<compile_context>
chip_gen: v7x
topology: tpu7x:2x2x1
jax: 0.10.0
libtpu: 0.0.40
codegen_flags: <defaults>
</compile_context>

<pallas_src>
from functools import partial

import numpy as np
import jax
import jax.numpy as jnp
from jax.experimental import pallas as pl
from jax.experimental.pallas import tpu as pltpu

NUM_PITCH_TYPES = 6  # len(PitchType) == 6 in the reference module

# Matmul weights, in kernel-argument order (biases are packed separately).
WEIGHT_ORDER = (
    "w_b1", "w_b2", "w_bl",
    "w_p1", "w_p2", "w_pl",
    "w_1a", "w_1b", "w_1c",
    "w_2", "w_3", "w_o",
    "biases",
)

# Packed-bias layout: name -> (lane offset, width) in one (1, 2048) f32 array.
# Offsets are 128-aligned so in-kernel slices need no lane rotation.
BIAS_SLOTS = {
    "b_b1": (0, 576),     # conv1 bias tiled over the 9 spatial positions
    "b_b2": (640, 128),
    "b_bl": (768, 128),
    "b_p1": (896, 288),
    "b_p2": (1280, 64),
    "b_pl": (1408, 64),
    "b_1":  (1536, 128),
    "b_2":  (1664, 64),
    "b_3":  (1792, 32),
    "b_o":  (1920, 1),
}
BIAS_TOTAL = 2048


# --------------------------------------------------------------------------
# Pallas kernel: whole forward pass for one batch tile, weights VMEM-resident.
# --------------------------------------------------------------------------
def batter_swings_kernel(
    bat_ref, pit_ref, scal_ref,
    w_b1, w_b2, w_bl,
    w_p1, w_p2, w_pl,
    w_1a, w_1b, w_1c,
    w_2, w_3, w_o,
    biases_ref,
    out_ref,
):
    f32 = jnp.float32
    mxu_dt = w_b1.dtype  # bf16 (MXU operand dtype)

    def mm(a, w_ref):
        return jnp.dot(a, w_ref[...], preferred_element_type=f32)

    def relu_cast(x):
        # bias add / relu in f32 (v5e VPU has no bf16); cast only the MXU input.
        return jnp.maximum(x, 0.0).astype(mxu_dt)

    def bias(name):
        off, width = BIAS_SLOTS[name]
        return biases_ref[:, off:off + width]          # (1, width) f32

    # ---- batter branch: conv1 (Toeplitz) -> conv2 (tap-stacked) -> linear
    # (b_dropout_1 / b_dropout_2 are identity at inference)
    h = relu_cast(mm(bat_ref[...], w_b1) + bias("b_b1"))   # [tn, 9*64]
    bat = relu_cast(mm(h, w_b2) + bias("b_b2"))             # [tn, 128]
    bat = relu_cast(mm(bat, w_bl) + bias("b_bl"))           # [tn, 128]

    # ---- pitch branch: same structure, smaller channels
    h = relu_cast(mm(pit_ref[...], w_p1) + bias("b_p1"))    # [tn, 9*32]
    pit = relu_cast(mm(h, w_p2) + bias("b_p2"))              # [tn, 64]
    pit = relu_cast(mm(pit, w_pl) + bias("b_pl"))            # [tn, 64]

    # ---- head MLP: concat(batter, pitch, 7 scalars) folded into split matmuls.
    # Scalar part: one K=8 MXU pass (scalars pre-padded 7->8, exact in bf16).
    z = mm(bat, w_1a) + mm(pit, w_1b) + mm(scal_ref[...], w_1c) + bias("b_1")
    h = relu_cast(z)                                         # [tn, 128]
    h = relu_cast(mm(h, w_2) + bias("b_2"))                  # [tn, 64]
    h3 = jnp.maximum(mm(h, w_3) + bias("b_3"), 0.0)          # [tn, 32] f32

    # Output layer (K=32, N=1): VPU multiply + XLU row reduce, not the MXU.
    logits = jnp.sum(h3 * w_o[...], axis=-1, keepdims=True) + bias("b_o")
    # Stable enough: exp overflow for very negative logits -> inf -> 0.0 (correct limit).
    out_ref[...] = 1.0 / (1.0 + jnp.exp(-logits))


# --------------------------------------------------------------------------
# Host-side weight packing (done once) and the pallas_call wrapper.
# --------------------------------------------------------------------------
def _toeplitz_conv1(w, in_hw=5):
    """Fold a VALID 3x3 conv on an in_hw x in_hw input into one matmul weight.

    w: [O, I, 3, 3] (PyTorch OIHW).  Returns [I*in_hw*in_hw, 9*O] so that
    flat(x)[N, I*25] @ W gives the conv output at all 9 spatial positions,
    column index = p*O + o with p = oi*3 + oj (matches _stack_conv2 rows).
    """
    w = np.asarray(w)
    o, i, kh, kw = w.shape
    oh, ow = in_hw - kh + 1, in_hw - kw + 1
    wt = np.transpose(w, (1, 2, 3, 0))  # [I, KH, KW, O]
    mat = np.zeros((i, in_hw, in_hw, oh * ow, o), w.dtype)
    for oi in range(oh):
        for oj in range(ow):
            mat[:, oi:oi + kh, oj:oj + kw, oi * ow + oj, :] = wt
    return mat.reshape(i * in_hw * in_hw, oh * ow * o)


def _stack_conv2(w):
    """[O, I, 3, 3] conv (3x3 -> 1x1) -> [9*I, O] with row index p*I + i."""
    w = np.asarray(w)
    return np.transpose(w, (2, 3, 1, 0)).reshape(9 * w.shape[1], w.shape[0])


def _pack_biases(params):
    buf = np.zeros((1, BIAS_TOTAL), np.float32)
    vals = {
        "b_b1": np.tile(np.asarray(params["b_conv_1_b"], np.float32), 9),
        "b_b2": np.asarray(params["b_conv_2_b"], np.float32),
        "b_bl": np.asarray(params["b_linear_b"], np.float32),
        "b_p1": np.tile(np.asarray(params["pitch_conv_1_b"], np.float32), 9),
        "b_p2": np.asarray(params["pitch_conv_2_b"], np.float32),
        "b_pl": np.asarray(params["pitch_linear_b"], np.float32),
        "b_1": np.asarray(params["linear_1_b"], np.float32),
        "b_2": np.asarray(params["linear_2_b"], np.float32),
        "b_3": np.asarray(params["linear_3_b"], np.float32),
        "b_o": np.asarray(params["output_b"], np.float32),
    }
    for name, (off, width) in BIAS_SLOTS.items():
        v = vals[name].reshape(-1)
        assert v.shape == (width,), (name, v.shape, width)
        buf[0, off:off + width] = v
    return buf


def pack_params(params, mxu_dtype=jnp.bfloat16):
    """Reshape PyTorch-layout params into matmul form; cast MXU operands."""
    w1 = np.asarray(params["linear_1_w"], np.float32)  # [199, 128] (in, out)
    w1c = np.concatenate([w1[192:], np.zeros((1, 128), np.float32)], axis=0)  # 7->8
    packed = {
        "w_b1": _toeplitz_conv1(params["b_conv_1_w"]),
        "w_b2": _stack_conv2(params["b_conv_2_w"]),
        "w_bl": np.asarray(params["b_linear_w"]),
        "w_p1": _toeplitz_conv1(params["pitch_conv_1_w"]),
        "w_p2": _stack_conv2(params["pitch_conv_2_w"]),
        "w_pl": np.asarray(params["pitch_linear_w"]),
        "w_1a": w1[:128],           # batter part of linear_1
        "w_1b": w1[128:192],        # pitch part
        "w_1c": w1c,                # scalar part, K padded 7 -> 8
        "w_2": np.asarray(params["linear_2_w"]),
        "w_3": np.asarray(params["linear_3_w"]),
        "w_o": np.asarray(params["output_w"], np.float32).reshape(1, 32),  # VPU row
        "biases": _pack_biases(params),
    }
    mxu_keys = {"w_b1", "w_b2", "w_bl", "w_p1", "w_p2", "w_pl",
                "w_1a", "w_1b", "w_1c", "w_2", "w_3"}
    return {k: jnp.asarray(v, mxu_dtype if k in mxu_keys else jnp.float32)
            for k, v in packed.items()}


def _choose_tile(n, max_tile):
    """Pick a batch tile: avoid padding, keep >=2 grid steps when possible."""
    max_tile = max(128, (int(max_tile) // 128) * 128)
    if n <= max_tile:
        if n % 256 == 0 and n >= 256:
            return n // 2            # two 128-multiple tiles -> both v7x TCs
        return n                     # one exact tile, no padding
    for t in range(max_tile, 127, -128):
        if n % t == 0:
            return t                 # largest 128-multiple tile dividing n
    return max_tile                  # ragged batch: minimal pad in the wrapper


@partial(jax.jit, static_argnames=("tile_n",))
def batter_swings_forward(packed, batter, pitch, strikes, balls, num_runs,
                          num_outs, on_first, on_second, on_third, tile_n=1024):
    n = batter.shape[0]
    tn = _choose_tile(n, tile_n)

    # Flattened 5x5 images (no im2col blow-up); bf16 MXU operands.
    bat_flat = batter.reshape(n, -1).astype(jnp.bfloat16)   # [N, 12*25]
    pit_flat = pitch.reshape(n, -1).astype(jnp.bfloat16)    # [N, 6*25]
    # Scalars padded 7 -> 8 lanes (zero column); bf16 is exact for these values.
    scal = jnp.stack([strikes, balls, num_runs, num_outs,
                      on_first, on_second, on_third,
                      jnp.zeros_like(strikes)], axis=1).astype(jnp.bfloat16)

    n_pad = pl.cdiv(n, tn) * tn
    pad = n_pad - n
    if pad:  # only for ragged batches _choose_tile could not divide
        bat_flat = jnp.pad(bat_flat, ((0, pad), (0, 0)))
        pit_flat = jnp.pad(pit_flat, ((0, pad), (0, 0)))
        scal = jnp.pad(scal, ((0, pad), (0, 0)))

    weights = tuple(packed[k] for k in WEIGHT_ORDER)

    data_specs = [
        pl.BlockSpec((tn, bat_flat.shape[1]), lambda i: (i, 0)),
        pl.BlockSpec((tn, pit_flat.shape[1]), lambda i: (i, 0)),
        pl.BlockSpec((tn, scal.shape[1]), lambda i: (i, 0)),
    ]
    # Constant index_map -> weights stay resident in VMEM across grid steps.
    weight_specs = [pl.BlockSpec(w.shape, lambda i: (0, 0)) for w in weights]

    out = pl.pallas_call(
        batter_swings_kernel,
        out_shape=jax.ShapeDtypeStruct((n_pad, 1), jnp.float32),
        grid=(n_pad // tn,),
        in_specs=data_specs + weight_specs,
        out_specs=pl.BlockSpec((tn, 1), lambda i: (i, 0)),
        compiler_params=pltpu.CompilerParams(
            dimension_semantics=("parallel",),
            vmem_limit_bytes=32 * 1024 * 1024),
    )(bat_flat, pit_flat, scal, *weights)
    return out[:n]


# --------------------------------------------------------------------------
# Deterministic synthetic parameters (shapes match the nn.Module __init__).
# --------------------------------------------------------------------------
def init_params(key):
    keys = iter(jax.random.split(key, 32))

    def rnd(shape, fan_in):
        return (jax.random.normal(next(keys), shape, jnp.float32)
                / jnp.sqrt(jnp.float32(fan_in)))

    p = {}
    p["b_conv_1_w"] = rnd((64, 2 * NUM_PITCH_TYPES, 3, 3), 2 * NUM_PITCH_TYPES * 9)
    p["b_conv_1_b"] = rnd((64,), 64)
    p["b_conv_2_w"] = rnd((128, 64, 3, 3), 64 * 9)
    p["b_conv_2_b"] = rnd((128,), 128)
    p["b_linear_w"] = rnd((128, 128), 128)          # stored [in, out]
    p["b_linear_b"] = rnd((128,), 128)
    p["pitch_conv_1_w"] = rnd((32, NUM_PITCH_TYPES, 3, 3), NUM_PITCH_TYPES * 9)
    p["pitch_conv_1_b"] = rnd((32,), 32)
    p["pitch_conv_2_w"] = rnd((64, 32, 3, 3), 32 * 9)
    p["pitch_conv_2_b"] = rnd((64,), 64)
    p["pitch_linear_w"] = rnd((64, 64), 64)
    p["pitch_linear_b"] = rnd((64,), 64)
    p["linear_1_w"] = rnd((128 + 64 + 7, 128), 128 + 64 + 7)
    p["linear_1_b"] = rnd((128,), 128)
    p["linear_2_w"] = rnd((128, 64), 128)
    p["linear_2_b"] = rnd((64,), 64)
    p["linear_3_w"] = rnd((64, 32), 64)
    p["linear_3_b"] = rnd((32,), 32)
    p["output_w"] = rnd((32, 1), 32)
    p["output_b"] = rnd((1,), 1)
    return p


# --------------------------------------------------------------------------
# Pure-JAX f32 reference (mirrors the PyTorch forward, dropout = identity).
# --------------------------------------------------------------------------
def reference_forward(params, batter, pitch, strikes, balls, num_runs,
                      num_outs, on_first, on_second, on_third):
    def conv(x, w, b):
        y = jax.lax.conv_general_dilated(
            x, w, window_strides=(1, 1), padding="VALID",
            dimension_numbers=("NCHW", "OIHW", "NCHW"))
        return y + b[None, :, None, None]

    relu = jax.nn.relu
    bat = relu(conv(batter, params["b_conv_1_w"], params["b_conv_1_b"]))
    bat = relu(conv(bat, params["b_conv_2_w"], params["b_conv_2_b"]))
    bat = bat.reshape(bat.shape[0], -1)
    bat = relu(bat @ params["b_linear_w"] + params["b_linear_b"])
    pit = relu(conv(pitch, params["pitch_conv_1_w"], params["pitch_conv_1_b"]))
    pit = relu(conv(pit, params["pitch_conv_2_w"], params["pitch_conv_2_b"]))
    pit = pit.reshape(pit.shape[0], -1)
    pit = relu(pit @ params["pitch_linear_w"] + params["pitch_linear_b"])
    scal = jnp.stack([strikes, balls, num_runs, num_outs,
                      on_first, on_second, on_third], axis=1)
    x = jnp.concatenate([bat, pit, scal], axis=1)
    x = relu(x @ params["linear_1_w"] + params["linear_1_b"])
    x = relu(x @ params["linear_2_w"] + params["linear_2_b"])
    x = relu(x @ params["linear_3_w"] + params["linear_3_b"])
    return jax.nn.sigmoid(x @ params["output_w"] + params["output_b"])


if __name__ == "__main__":
    key = jax.random.PRNGKey(0)
    pkey, dkey = jax.random.split(key)
    params = init_params(pkey)
    packed = pack_params(params)   # one-time host-side weight packing

    N = 256                        # small demo batch; adaptive tile -> 2 grid steps
    ks = jax.random.split(dkey, 9)
    batter = jax.random.normal(ks[0], (N, 2 * NUM_PITCH_TYPES, 5, 5), jnp.float32)
    pitch = jax.random.normal(ks[1], (N, NUM_PITCH_TYPES, 5, 5), jnp.float32)
    strikes = jax.random.randint(ks[2], (N,), 0, 3).astype(jnp.float32)
    balls = jax.random.randint(ks[3], (N,), 0, 4).astype(jnp.float32)
    num_runs = jax.random.randint(ks[4], (N,), 0, 5).astype(jnp.float32)
    num_outs = jax.random.randint(ks[5], (N,), 0, 3).astype(jnp.float32)
    on_first = jax.random.bernoulli(ks[6], 0.5, (N,)).astype(jnp.float32)
    on_second = jax.random.bernoulli(ks[7], 0.5, (N,)).astype(jnp.float32)
    on_third = jax.random.bernoulli(ks[8], 0.5, (N,)).astype(jnp.float32)

    out = batter_swings_forward(packed, batter, pitch, strikes, balls,
                                num_runs, num_outs, on_first, on_second,
                                on_third)
    out = jax.block_until_ready(out)

    ref = reference_forward(params, batter, pitch, strikes, balls,
                            num_runs, num_outs, on_first, on_second, on_third)
    assert out.shape == (N, 1) and out.dtype == jnp.float32
    # bf16 MXU operands with f32 accumulation vs pure-f32 reference.
    max_err = float(jnp.max(jnp.abs(out - ref)))
    assert jnp.allclose(out, ref, atol=2e-2, rtol=2e-2), (max_err, out[:4], ref[:4])
    print("KERNEL_OK")
</pallas_src>

<mosaic_0001>
module attributes {stable_mosaic.version = 11 : i64} {
  func.func @batter_swings_kernel(%arg0: i32, %arg1: memref<128x300xbf16, #tpu.memory_space<vmem>>, %arg2: memref<128x150xbf16, #tpu.memory_space<vmem>>, %arg3: memref<128x8xbf16, #tpu.memory_space<vmem>>, %arg4: memref<300x576xbf16, #tpu.memory_space<vmem>>, %arg5: memref<576x128xbf16, #tpu.memory_space<vmem>>, %arg6: memref<128x128xbf16, #tpu.memory_space<vmem>>, %arg7: memref<150x288xbf16, #tpu.memory_space<vmem>>, %arg8: memref<288x64xbf16, #tpu.memory_space<vmem>>, %arg9: memref<64x64xbf16, #tpu.memory_space<vmem>>, %arg10: memref<128x128xbf16, #tpu.memory_space<vmem>>, %arg11: memref<64x128xbf16, #tpu.memory_space<vmem>>, %arg12: memref<8x128xbf16, #tpu.memory_space<vmem>>, %arg13: memref<128x64xbf16, #tpu.memory_space<vmem>>, %arg14: memref<64x32xbf16, #tpu.memory_space<vmem>>, %arg15: memref<1x32xf32, #tpu.memory_space<vmem>>, %arg16: memref<1x2048xf32, #tpu.memory_space<vmem>>, %arg17: memref<128x1xf32, #tpu.memory_space<vmem>>) attributes {dimension_semantics = [#tpu.dimension_semantics<parallel>], iteration_bounds = array<i64: 2>, scalar_prefetch = 0 : i64, scratch_operands = 0 : i64, tpu.core_type = #tpu.core_type<tc>, window_params = [{transform_indices = @transform_0, window_bounds = array<i64: 128, 300>}, {transform_indices = @transform_1, window_bounds = array<i64: 128, 150>}, {transform_indices = @transform_2, window_bounds = array<i64: 128, 8>}, {pipeline_mode = #tpu.pipeline_mode<synchronous>, transform_indices = @transform_3, window_bounds = array<i64: 300, 576>}, {pipeline_mode = #tpu.pipeline_mode<synchronous>, transform_indices = @transform_4, window_bounds = array<i64: 576, 128>}, {pipeline_mode = #tpu.pipeline_mode<synchronous>, transform_indices = @transform_5, window_bounds = array<i64: 128, 128>}, {pipeline_mode = #tpu.pipeline_mode<synchronous>, transform_indices = @transform_6, window_bounds = array<i64: 150, 288>}, {pipeline_mode = #tpu.pipeline_mode<synchronous>, transform_indices = @transform_7, window_bounds = array<i64: 288, 64>}, {pipeline_mode = #tpu.pipeline_mode<synchronous>, transform_indices = @transform_8, window_bounds = array<i64: 64, 64>}, {pipeline_mode = #tpu.pipeline_mode<synchronous>, transform_indices = @transform_9, window_bounds = array<i64: 128, 128>}, {pipeline_mode = #tpu.pipeline_mode<synchronous>, transform_indices = @transform_10, window_bounds = array<i64: 64, 128>}, {pipeline_mode = #tpu.pipeline_mode<synchronous>, transform_indices = @transform_11, window_bounds = array<i64: 8, 128>}, {pipeline_mode = #tpu.pipeline_mode<synchronous>, transform_indices = @transform_12, window_bounds = array<i64: 128, 64>}, {pipeline_mode = #tpu.pipeline_mode<synchronous>, transform_indices = @transform_13, window_bounds = array<i64: 64, 32>}, {pipeline_mode = #tpu.pipeline_mode<synchronous>, transform_indices = @transform_14, window_bounds = array<i64: 1, 32>}, {pipeline_mode = #tpu.pipeline_mode<synchronous>, transform_indices = @transform_15, window_bounds = array<i64: 1, 2048>}, {transform_indices = @transform_16, window_bounds = array<i64: 128, 1>}]} {
    %c0 = arith.constant 0 : index
    %c0_0 = arith.constant 0 : index
    %0 = vector.load %arg1[%c0, %c0_0] : memref<128x300xbf16, #tpu.memory_space<vmem>>, vector<128x300xbf16>
    %c0_1 = arith.constant 0 : index
    %c0_2 = arith.constant 0 : index
    %1 = vector.load %arg4[%c0_1, %c0_2] : memref<300x576xbf16, #tpu.memory_space<vmem>>, vector<300x576xbf16>
    %cst = arith.constant dense<0.000000e+00> : vector<128x576xf32>
    %2 = tpu.matmul %0, %1, %cst {dimension_numbers = #tpu.dot_dimension_numbers<[1], [0], [0], [1], [0, 0, 1, 1], [], []>} : vector<128x300xbf16>, vector<300x576xbf16>, vector<128x576xf32> -> vector<128x576xf32>
    %c0_3 = arith.constant 0 : index
    %c0_4 = arith.constant 0 : index
    %3 = vector.load %arg16[%c0_3, %c0_4] : memref<1x2048xf32, #tpu.memory_space<vmem>>, vector<1x576xf32>
    %4 = vector.broadcast %3 : vector<1x576xf32> to vector<128x576xf32>
    %5 = arith.addf %2, %4 : vector<128x576xf32>
    %cst_5 = arith.constant 0.000000e+00 : f32
    %6 = vector.broadcast %cst_5 : f32 to vector<128x576xf32>
    %7 = arith.maximumf %5, %6 : vector<128x576xf32>
    %8 = arith.truncf %7 : vector<128x576xf32> to vector<128x576xbf16>
    %c0_6 = arith.constant 0 : index
    %c0_7 = arith.constant 0 : index
    %9 = vector.load %arg5[%c0_6, %c0_7] : memref<576x128xbf16, #tpu.memory_space<vmem>>, vector<576x128xbf16>
    %cst_8 = arith.constant dense<0.000000e+00> : vector<128x128xf32>
    %10 = tpu.matmul %8, %9, %cst_8 {dimension_numbers = #tpu.dot_dimension_numbers<[1], [0], [0], [1], [0, 0, 1, 1], [], []>} : vector<128x576xbf16>, vector<576x128xbf16>, vector<128x128xf32> -> vector<128x128xf32>
    %c0_9 = arith.constant 0 : index
    %c640 = arith.constant 640 : index
    %11 = vector.load %arg16[%c0_9, %c640] : memref<1x2048xf32, #tpu.memory_space<vmem>>, vector<1x128xf32>
    %12 = vector.broadcast %11 : vector<1x128xf32> to vector<128x128xf32>
    %13 = arith.addf %10, %12 : vector<128x128xf32>
    %cst_10 = arith.constant 0.000000e+00 : f32
    %14 = vector.broadcast %cst_10 : f32 to vector<128x128xf32>
    %15 = arith.maximumf %13, %14 : vector<128x128xf32>
    %16 = arith.truncf %15 : vector<128x128xf32> to vector<128x128xbf16>
    %c0_11 = arith.constant 0 : index
    %c0_12 = arith.constant 0 : index
    %17 = vector.load %arg6[%c0_11, %c0_12] : memref<128x128xbf16, #tpu.memory_space<vmem>>, vector<128x128xbf16>
    %cst_13 = arith.constant dense<0.000000e+00> : vector<128x128xf32>
    %18 = tpu.matmul %16, %17, %cst_13 {dimension_numbers = #tpu.dot_dimension_numbers<[1], [0], [0], [1], [0, 0, 1, 1], [], []>} : vector<128x128xbf16>, vector<128x128xbf16>, vector<128x128xf32> -> vector<128x128xf32>
    %c0_14 = arith.constant 0 : index
    %c768 = arith.constant 768 : index
    %19 = vector.load %arg16[%c0_14, %c768] : memref<1x2048xf32, #tpu.memory_space<vmem>>, vector<1x128xf32>
    %20 = vector.broadcast %19 : vector<1x128xf32> to vector<128x128xf32>
    %21 = arith.addf %18, %20 : vector<128x128xf32>
    %cst_15 = arith.constant 0.000000e+00 : f32
    %22 = vector.broadcast %cst_15 : f32 to vector<128x128xf32>
    %23 = arith.maximumf %21, %22 : vector<128x128xf32>
    %24 = arith.truncf %23 : vector<128x128xf32> to vector<128x128xbf16>
    %c0_16 = arith.constant 0 : index
    %c0_17 = arith.constant 0 : index
    %25 = vector.load %arg2[%c0_16, %c0_17] : memref<128x150xbf16, #tpu.memory_space<vmem>>, vector<128x150xbf16>
    %c0_18 = arith.constant 0 : index
    %c0_19 = arith.constant 0 : index
    %26 = vector.load %arg7[%c0_18, %c0_19] : memref<150x288xbf16, #tpu.memory_space<vmem>>, vector<150x288xbf16>
    %cst_20 = arith.constant dense<0.000000e+00> : vector<128x288xf32>
    %27 = tpu.matmul %25, %26, %cst_20 {dimension_numbers = #tpu.dot_dimension_numbers<[1], [0], [0], [1], [0, 0, 1, 1], [], []>} : vector<128x150xbf16>, vector<150x288xbf16>, vector<128x288xf32> -> vector<128x288xf32>
    %c0_21 = arith.constant 0 : index
    %c896 = arith.constant 896 : index
    %28 = vector.load %arg16[%c0_21, %c896] : memref<1x2048xf32, #tpu.memory_space<vmem>>, vector<1x288xf32>
    %29 = vector.broadcast %28 : vector<1x288xf32> to vector<128x288xf32>
    %30 = arith.addf %27, %29 : vector<128x288xf32>
    %cst_22 = arith.constant 0.000000e+00 : f32
    %31 = vector.broadcast %cst_22 : f32 to vector<128x288xf32>
    %32 = arith.maximumf %30, %31 : vector<128x288xf32>
    %33 = arith.truncf %32 : vector<128x288xf32> to vector<128x288xbf16>
    %c0_23 = arith.constant 0 : index
    %c0_24 = arith.constant 0 : index
    %34 = vector.load %arg8[%c0_23, %c0_24] : memref<288x64xbf16, #tpu.memory_space<vmem>>, vector<288x64xbf16>
    %cst_25 = arith.constant dense<0.000000e+00> : vector<128x64xf32>
    %35 = tpu.matmul %33, %34, %cst_25 {dimension_numbers = #tpu.dot_dimension_numbers<[1], [0], [0], [1], [0, 0, 1, 1], [], []>} : vector<128x288xbf16>, vector<288x64xbf16>, vector<128x64xf32> -> vector<128x64xf32>
    %c0_26 = arith.constant 0 : index
    %c1280 = arith.constant 1280 : index
    %36 = vector.load %arg16[%c0_26, %c1280] : memref<1x2048xf32, #tpu.memory_space<vmem>>, vector<1x64xf32>
    %37 = vector.broadcast %36 : vector<1x64xf32> to vector<128x64xf32>
    %38 = arith.addf %35, %37 : vector<128x64xf32>
    %cst_27 = arith.constant 0.000000e+00 : f32
    %39 = vector.broadcast %cst_27 : f32 to vector<128x64xf32>
    %40 = arith.maximumf %38, %39 : vector<128x64xf32>
    %41 = arith.truncf %40 : vector<128x64xf32> to vector<128x64xbf16>
    %c0_28 = arith.constant 0 : index
    %c0_29 = arith.constant 0 : index
    %42 = vector.load %arg9[%c0_28, %c0_29] : memref<64x64xbf16, #tpu.memory_space<vmem>>, vector<64x64xbf16>
    %cst_30 = arith.constant dense<0.000000e+00> : vector<128x64xf32>
    %43 = tpu.matmul %41, %42, %cst_30 {dimension_numbers = #tpu.dot_dimension_numbers<[1], [0], [0], [1], [0, 0, 1, 1], [], []>} : vector<128x64xbf16>, vector<64x64xbf16>, vector<128x64xf32> -> vector<128x64xf32>
    %c0_31 = arith.constant 0 : index
    %c1408 = arith.constant 1408 : index
    %44 = vector.load %arg16[%c0_31, %c1408] : memref<1x2048xf32, #tpu.memory_space<vmem>>, vector<1x64xf32>
    %45 = vector.broadcast %44 : vector<1x64xf32> to vector<128x64xf32>
    %46 = arith.addf %43, %45 : vector<128x64xf32>
    %cst_32 = arith.constant 0.000000e+00 : f32
    %47 = vector.broadcast %cst_32 : f32 to vector<128x64xf32>
    %48 = arith.maximumf %46, %47 : vector<128x64xf32>
    %49 = arith.truncf %48 : vector<128x64xf32> to vector<128x64xbf16>
    %c0_33 = arith.constant 0 : index
    %c0_34 = arith.constant 0 : index
    %50 = vector.load %arg10[%c0_33, %c0_34] : memref<128x128xbf16, #tpu.memory_space<vmem>>, vector<128x128xbf16>
    %cst_35 = arith.constant dense<0.000000e+00> : vector<128x128xf32>
    %51 = tpu.matmul %24, %50, %cst_35 {dimension_numbers = #tpu.dot_dimension_numbers<[1], [0], [0], [1], [0, 0, 1, 1], [], []>} : vector<128x128xbf16>, vector<128x128xbf16>, vector<128x128xf32> -> vector<128x128xf32>
    %c0_36 = arith.constant 0 : index
    %c0_37 = arith.constant 0 : index
    %52 = vector.load %arg11[%c0_36, %c0_37] : memref<64x128xbf16, #tpu.memory_space<vmem>>, vector<64x128xbf16>
    %cst_38 = arith.constant dense<0.000000e+00> : vector<128x128xf32>
    %53 = tpu.matmul %49, %52, %cst_38 {dimension_numbers = #tpu.dot_dimension_numbers<[1], [0], [0], [1], [0, 0, 1, 1], [], []>} : vector<128x64xbf16>, vector<64x128xbf16>, vector<128x128xf32> -> vector<128x128xf32>
    %54 = arith.addf %51, %53 : vector<128x128xf32>
    %c0_39 = arith.constant 0 : index
    %c0_40 = arith.constant 0 : index
    %55 = vector.load %arg3[%c0_39, %c0_40] : memref<128x8xbf16, #tpu.memory_space<vmem>>, vector<128x8xbf16>
    %c0_41 = arith.constant 0 : index
    %c0_42 = arith.constant 0 : index
    %56 = vector.load %arg12[%c0_41, %c0_42] : memref<8x128xbf16, #tpu.memory_space<vmem>>, vector<8x128xbf16>
    %cst_43 = arith.constant dense<0.000000e+00> : vector<128x128xf32>
    %57 = tpu.matmul %55, %56, %cst_43 {dimension_numbers = #tpu.dot_dimension_numbers<[1], [0], [0], [1], [0, 0, 1, 1], [], []>} : vector<128x8xbf16>, vector<8x128xbf16>, vector<128x128xf32> -> vector<128x128xf32>
    %58 = arith.addf %54, %57 : vector<128x128xf32>
    %c0_44 = arith.constant 0 : index
    %c1536 = arith.constant 1536 : index
    %59 = vector.load %arg16[%c0_44, %c1536] : memref<1x2048xf32, #tpu.memory_space<vmem>>, vector<1x128xf32>
    %60 = vector.broadcast %59 : vector<1x128xf32> to vector<128x128xf32>
    %61 = arith.addf %58, %60 : vector<128x128xf32>
    %cst_45 = arith.constant 0.000000e+00 : f32
    %62 = vector.broadcast %cst_45 : f32 to vector<128x128xf32>
    %63 = arith.maximumf %61, %62 : vector<128x128xf32>
    %64 = arith.truncf %63 : vector<128x128xf32> to vector<128x128xbf16>
    %c0_46 = arith.constant 0 : index
    %c0_47 = arith.constant 0 : index
    %65 = vector.load %arg13[%c0_46, %c0_47] : memref<128x64xbf16, #tpu.memory_space<vmem>>, vector<128x64xbf16>
    %cst_48 = arith.constant dense<0.000000e+00> : vector<128x64xf32>
    %66 = tpu.matmul %64, %65, %cst_48 {dimension_numbers = #tpu.dot_dimension_numbers<[1], [0], [0], [1], [0, 0, 1, 1], [], []>} : vector<128x128xbf16>, vector<128x64xbf16>, vector<128x64xf32> -> vector<128x64xf32>
    %c0_49 = arith.constant 0 : index
    %c1664 = arith.constant 1664 : index
    %67 = vector.load %arg16[%c0_49, %c1664] : memref<1x2048xf32, #tpu.memory_space<vmem>>, vector<1x64xf32>
    %68 = vector.broadcast %67 : vector<1x64xf32> to vector<128x64xf32>
    %69 = arith.addf %66, %68 : vector<128x64xf32>
    %cst_50 = arith.constant 0.000000e+00 : f32
    %70 = vector.broadcast %cst_50 : f32 to vector<128x64xf32>
    %71 = arith.maximumf %69, %70 : vector<128x64xf32>
    %72 = arith.truncf %71 : vector<128x64xf32> to vector<128x64xbf16>
    %c0_51 = arith.constant 0 : index
    %c0_52 = arith.constant 0 : index
    %73 = vector.load %arg14[%c0_51, %c0_52] : memref<64x32xbf16, #tpu.memory_space<vmem>>, vector<64x32xbf16>
    %cst_53 = arith.constant dense<0.000000e+00> : vector<128x32xf32>
    %74 = tpu.matmul %72, %73, %cst_53 {dimension_numbers = #tpu.dot_dimension_numbers<[1], [0], [0], [1], [0, 0, 1, 1], [], []>} : vector<128x64xbf16>, vector<64x32xbf16>, vector<128x32xf32> -> vector<128x32xf32>
    %c0_54 = arith.constant 0 : index
    %c1792 = arith.constant 1792 : index
    %75 = vector.load %arg16[%c0_54, %c1792] : memref<1x2048xf32, #tpu.memory_space<vmem>>, vector<1x32xf32>
    %76 = vector.broadcast %75 : vector<1x32xf32> to vector<128x32xf32>
    %77 = arith.addf %74, %76 : vector<128x32xf32>
    %cst_55 = arith.constant 0.000000e+00 : f32
    %78 = vector.broadcast %cst_55 : f32 to vector<128x32xf32>
    %79 = arith.maximumf %77, %78 : vector<128x32xf32>
    %c0_56 = arith.constant 0 : index
    %c0_57 = arith.constant 0 : index
    %80 = vector.load %arg15[%c0_56, %c0_57] : memref<1x32xf32, #tpu.memory_space<vmem>>, vector<1x32xf32>
    %81 = vector.broadcast %80 : vector<1x32xf32> to vector<128x32xf32>
    %82 = arith.mulf %79, %81 : vector<128x32xf32>
    %cst_58 = arith.constant dense<0.000000e+00> : vector<128xf32>
    %83 = vector.multi_reduction <add>, %82, %cst_58 [1] : vector<128x32xf32> to vector<128xf32>
    %84 = vector.shape_cast %83 : vector<128xf32> to vector<128x1xf32>
    %c0_59 = arith.constant 0 : index
    %c1920 = arith.constant 1920 : index
    %85 = vector.load %arg16[%c0_59, %c1920] : memref<1x2048xf32, #tpu.memory_space<vmem>>, vector<1x1xf32>
    %86 = vector.broadcast %85 : vector<1x1xf32> to vector<128x1xf32>
    %87 = arith.addf %84, %86 : vector<128x1xf32>
    %cst_60 = arith.constant 0.000000e+00 : f32
    %88 = vector.broadcast %cst_60 : f32 to vector<128x1xf32>
    %89 = arith.subf %88, %87 : vector<128x1xf32>
    %90 = math.exp %89 : vector<128x1xf32>
    %cst_61 = arith.constant 1.000000e+00 : f32
    %91 = vector.broadcast %cst_61 : f32 to vector<128x1xf32>
    %92 = arith.addf %91, %90 : vector<128x1xf32>
    %cst_62 = arith.constant 1.000000e+00 : f32
    %93 = vector.broadcast %cst_62 : f32 to vector<128x1xf32>
    %94 = arith.divf %93, %92 : vector<128x1xf32>
    %c0_63 = arith.constant 0 : index
    %c0_64 = arith.constant 0 : index
    %95 = vector.load %arg17[%c0_63, %c0_64] : memref<128x1xf32, #tpu.memory_space<vmem>>, vector<128x1xf32>
    tpu.vector_store %arg17[%c0_63, %c0_64], %94 {strides = array<i32>} : memref<128x1xf32, #tpu.memory_space<vmem>>, vector<128x1xf32>,
    return
  }
  func.func @transform_0(%arg0: i32) -> (i32, i32) {
    %c0_i32 = arith.constant 0 : i32
    %c0_i32_0 = arith.constant 0 : i32
    return %arg0, %c0_i32 : i32, i32
  }
  func.func @transform_1(%arg0: i32) -> (i32, i32) {
    %c0_i32 = arith.constant 0 : i32
    %c0_i32_0 = arith.constant 0 : i32
    return %arg0, %c0_i32 : i32, i32
  }
  func.func @transform_2(%arg0: i32) -> (i32, i32) {
    %c0_i32 = arith.constant 0 : i32
    %c0_i32_0 = arith.constant 0 : i32
    return %arg0, %c0_i32 : i32, i32
  }
  func.func @transform_3(%arg0: i32) -> (i32, i32) {
    %c0_i32 = arith.constant 0 : i32
    %c0_i32_0 = arith.constant 0 : i32
    %c0_i32_1 = arith.constant 0 : i32
    return %c0_i32, %c0_i32_0 : i32, i32
  }
  func.func @transform_4(%arg0: i32) -> (i32, i32) {
    %c0_i32 = arith.constant 0 : i32
    %c0_i32_0 = arith.constant 0 : i32
    %c0_i32_1 = arith.constant 0 : i32
    return %c0_i32, %c0_i32_0 : i32, i32
  }
  func.func @transform_5(%arg0: i32) -> (i32, i32) {
    %c0_i32 = arith.constant 0 : i32
    %c0_i32_0 = arith.constant 0 : i32
    %c0_i32_1 = arith.constant 0 : i32
    return %c0_i32, %c0_i32_0 : i32, i32
  }
  func.func @transform_6(%arg0: i32) -> (i32, i32) {
    %c0_i32 = arith.constant 0 : i32
    %c0_i32_0 = arith.constant 0 : i32
    %c0_i32_1 = arith.constant 0 : i32
    return %c0_i32, %c0_i32_0 : i32, i32
  }
  func.func @transform_7(%arg0: i32) -> (i32, i32) {
    %c0_i32 = arith.constant 0 : i32
    %c0_i32_0 = arith.constant 0 : i32
    %c0_i32_1 = arith.constant 0 : i32
    return %c0_i32, %c0_i32_0 : i32, i32
  }
  func.func @transform_8(%arg0: i32) -> (i32, i32) {
    %c0_i32 = arith.constant 0 : i32
    %c0_i32_0 = arith.constant 0 : i32
    %c0_i32_1 = arith.constant 0 : i32
    return %c0_i32, %c0_i32_0 : i32, i32
  }
  func.func @transform_9(%arg0: i32) -> (i32, i32) {
    %c0_i32 = arith.constant 0 : i32
    %c0_i32_0 = arith.constant 0 : i32
    %c0_i32_1 = arith.constant 0 : i32
    return %c0_i32, %c0_i32_0 : i32, i32
  }
  func.func @transform_10(%arg0: i32) -> (i32, i32) {
    %c0_i32 = arith.constant 0 : i32
    %c0_i32_0 = arith.constant 0 : i32
    %c0_i32_1 = arith.constant 0 : i32
    return %c0_i32, %c0_i32_0 : i32, i32
  }
  func.func @transform_11(%arg0: i32) -> (i32, i32) {
    %c0_i32 = arith.constant 0 : i32
    %c0_i32_0 = arith.constant 0 : i32
    %c0_i32_1 = arith.constant 0 : i32
    return %c0_i32, %c0_i32_0 : i32, i32
  }
  func.func @transform_12(%arg0: i32) -> (i32, i32) {
    %c0_i32 = arith.constant 0 : i32
    %c0_i32_0 = arith.constant 0 : i32
    %c0_i32_1 = arith.constant 0 : i32
    return %c0_i32, %c0_i32_0 : i32, i32
  }
  func.func @transform_13(%arg0: i32) -> (i32, i32) {
    %c0_i32 = arith.constant 0 : i32
    %c0_i32_0 = arith.constant 0 : i32
    %c0_i32_1 = arith.constant 0 : i32
    return %c0_i32, %c0_i32_0 : i32, i32
  }
  func.func @transform_14(%arg0: i32) -> (i32, i32) {
    %c0_i32 = arith.constant 0 : i32
    %c0_i32_0 = arith.constant 0 : i32
    %c0_i32_1 = arith.constant 0 : i32
    return %c0_i32, %c0_i32_0 : i32, i32
  }
  func.func @transform_15(%arg0: i32) -> (i32, i32) {
    %c0_i32 = arith.constant 0 : i32
    %c0_i32_0 = arith.constant 0 : i32
    %c0_i32_1 = arith.constant 0 : i32
    return %c0_i32, %c0_i32_0 : i32, i32
  }
  func.func @transform_16(%arg0: i32) -> (i32, i32) {
    %c0_i32 = arith.constant 0 : i32
    %c0_i32_0 = arith.constant 0 : i32
    return %arg0, %c0_i32 : i32, i32
  }
}

</mosaic_0001>

<bundles_post_ra>
// kernel: batter_swings_forward.1
= control target key start
LH: loop header
LB: loop body
LE: loop exit
PB: predicated region body
PF: predicated region fallthrough
CT: control target
= control target key end

     0   :  { %s7067_s21 = smov 0   ;;  %s8579_s0 = inlined_call_operand.vmem [shape: bf16[256,300], index: 0, kind: input, shape index: {}]   ;;  %s8580_s1 = inlined_call_operand.vmem [shape: bf16[256,150], index: 1, kind: input, shape index: {}]   ;;  %s8581_s2 = inlined_call_operand.vmem [shape: bf16[256,8], index: 2, kind: input, shape index: {}]   ;;  %s8582_s3 = inlined_call_operand.vmem [shape: bf16[300,576], index: 3, kind: input, shape index: {}]   ;;  %s8583_s4 = inlined_call_operand.vmem [shape: bf16[576,128], index: 4, kind: input, shape index: {}]   ;;  %s8584_s5 = inlined_call_operand.vmem [shape: bf16[128,128], index: 5, kind: input, shape index: {}]   ;;  %s8585_s6 = inlined_call_operand.vmem [shape: bf16[150,288], index: 6, kind: input, shape index: {}]   ;;  %s8586_s7 = inlined_call_operand.vmem [shape: bf16[288,64], index: 7, kind: input, shape index: {}]   ;;  %s8587_s8 = inlined_call_operand.vmem [shape: bf16[64,64], index: 8, kind: input, shape index: {}]   ;;  %s8588_s9 = inlined_call_operand.vmem [shape: bf16[128,128], index: 9, kind: input, shape index: {}]   ;;  %s8589_s10 = inlined_call_operand.vmem [shape: bf16[64,128], index: 10, kind: input, shape index: {}]   ;;  %s8590_s11 = inlined_call_operand.vmem [shape: bf16[8,128], index: 11, kind: input, shape index: {}]   ;;  %s8591_s12 = inlined_call_operand.vmem [shape: bf16[128,64], index: 12, kind: input, shape index: {}]   ;;  %s8592_s13 = inlined_call_operand.vmem [shape: bf16[64,32], index: 13, kind: input, shape index: {}]   ;;  %s8593_s14 = inlined_call_operand.vmem [shape: f32[1,32], index: 14, kind: input, shape index: {}]   ;;  %s8594_s15 = inlined_call_operand.vmem [shape: f32[1,2048], index: 15, kind: input, shape index: {}]   ;;  %s8595_s16 = inlined_call_operand.vmem [shape: f32[256,1], index: 16, kind: output, shape index: {}]  }
   0x1   :  { %8596 = sst [smem:[#allocation2_spill]] %s8579_s0 }
   0x2 LB: > { %s5397_s22 = sadd.s32 4294967295, %s6979_s21   ;;  %p5401_p0 = scmp.ge.s32.totalorder %s6979_s21, 1  ;;  %s6979_s21 = sphi %s7067_s21, %s26_s21  }
   0x3   : > { %p487_p1 = scmp.lt.s32.totalorder %s6979_s21, 3 }
   0x5   : > { %p488_p2 = pnand %p5401_p0, %p487_p1 }
   0x6   : > { %v6583_v0 = vld [vmem:[%s8582_s3 + $0x4] ss:$20 sps:$4 sm:$0xff] (!%p488_p2)   ;;  %v6585_v1 = vld [vmem:[%s8582_s3 + $0xc] ss:$20 sps:$4 sm:$0xff] (!%p488_p2)   ;;  %v6588_v3 = vld [vmem:[%s8582_s3 + $0x8] ss:$20 sps:$4 sm:$0xff] (!%p488_p2)  }
   0x7   : > { %491 = sbr.rel (%p488_p2) target bundleno = 2337 (0x921), region = 84  ;;  %1399 = vmatprep.subr.bf16.mxu0 (!%p488_p2), %v6583_v0  ;;  %v6587_v2 = vld [vmem:[%s8582_s3] ss:$20 sps:$4 sm:$0xff] (!%p488_p2)   ;;  %1625 = vmatprep.subr.bf16.mxu1 (!%p488_p2), %v6585_v1  ;;  %v6593_v6 = vld [vmem:[%s8582_s3 + $0x28] ss:$20 sps:$4 sm:$0xff] (!%p488_p2)   ;;  %s5402_s0 = sshll.u32 (!%p488_p2), %s5397_s22, 4 }
   0x8   : > { %v6589_v4 = vld [vmem:[%s8582_s3 + $0x2c] ss:$20 sps:$4 sm:$0xff] (!%p488_p2)   ;;  %1400 = vmatpush1.bf16.msra.mxu0 (!%p488_p2), %v6587_v2  ;;  %1626 = vmatpush1.bf16.msra.mxu1 (!%p488_p2), %v6588_v3  ;;  %v6591_v5 = vld [vmem:[%s8582_s3 + $0x34] ss:$20 sps:$4 sm:$0xff] (!%p488_p2)   ;;  %v6594_v7 = vld [vmem:[%s8582_s3 + $0x30] ss:$20 sps:$4 sm:$0xff] (!%p488_p2)  }
   0x9   : > { %1401 = vmatprep.subr.bf16.mxu0 (!%p488_p2), %v6589_v4  ;;  %1627 = vmatprep.subr.bf16.mxu1 (!%p488_p2), %v6591_v5  ;;  %v6595_v8 = vld [vmem:[%s8582_s3 + $0x54] ss:$20 sps:$4 sm:$0xff] (!%p488_p2)   ;;  %v6597_v9 = vld [vmem:[%s8582_s3 + $0x5c] ss:$20 sps:$4 sm:$0xff] (!%p488_p2)   ;;  %v6600_v11 = vld [vmem:[%s8582_s3 + $0x58] ss:$20 sps:$4 sm:$0xff] (!%p488_p2)  }
   0xa   : > { %v6599_v10 = vld [vmem:[%s8582_s3 + $0x50] ss:$20 sps:$4 sm:$0xff] (!%p488_p2)   ;;  %v6605_v14 = vld [vmem:[%s8582_s3 + $0x78] ss:$20 sps:$4 sm:$0xff] (!%p488_p2)   ;;  %v6606_v15 = vld [vmem:[%s8582_s3 + $0x80] ss:$20 sps:$4 sm:$0xff] (!%p488_p2)  }
   0xb   : > { %v6601_v12 = vld [vmem:[%s8582_s3 + $0x7c] ss:$20 sps:$4 sm:$0xff] (!%p488_p2)   ;;  %v6603_v13 = vld [vmem:[%s8582_s3 + $0x84] ss:$20 sps:$4 sm:$0xff] (!%p488_p2)   ;;  %v6609_v17 = vld [vmem:[%s8582_s3 + $0xac] ss:$20 sps:$4 sm:$0xff] (!%p488_p2)  }
   0xc   : > { %1402 = vmatpush1.bf16.msra.mxu0 (!%p488_p2), %v6593_v6  ;;  %1628 = vmatpush1.bf16.msra.mxu1 (!%p488_p2), %v6594_v7  ;;  %v6607_v16 = vld [vmem:[%s8582_s3 + $0xa4] ss:$20 sps:$4 sm:$0xff] (!%p488_p2)   ;;  %v6611_v18 = vld [vmem:[%s8582_s3 + $0xa0] ss:$20 sps:$4 sm:$0xff] (!%p488_p2)   ;;  %v6612_v19 = vld [vmem:[%s8582_s3 + $0xa8] ss:$20 sps:$4 sm:$0xff] (!%p488_p2)  }
   0xd   : > { %1403 = vmatprep.subr.bf16.mxu0 (!%p488_p2), %v6595_v8  ;;  %1629 = vmatprep.subr.bf16.mxu1 (!%p488_p2), %v6597_v9  ;;  %v6613_v20 = vld [vmem:[%s8582_s3 + $0xcc] ss:$20 sps:$4 sm:$0xff] (!%p488_p2)   ;;  %v6615_v21 = vld [vmem:[%s8582_s3 + $0xd4] ss:$20 sps:$4 sm:$0xff] (!%p488_p2)   ;;  %v6618_v23 = vld [vmem:[%s8582_s3 + $0xd0] ss:$20 sps:$4 sm:$0xff] (!%p488_p2)  }
   0xe   : > { %v6617_v22 = vld [vmem:[%s8582_s3 + $0xc8] ss:$20 sps:$4 sm:$0xff]   ;;  %v6623_v26 = vld [vmem:[%s8582_s3 + $0xf0] ss:$20 sps:$4 sm:$0xff]   ;;  %v6624_v27 = vld [vmem:[%s8582_s3 + $0xf8] ss:$20 sps:$4 sm:$0xff]  }
   0xf   : > { %v6619_v24 = vld [vmem:[%s8582_s3 + $0xf4] ss:$20 sps:$4 sm:$0xff]   ;;  %v6621_v25 = vld [vmem:[%s8582_s3 + $0xfc] ss:$20 sps:$4 sm:$0xff]   ;;  %v6627_v29 = vld [vmem:[%s8582_s3 + $0x124] ss:$20 sps:$4 sm:$0xff]  }
  0x10   : > { %1404 = vmatpush1.bf16.msra.mxu0 %v6599_v10  ;;  %1630 = vmatpush1.bf16.msra.mxu1 %v6600_v11  ;;  %v6625_v28 = vld [vmem:[%s8582_s3 + $0x11c] ss:$20 sps:$4 sm:$0xff]   ;;  %v6629_v30 = vld [vmem:[%s8582_s3 + $0x118] ss:$20 sps:$4 sm:$0xff]   ;;  %v6630_v31 = vld [vmem:[%s8582_s3 + $0x120] ss:$20 sps:$4 sm:$0xff]  }
  0x11   : > { %1405 = vmatprep.subr.bf16.mxu0 %v6601_v12  ;;  %1631 = vmatprep.subr.bf16.mxu1 %v6603_v13  ;;  %v6631_v32 = vld [vmem:[%s8582_s3 + $0x144] ss:$20 sps:$4 sm:$0xff]   ;;  %p550_p3 = scmp.lt.s32.totalorder %s5402_s0, 31  ;;  %v6633_v33 = vld [vmem:[%s8582_s3 + $0x14c] ss:$20 sps:$4 sm:$0xff]   ;;  %s8597_s26 = sld [smem:[#allocation2_spill]] }
  0x12   : > { %v6635_v34 = vld [vmem:[%s8582_s3 + $0x140] ss:$20 sps:$4 sm:$0xff]   ;;  %v6636_v35 = vld [vmem:[%s8582_s3 + $0x148] ss:$20 sps:$4 sm:$0xff]   ;;  %v6642_v39 = vld [vmem:[%s8582_s3 + $0x170] ss:$20 sps:$4 sm:$0xff]  }
  0x13   : > { %v6637_v36 = vld [vmem:[%s8582_s3 + $0x16c] ss:$20 sps:$4 sm:$0xff]   ;;  %s8599_s0 = smov (!%p550_p3, %s5402_s0), 31  ;;  %v6639_v37 = vld [vmem:[%s8582_s3 + $0x174] ss:$20 sps:$4 sm:$0xff]   ;;  %vm1383_vm0 = vcmask 1045504  }
  0x14   : > { %1406 = vmatpush1.bf16.msra.mxu0 %v6605_v14  ;;  %1632 = vmatpush1.bf16.msra.mxu1 %v6606_v15  ;;  %v6641_v38 = vld [vmem:[%s8582_s3 + $0x168] ss:$20 sps:$4 sm:$0xff]   ;;  %s6573_s27 = smul.u32 12, %s8599_s0  ;;  %v6647_v42 = vld [vmem:[%s8582_s3 + $0x190] ss:$20 sps:$4 sm:$0xff]   ;;  %vm1358_vm1 = vcmask 359424  }
  0x15   : > { %1407 = vmatprep.subr.bf16.mxu0 %v6607_v16  ;;  %1633 = vmatprep.subr.bf16.mxu1 %v6609_v17  ;;  %v6643_v40 = vld [vmem:[%s8582_s3 + $0x194] ss:$20 sps:$4 sm:$0xff]   ;;  %v6645_v41 = vld [vmem:[%s8582_s3 + $0x19c] ss:$20 sps:$4 sm:$0xff]   ;;  %v6648_v43 = vld [vmem:[%s8582_s3 + $0x198] ss:$20 sps:$4 sm:$0xff]  }
  0x16   : > { %v6649_v44 = vld [vmem:[%s8582_s3 + $0x1bc] ss:$20 sps:$4 sm:$0xff]   ;;  %v6651_v45 = vld [vmem:[%s8582_s3 + $0x1c4] ss:$20 sps:$4 sm:$0xff]   ;;  %v6654_v47 = vld [vmem:[%s8582_s3 + $0x1c0] ss:$20 sps:$4 sm:$0xff]  }
  0x17   : > { %s7218_s22 = scalar_lea.vmem %s8597_s26, %s6573_s27  ;;  %v6653_v46 = vld [vmem:[%s8582_s3 + $0x1b8] ss:$20 sps:$4 sm:$0xff]   ;;  %v6659_v51 = vld [vmem:[%s8582_s3 + $0x1e0] ss:$20 sps:$4 sm:$0xff]   ;;  %v6660_v52 = vld [vmem:[%s8582_s3 + $0x1e8] ss:$20 sps:$4 sm:$0xff]  }
  0x18   : > { %1408 = vmatpush1.bf16.msra.mxu0 %v6611_v18  ;;  %1634 = vmatpush1.bf16.msra.mxu1 %v6612_v19  ;;  %v7230_v48 = vld [vmem:[%s7218_s22 + $0x4] ss:$12 sps:$4 sm:$0xff]   ;;  %v6657_v50 = vld [vmem:[%s8582_s3 + $0x1ec] ss:$20 sps:$4 sm:$0xff]   ;;  %v6663_v54 = vld [vmem:[%s8582_s3 + $0x214] ss:$20 sps:$4 sm:$0xff]  }
  0x19   : > { %1409 = vmatprep.subr.bf16.mxu0 %v6613_v20  ;;  %1635 = vmatprep.subr.bf16.mxu1 %v6615_v21  ;;  %v6655_v49 = vld [vmem:[%s8582_s3 + $0x1e4] ss:$20 sps:$4 sm:$0xff]   ;;  %v6661_v53 = vld [vmem:[%s8582_s3 + $0x20c] ss:$20 sps:$4 sm:$0xff]   ;;  %v6665_v55 = vld [vmem:[%s8582_s3 + $0x208] ss:$20 sps:$4 sm:$0xff]  }
  0x1a   : > { %1431 = vmatprep.mubr.bf16.mxu0 %v7230_v48  ;;  %1657 = vmatprep.mubr.bf16.mxu1 %v7230_v48  ;;  %v6666_v56 = vld [vmem:[%s8582_s3 + $0x210] ss:$20 sps:$4 sm:$0xff]   ;;  %v6667_v57 = vld [vmem:[%s8582_s3 + $0x234] ss:$20 sps:$4 sm:$0xff]   ;;  %v6672_v60 = vld [vmem:[%s8582_s3 + $0x238] ss:$20 sps:$4 sm:$0xff]  }
  0x1b   : > { %v6669_v58 = vld [vmem:[%s8582_s3 + $0x23c] ss:$20 sps:$4 sm:$0xff]   ;;  %v6675_v62 = vld [vmem:[%s8582_s3 + $0x264] ss:$20 sps:$4 sm:$0xff]   ;;  %v6678_v0 = vld [vmem:[%s8582_s3 + $0x260] ss:$20 sps:$4 sm:$0xff]  }
  0x1c   : > { %1410 = vmatpush1.bf16.msra.mxu0 %v6617_v22  ;;  %1636 = vmatpush1.bf16.msra.mxu1 %v6618_v23  ;;  %v6671_v59 = vld [vmem:[%s8582_s3 + $0x230] ss:$20 sps:$4 sm:$0xff]   ;;  %v6677_v63 = vld [vmem:[%s8582_s3 + $0x258] ss:$20 sps:$4 sm:$0xff]   ;;  %v6682_v4 = vld [vmem:[%s8582_s3 + $0x280] ss:$20 sps:$4 sm:$0xff]  }
  0x1d   : > { %1411 = vmatprep.subr.bf16.mxu0 %v6619_v24  ;;  %1637 = vmatprep.subr.bf16.mxu1 %v6621_v25  ;;  %v6673_v61 = vld [vmem:[%s8582_s3 + $0x25c] ss:$20 sps:$4 sm:$0xff]   ;;  %v6684_v1 = vld [vmem:[%s8582_s3 + $0x284] ss:$20 sps:$4 sm:$0xff]   ;;  %v6699_v2 = vld [vmem:[%s8582_s3 + $0x28c] ss:$20 sps:$4 sm:$0xff]  }
  0x1e   : > { %v7289_v3 = vld [vmem:[%s7218_s22] ss:$12 sps:$4 sm:$0xff]   ;;  %v7295_v5 = vld [vmem:[%s7218_s22 + $0x1c] ss:$12 sps:$4 sm:$0xff]   ;;  %v6712_v13 = vld [vmem:[%s8582_s3 + $0x2b0] ss:$20 sps:$4 sm:$0xff]  }
  0x1f   : > { %v6693_v6 = vld [vmem:[%s8582_s3 + $0x2ac] ss:$20 sps:$4 sm:$0xff]   ;;  %v6697_v7 = vld [vmem:[%s8582_s3 + $0x288] ss:$20 sps:$4 sm:$0xff]   ;;  %v7326_v14 = vld [vmem:[%s7218_s22 + $0x18] ss:$12 sps:$4 sm:$0xff]  }
  0x20   : > { %1412 = vmatpush1.bf16.msra.mxu0 %v6623_v26  ;;  %1638 = vmatpush1.bf16.msra.mxu1 %v6624_v27  ;;  %v6706_v8 = vld [vmem:[%s8582_s3 + $0x2d4] ss:$20 sps:$4 sm:$0x3f]   ;;  %v6708_v9 = vld [vmem:[%s8582_s3 + $0x2d0] ss:$20 sps:$4 sm:$0x3f]  }
  0x21   : > { %1413 = vmatprep.subr.bf16.mxu0 %v6625_v28  ;;  %1639 = vmatprep.subr.bf16.mxu1 %v6627_v29  ;;  %v6714_v10 = vld [vmem:[%s8582_s3 + $0x2b4] ss:$20 sps:$4 sm:$0xff]   ;;  %v6720_v11 = vld [vmem:[%s8582_s3 + $0x2d8] ss:$20 sps:$4 sm:$0x3f]   ;;  %v1385_v17 = vsel %vm1383_vm0, %v6708_v9, 0 }
  0x22   : > { %v6691_v12 = vld [vmem:[%s8582_s3 + $0x2a8] ss:$20 sps:$4 sm:$0xff]   ;;  %v7332_v16 = vld [vmem:[%s7218_s22 + $0x34] ss:$12 sps:$4 sm:$0xff]   ;;  %v1391_v18 = vsel %vm1383_vm0, %v6720_v11, 0  ;;  %vm2460_vm2 = vcmask 523264  }
  0x23   : > { %v6718_v15 = vld [vmem:[%s8582_s3 + $0x2dc] ss:$20 sps:$4 sm:$0x3f]   ;;  %v7352_v22 = vld [vmem:[%s7218_s22 + $0x4c] ss:$12 sps:$4 sm:$0xff]   ;;  %v6764_v11 = vld [vmem:[%s8583_s4 + $0x60] sm:$0xff]  }
  0x24   : > { %1414 = vmatpush1.bf16.msra.mxu0 %v6629_v30  ;;  %1640 = vmatpush1.bf16.msra.mxu1 %v6630_v31  ;;  %v6722_v19 = vld [vmem:[%s8582_s3 + $0x150] ss:$20 sps:$4 sm:$0xff]   ;;  %v7359_v23 = vld [vmem:[%s7218_s22 + $0x48] ss:$12 sps:$4 sm:$0xff]   ;;  %v7369_v25 = vld [vmem:[%s7218_s22 + $0x60] ss:$12 sps:$4 sm:$0xff]  }
  0x25   : > { %1415 = vmatprep.subr.bf16.mxu0 %v6631_v32  ;;  %1641 = vmatprep.subr.bf16.mxu1 %v6633_v33  ;;  %v6733_v20 = vld [vmem:[%s8582_s3 + $0x290] ss:$20 sps:$4 sm:$0xff]   ;;  %v7372_v26 = vld [vmem:[%s7218_s22 + $0x7c] ss:$12 sps:$4 sm:$0xff]   ;;  %v7382_v28 = vld [vmem:[%s7218_s22 + $0x94] ss:$12 sps:$4 sm:$0xff]  }
  0x26   : > { %v7349_v21 = vld [vmem:[%s7218_s22 + $0x30] ss:$12 sps:$4 sm:$0xff]   ;;  %v7379_v27 = vld [vmem:[%s7218_s22 + $0x78] ss:$12 sps:$4 sm:$0xff]   ;;  %v7399_v31 = vld [vmem:[%s7218_s22 + $0xa8] ss:$12 sps:$4 sm:$0xff]  }
  0x27   : > { %v7362_v24 = vld [vmem:[%s7218_s22 + $0x64] ss:$12 sps:$4 sm:$0xff]   ;;  %v7392_v30 = vld [vmem:[%s7218_s22 + $0xac] ss:$12 sps:$4 sm:$0xff]   ;;  %v6981_v32 = vmov 0   ;;  %vm3312_vm3 = vcmask 1042432  }
  0x28   : > { %1416 = vmatpush1.bf16.msra.mxu0 %v6635_v34  ;;  %1642 = vmatpush1.bf16.msra.mxu1 %v6636_v35  ;;  %v7389_v29 = vld [vmem:[%s7218_s22 + $0x90] ss:$12 sps:$4 sm:$0xff]   ;;  %v7406_v33 = vld [vmem:[%s7218_s22 + $0x8] ss:$12 sps:$4 sm:$0xff]   ;;  %v6725_v35 = vld [vmem:[%s8582_s3 + $0x178] ss:$20 sps:$4 sm:$0xff]  }
  0x29   : > { %1417 = vmatprep.subr.bf16.mxu0 %v6637_v36  ;;  %1643 = vmatprep.subr.bf16.mxu1 %v6639_v37  ;;  %v6723_v34 = vld [vmem:[%s8582_s3 + $0x10] ss:$20 sps:$4 sm:$0xff]   ;;  %v6743_v36 = vld [vmem:[%s8582_s3 + $0x2b8] ss:$20 sps:$4 sm:$0xff]   ;;  %s5776_s30 = sshll.u32 %s8599_s0, 3  ;;  %vm3287_vm4 = vcmask 179200  }
  0x2a   : > { %v6726_v37 = vld [vmem:[%s8582_s3 + $0x38] ss:$20 sps:$4 sm:$0xff]   ;;  %s7860_s19 = scalar_lea.vmem %s8580_s1, %s5776_s30  ;;  %vm3755_vm5 = vcmask 261120   ;;  %s5408_s18 = sshll.u32 %s8599_s0, 2  ;;  %vm4578_vm6 = vcmask 1043456   ;;  %vm4553_vm7 = vcmask 64512  }
  0x2b   : > { %v6762_v9 = vld [vmem:[%s8583_s4 + $0x18] sm:$0xff]   ;;  %s8309_s20 = scalar_lea.vmem %s8581_s2, %s5408_s18  ;;  %vm5300_vm8 = vcmask 7168   ;;  %s8539_s18 = scalar_lea.vmem %s8595_s16, %s5776_s30 }
  0x2c   : > { %1418 = vmatpush1.bf16.msra.mxu0 %v6641_v38  ;;  %1644 = vmatpush1.bf16.msra.mxu1 %v6642_v39  ;;  %v6747_v38 = vld [vmem:[%s8582_s3 + $0x2e0] ss:$20 sps:$4 sm:$0x3f]  }
  0x2d   : > { %1419 = vmatprep.subr.bf16.mxu0 %v6643_v40  ;;  %1645 = vmatprep.subr.bf16.mxu1 %v6645_v41  ;;  %v6728_v39 = vld [vmem:[%s8582_s3 + $0x1a0] ss:$20 sps:$4 sm:$0xff]   ;;  %v1397_v41 = vsel %vm1383_vm0, %v6747_v38, 0 }
  0x2e   : > { %v7433_v40 = vld [vmem:[%s7218_s22 + $0x20] ss:$12 sps:$4 sm:$0xff]  }
  0x30   : > { %1420 = vmatpush1.bf16.msra.mxu0 %v6647_v42  ;;  %1646 = vmatpush1.bf16.msra.mxu1 %v6648_v43  ;;  %v6729_v42 = vld [vmem:[%s8582_s3 + $0x60] ss:$20 sps:$4 sm:$0xff]   ;;  %v6731_v43 = vld [vmem:[%s8582_s3 + $0x1c8] ss:$20 sps:$4 sm:$0xff]  }
  0x31   : > { %1421 = vmatprep.subr.bf16.mxu0 %v6649_v44  ;;  %1647 = vmatprep.subr.bf16.mxu1 %v6651_v45  ;;  %v6748_v44 = vld [vmem:[%s8583_s4 + $0x40] sm:$0xff]   ;;  %v6732_v45 = vld [vmem:[%s8582_s3 + $0x88] ss:$20 sps:$4 sm:$0xff]  }
  0x34   : > { %1422 = vmatpush1.bf16.msra.mxu0 %v6653_v46  ;;  %1648 = vmatpush1.bf16.msra.mxu1 %v6654_v47  ;;  %v6735_v46 = vld [vmem:[%s8582_s3 + $0x1f0] ss:$20 sps:$4 sm:$0xff]  }
  0x35   : > { %1423 = vmatprep.subr.bf16.mxu0 %v6655_v49  ;;  %1649 = vmatprep.subr.bf16.mxu1 %v6657_v50  ;;  %v6727_v47 = vld [vmem:[%s7218_s22 + $0x38] ss:$12 sps:$4 sm:$0xff]  }
  0x36   : > { %v6736_v49 = vld [vmem:[%s8582_s3 + $0xb0] ss:$20 sps:$4 sm:$0xff]   ;;  %v6738_v50 = vld [vmem:[%s8582_s3 + $0x218] ss:$20 sps:$4 sm:$0xff]  }
  0x38   : > { %1424 = vmatpush1.bf16.msra.mxu0 %v6659_v51  ;;  %1650 = vmatpush1.bf16.msra.mxu1 %v6660_v52  ;;  %v6739_v51 = vld [vmem:[%s8582_s3 + $0xd8] ss:$20 sps:$4 sm:$0xff]   ;;  %v6741_v52 = vld [vmem:[%s8582_s3 + $0x240] ss:$20 sps:$4 sm:$0xff]  }
  0x39   : > { %1425 = vmatprep.subr.bf16.mxu0 %v6661_v53  ;;  %1651 = vmatprep.subr.bf16.mxu1 %v6663_v54  ;;  %v6730_v53 = vld [vmem:[%s7218_s22 + $0x50] ss:$12 sps:$4 sm:$0xff]   ;;  %v6742_v54 = vld [vmem:[%s8582_s3 + $0x100] ss:$20 sps:$4 sm:$0xff]  }
  0x3c   : > { %1426 = vmatpush1.bf16.msra.mxu0 %v6665_v55  ;;  %1652 = vmatpush1.bf16.msra.mxu1 %v6666_v56  ;;  %v6745_v55 = vld [vmem:[%s8582_s3 + $0x268] ss:$20 sps:$4 sm:$0xff]  }
  0x3d   : > { %1427 = vmatprep.subr.bf16.mxu0 %v6667_v57  ;;  %1653 = vmatprep.subr.bf16.mxu1 %v6669_v58  ;;  %v6746_v56 = vld [vmem:[%s8582_s3 + $0x128] ss:$20 sps:$4 sm:$0xff]   ;;  %v6749_v57 = vld [vmem:[%s8583_s4 + $0xc0] sm:$0xff]  }
  0x3e   : > { %v6734_v58 = vld [vmem:[%s7218_s22 + $0x68] ss:$12 sps:$4 sm:$0xff]  }
  0x40   : > { %1428 = vmatpush1.bf16.msra.mxu0 %v6671_v59  ;;  %1654 = vmatpush1.bf16.msra.mxu1 %v6672_v60  ;;  %v6737_v59 = vld [vmem:[%s7218_s22 + $0x80] ss:$12 sps:$4 sm:$0xff]   ;;  %v6740_v60 = vld [vmem:[%s7218_s22 + $0x98] ss:$12 sps:$4 sm:$0xff]  }
  0x41   : > { %1429 = vmatprep.subr.bf16.mxu0 %v6673_v61  ;;  %1655 = vmatprep.subr.bf16.mxu1 %v6675_v62  ;;  %v7508_v61 = vld [vmem:[%s7218_s22 + $0xb0] ss:$12 sps:$4 sm:$0xff]   ;;  %v6750_v62 = vld [vmem:[%s8583_s4] sm:$0xff]  }
  0x44   : > { %1430 = vmatpush1.bf16.msra.mxu0 %v6677_v63  ;;  %1656 = vmatpush1.bf16.msra.mxu1 %v6678_v0  ;;  %v6751_v63 = vld [vmem:[%s8583_s4 + $0x80] sm:$0xff]   ;;  %v6752_v0 = vld [vmem:[%s8583_s4 + $0x48] sm:$0xff]  }
  0x45   : > { %1512 = vmatprep.subr.bf16.mxu0 %v6684_v1  ;;  %1738 = vmatprep.subr.bf16.mxu1 %v6699_v2  ;;  %v6753_v1 = vld [vmem:[%s8583_s4 + $0xc8] sm:$0xff]  }
  0x46   : > { %v6755_v2 = vld [vmem:[%s8583_s4 + $0x88] sm:$0xff]  }
  0x47   : > { %1432 = vmatmul.mubr.bf16.vlgmr.msra.gmra.mrb[0].mxu0 %v7289_v3  ;;  %1658 = vmatmul.mubr.bf16.vlgmr.msra.gmra.mrb[0].mxu1 %v7289_v3 }
  0x48   : > { %1513 = vmatpush1.bf16.msra.mxu0 %v6682_v4  ;;  %1441 = vmatprep.mubr.bf16.mxu0 %v7295_v5  ;;  %v6757_v4 = vld [vmem:[%s8583_s4 + $0xd0] sm:$0xff]  }
  0x49   : > { %1667 = vmatprep.mubr.bf16.mxu1 %v7295_v5  ;;  %1514 = vmatprep.subr.bf16.mxu0 %v6693_v6  ;;  %v6759_v6 = vld [vmem:[%s8583_s4 + $0x90] sm:$0xff]  }
  0x4a   : > { %1739 = vmatpush1.bf16.msra.mxu1 %v6697_v7  ;;  %v6760_v7 = vld [vmem:[%s8583_s4 + $0x58] sm:$0xff]  }
  0x4b   : > { %1740 = vmatprep.subr.bf16.mxu1 %v6714_v10  ;;  %v6763_v10 = vld [vmem:[%s8583_s4 + $0x98] sm:$0xff]  }
  0x4c   : > { %1515 = vmatpush1.bf16.msra.mxu0 %v6691_v12  ;;  %v6765_v12 = vld [vmem:[%s8583_s4 + $0xe0] sm:$0xff]  }
  0x4d   : > { %5530 = vmatprep.subr.msk.bf16.mxu0 %vm1383_vm0, %v6706_v8  ;;  %v6761_v8 = vld [vmem:[%s8583_s4 + $0xd8] sm:$0xff]  }
  0x4e   : > { %1741 = vmatpush1.bf16.msra.mxu1 %v6712_v13  ;;  %v6766_v13 = vld [vmem:[%s8583_s4 + $0x20] sm:$0xff]  }
  0x4f   : > { %1442 = vmatmul.mubr.bf16.gmra.mrb[4].mxu0 %v7326_v14  ;;  %1668 = vmatmul.mubr.bf16.gmra.mrb[4].mxu1 %v7326_v14 }
  0x50   : > { %1451 = vmatprep.mubr.bf16.mxu0 %v7332_v16  ;;  %1677 = vmatprep.mubr.bf16.mxu1 %v7332_v16 }
  0x51   : > { %1517 = vmatpush1.bf16.msra.mxu0 %v1385_v17  ;;  %5539 = vmatprep.subr.msk.bf16.mxu1 %vm1383_vm0, %v6718_v15  ;;  %v6768_v15 = vld [vmem:[%s8583_s4 + $0x68] sm:$0xff]  }
  0x52   : > { %1743 = vmatpush1.bf16.msra.mxu1 %v1391_v18  ;;  %5777 = vmatprep.subr.bf16.mxu0 %v6722_v19  ;;  %v6770_v17 = vld [vmem:[%s8583_s4 + $0x28] sm:$0xff]   ;;  %v6772_v19 = vld [vmem:[%s8583_s4 + $0x70] sm:$0xff]  }
  0x53   : > { %6159 = vmatprep.subr.bf16.mxu1 %v6733_v20  ;;  %v6771_v18 = vld [vmem:[%s8583_s4 + $0xa8] sm:$0xff]  }
  0x57   : > { %1452 = vmatmul.mubr.bf16.gmra.mrb[8].mxu0 %v7349_v21  ;;  %1678 = vmatmul.mubr.bf16.gmra.mrb[8].mxu1 %v7349_v21 }
  0x58   : > { %1461 = vmatprep.mubr.bf16.mxu0 %v7352_v22  ;;  %1687 = vmatprep.mubr.bf16.mxu1 %v7352_v22 }
  0x5f   : > { %1462 = vmatmul.mubr.bf16.gmra.mrb[12].mxu0 %v7359_v23  ;;  %1688 = vmatmul.mubr.bf16.gmra.mrb[12].mxu1 %v7359_v23 }
  0x60   : > { %1471 = vmatprep.mubr.bf16.mxu0 %v7362_v24  ;;  %1697 = vmatprep.mubr.bf16.mxu1 %v7362_v24 }
  0x67   : > { %1472 = vmatmul.mubr.bf16.gmra.mrb[16].mxu0 %v7369_v25  ;;  %1698 = vmatmul.mubr.bf16.gmra.mrb[16].mxu1 %v7369_v25 }
  0x68   : > { %1481 = vmatprep.mubr.bf16.mxu0 %v7372_v26  ;;  %1707 = vmatprep.mubr.bf16.mxu1 %v7372_v26 }
  0x6f   : > { %1482 = vmatmul.mubr.bf16.gmra.mrb[20].mxu0 %v7379_v27  ;;  %1708 = vmatmul.mubr.bf16.gmra.mrb[20].mxu1 %v7379_v27 }
  0x70   : > { %1491 = vmatprep.mubr.bf16.mxu0 %v7382_v28  ;;  %1717 = vmatprep.mubr.bf16.mxu1 %v7382_v28 }
  0x77   : > { %1492 = vmatmul.mubr.bf16.gmra.mrb[24].mxu0 %v7389_v29  ;;  %1718 = vmatmul.mubr.bf16.gmra.mrb[24].mxu1 %v7389_v29 }
  0x78   : > { %1501 = vmatprep.mubr.bf16.mxu0 %v7392_v30  ;;  %1727 = vmatprep.mubr.bf16.mxu1 %v7392_v30 }
  0x7f   : > { %1502 = vmatmul.mubr.bf16.gmra.mrb[28].mxu0 %v7399_v31  ;;  %1728 = vmatmul.mubr.bf16.gmra.mrb[28].mxu1 %v7399_v31 }
  0x80   : > { %1544 = vmatprep.mubr.bf16.mxu0 %v6981_v32  ;;  %1770 = vmatprep.mubr.bf16.mxu1 %v6981_v32 }
  0x87   : > { %5531 = vmatmul.mubr.msk.bf16.vlgmr.msra.gmra.mrb[0].mxu0 %vm1358_vm1, %v7406_v33  ;;  %5540 = vmatmul.mubr.msk.bf16.vlgmr.msra.gmra.mrb[0].mxu1 %vm1358_vm1, %v7406_v33 }
  0x88   : > { %5778 = vmatpush3.bf16.msra.mxu0 %v6723_v34  ;;  %1554 = vmatprep.mubr.bf16.mxu0 %v6981_v32  ;;  %v6777_v34 = vld [vmem:[%s8583_s4 + $0xf8] sm:$0xff]  }
  0x89   : > { %1780 = vmatprep.mubr.bf16.mxu1 %v6981_v32  ;;  %5779 = vmatprep.subr.bf16.mxu0 %v6725_v35  ;;  %v6778_v35 = vld [vmem:[%s8583_s4 + $0x38] sm:$0xff]  }
  0x8a   : > { %6160 = vmatpush3.bf16.msra.mxu1 %v6733_v20  ;;  %v6773_v20 = vld [vmem:[%s8583_s4 + $0xf0] sm:$0xff]  }
  0x8b   : > { %6161 = vmatprep.subr.bf16.mxu1 %v6743_v36 }
  0x8c   : > { %5780 = vmatpush3.bf16.msra.mxu0 %v6726_v37 }
  0x8d   : > { %5781 = vmatprep.subr.bf16.mxu0 %v6728_v39 }
  0x8e   : > { %6162 = vmatpush3.bf16.msra.mxu1 %v6743_v36  ;;  %v724_v36 = vlaneseq }
  0x8f   : > { %5532 = vmatmul.mubr.msk.bf16.gmra.mrb[4].mxu0 %vm1358_vm1, %v7433_v40  ;;  %5541 = vmatmul.mubr.msk.bf16.gmra.mrb[4].mxu1 %vm1358_vm1, %v7433_v40 }
  0x90   : > { %1564 = vmatprep.mubr.bf16.mxu0 %v6981_v32  ;;  %1790 = vmatprep.mubr.bf16.mxu1 %v6981_v32  ;;  %v7634_v37 = vshrl.u32 %v724_v36, 7 }
  0x91   : > { %5782 = vmatpush3.bf16.msra.mxu0 %v6729_v42  ;;  %6571 = vmatprep.subr.msk.bf16.mxu1 %vm1383_vm0, %v6747_v38 }
  0x92   : > { %5783 = vmatprep.subr.bf16.mxu0 %v6731_v43  ;;  %6164 = vmatpush3.bf16.msra.mxu1 %v1397_v41 }
  0x93   : > { %5852 = vmatprep.subr.bf16.mxu1 %v6748_v44 }
  0x95   : > { %5784 = vmatpush3.bf16.msra.mxu0 %v6732_v45 }
  0x96   : > { %5785 = vmatprep.subr.bf16.mxu0 %v6735_v46 }
  0x97   : > { %5533 = vmatmul.mubr.msk.bf16.gmra.mrb[8].mxu0 %vm1358_vm1, %v6727_v47  ;;  %5542 = vmatmul.mubr.msk.bf16.gmra.mrb[8].mxu1 %vm1358_vm1, %v6727_v47 }
  0x98   : > { %1574 = vmatprep.mubr.bf16.mxu0 %v6981_v32  ;;  %1800 = vmatprep.mubr.bf16.mxu1 %v6981_v32 }
  0x99   : > { %5786 = vmatpush3.bf16.msra.mxu0 %v6736_v49 }
  0x9a   : > { %5787 = vmatprep.subr.bf16.mxu0 %v6738_v50 }
  0x9d   : > { %5788 = vmatpush3.bf16.msra.mxu0 %v6739_v51 }
  0x9e   : > { %5789 = vmatprep.subr.bf16.mxu0 %v6741_v52 }
  0x9f   : > { %5534 = vmatmul.mubr.msk.bf16.gmra.mrb[12].mxu0 %vm1358_vm1, %v6730_v53  ;;  %5543 = vmatmul.mubr.msk.bf16.gmra.mrb[12].mxu1 %vm1358_vm1, %v6730_v53 }
  0xa0   : > { %1584 = vmatprep.mubr.bf16.mxu0 %v6981_v32  ;;  %1810 = vmatprep.mubr.bf16.mxu1 %v6981_v32 }
  0xa1   : > { %5790 = vmatpush3.bf16.msra.mxu0 %v6742_v54 }
  0xa2   : > { %5791 = vmatprep.subr.bf16.mxu0 %v6745_v55 }
  0xa5   : > { %5792 = vmatpush3.bf16.msra.mxu0 %v6746_v56 }
  0xa6   : > { %5916 = vmatprep.subr.bf16.mxu0 %v6749_v57 }
  0xa7   : > { %5535 = vmatmul.mubr.msk.bf16.gmra.mrb[16].mxu0 %vm1358_vm1, %v6734_v58  ;;  %5544 = vmatmul.mubr.msk.bf16.gmra.mrb[16].mxu1 %vm1358_vm1, %v6734_v58 }
  0xa8   : > { %1594 = vmatprep.mubr.bf16.mxu0 %v6981_v32  ;;  %1820 = vmatprep.mubr.bf16.mxu1 %v6981_v32 }
  0xaf   : > { %5536 = vmatmul.mubr.msk.bf16.gmra.mrb[20].mxu0 %vm1358_vm1, %v6737_v59  ;;  %5545 = vmatmul.mubr.msk.bf16.gmra.mrb[20].mxu1 %vm1358_vm1, %v6737_v59 }
  0xb0   : > { %1604 = vmatprep.mubr.bf16.mxu0 %v6981_v32  ;;  %1830 = vmatprep.mubr.bf16.mxu1 %v6981_v32 }
  0xb7   : > { %5537 = vmatmul.mubr.msk.bf16.gmra.mrb[24].mxu0 %vm1358_vm1, %v6740_v60  ;;  %5546 = vmatmul.mubr.msk.bf16.gmra.mrb[24].mxu1 %vm1358_vm1, %v6740_v60 }
  0xb8   : > { %1614 = vmatprep.mubr.bf16.mxu0 %v6981_v32  ;;  %1840 = vmatprep.mubr.bf16.mxu1 %v6981_v32 }
  0xbf   : > { %5538 = vmatmul.mubr.msk.bf16.gmra.mrb[28].mxu0 %vm1358_vm1, %v7508_v61  ;;  %5547 = vmatmul.mubr.msk.bf16.gmra.mrb[28].mxu1 %vm1358_vm1, %v7508_v61 }
  0xc0   : > { %1883 = vmatprep.mubr.bf16.mxu0 %v7230_v48  ;;  %6165 = vmatprep.mubr.msk.bf16.mxu1 %vm1358_vm1, %v7406_v33  ;;  %v6754_v48 = vld [vmem:[%s8583_s4 + $0x8] sm:$0xff]   ;;  %v6776_v33 = vld [vmem:[%s8583_s4 + $0x78] sm:$0xff]  }
  0xc7   : > { %1884 = vmatmul.mubr.bf16.vlgmr.msra.gmra.mrb[32].mxu0 %v7289_v3  ;;  %6166 = vmatmul.mubr.msk.bf16.vlgmr.msra.gmra.mrb[32].mxu1 %vm1358_vm1, %v7433_v40  ;;  %v6756_v3 = vld [vmem:[%s8583_s4 + $0x50] sm:$0xff]  }
  0xc8   : > { %1891 = vmatprep.mubr.bf16.mxu0 %v7295_v5  ;;  %6169 = vmatprep.mubr.msk.bf16.mxu1 %vm1358_vm1, %v6727_v47  ;;  %v6758_v5 = vld [vmem:[%s8583_s4 + $0x10] sm:$0xff]  }
  0xc9   : > { %5853 = vmatpush3.bf16.msra.mxu1 %v6750_v62  ;;  %5917 = vmatpush3.bf16.msra.mxu0 %v6751_v63 }
  0xca   : > { %5854 = vmatprep.subr.bf16.mxu1 %v6752_v0  ;;  %5918 = vmatprep.subr.bf16.mxu0 %v6753_v1 }
  0xcd   : > { %5855 = vmatpush3.bf16.msra.mxu1 %v6754_v48  ;;  %5919 = vmatpush3.bf16.msra.mxu0 %v6755_v2 }
  0xce   : > { %5856 = vmatprep.subr.bf16.mxu1 %v6756_v3  ;;  %5920 = vmatprep.subr.bf16.mxu0 %v6757_v4 }
  0xcf   : > { %1892 = vmatmul.mubr.bf16.gmra.mrb[36].mxu0 %v7326_v14  ;;  %6170 = vmatmul.mubr.msk.bf16.gmra.mrb[36].mxu1 %vm1358_vm1, %v6730_v53  ;;  %v6767_v14 = vld [vmem:[%s8583_s4 + $0xa0] sm:$0xff]  }
  0xd0   : > { %1899 = vmatprep.mubr.bf16.mxu0 %v7332_v16  ;;  %6173 = vmatprep.mubr.msk.bf16.mxu1 %vm1358_vm1, %v6734_v58  ;;  %v6769_v16 = vld [vmem:[%s8583_s4 + $0xe8] sm:$0xff]  }
  0xd1   : > { %5857 = vmatpush3.bf16.msra.mxu1 %v6758_v5  ;;  %5921 = vmatpush3.bf16.msra.mxu0 %v6759_v6 }
  0xd2   : > { %5858 = vmatprep.subr.bf16.mxu1 %v6760_v7  ;;  %5922 = vmatprep.subr.bf16.mxu0 %v6761_v8 }
  0xd5   : > { %5859 = vmatpush3.bf16.msra.mxu1 %v6762_v9  ;;  %5923 = vmatpush3.bf16.msra.mxu0 %v6763_v10  ;;  %v6781_v10 = vld [vmem:[%s8583_s4 + $0x108] sm:$0xff]  }
  0xd6   : > { %5860 = vmatprep.subr.bf16.mxu1 %v6764_v11  ;;  %5924 = vmatprep.subr.bf16.mxu0 %v6765_v12 }
  0xd7   : > { %1900 = vmatmul.mubr.bf16.gmra.mrb[40].mxu0 %v7349_v21  ;;  %6174 = vmatmul.mubr.msk.bf16.gmra.mrb[40].mxu1 %vm1358_vm1, %v6737_v59  ;;  %v6774_v21 = vld [vmem:[%s8583_s4 + $0x30] sm:$0xff]  }
  0xd8   : > { %1907 = vmatprep.mubr.bf16.mxu0 %v7352_v22  ;;  %6177 = vmatprep.mubr.msk.bf16.mxu1 %vm1358_vm1, %v6740_v60  ;;  %v6775_v22 = vld [vmem:[%s8583_s4 + $0xb0] sm:$0xff]  }
  0xd9   : > { %5861 = vmatpush3.bf16.msra.mxu1 %v6766_v13  ;;  %5925 = vmatpush3.bf16.msra.mxu0 %v6767_v14 }
  0xda   : > { %5862 = vmatprep.subr.bf16.mxu1 %v6768_v15  ;;  %5926 = vmatprep.subr.bf16.mxu0 %v6769_v16 }
  0xdd   : > { %5863 = vmatpush3.bf16.msra.mxu1 %v6770_v17  ;;  %5927 = vmatpush3.bf16.msra.mxu0 %v6771_v18 }
  0xde   : > { %5864 = vmatprep.subr.bf16.mxu1 %v6772_v19  ;;  %5928 = vmatprep.subr.bf16.mxu0 %v6773_v20 }
  0xdf   : > { %1908 = vmatmul.mubr.bf16.gmra.mrb[44].mxu0 %v7359_v23  ;;  %6178 = vmatmul.mubr.msk.bf16.gmra.mrb[44].mxu1 %vm1358_vm1, %v7508_v61  ;;  %v6779_v23 = vld [vmem:[%s8583_s4 + $0xb8] sm:$0xff]  }
  0xe0   : > { %1915 = vmatprep.mubr.bf16.mxu0 %v7362_v24  ;;  %v6780_v24 = vld [vmem:[%s8583_s4 + $0x100] sm:$0xff]  }
  0xe1   : > { %5865 = vmatpush3.bf16.msra.mxu1 %v6774_v21  ;;  %5929 = vmatpush3.bf16.msra.mxu0 %v6775_v22 }
  0xe2   : > { %5866 = vmatprep.subr.bf16.mxu1 %v6776_v33  ;;  %5930 = vmatprep.subr.bf16.mxu0 %v6777_v34 }
  0xe5   : > { %5867 = vmatpush3.bf16.msra.mxu1 %v6778_v35  ;;  %5931 = vmatpush3.bf16.msra.mxu0 %v6779_v23  ;;  %v6782_v35 = vld [vmem:[%s8583_s4 + $0x110] sm:$0xff]  }
  0xe6   : > { %6181 = vmatprep.subr.bf16.mxu1 %v6780_v24 }
  0xe7   : > { %1916 = vmatmul.mubr.bf16.gmra.mrb[48].mxu0 %v7369_v25  ;;  %v726_v25 = vsub.s32 0, %v7634_v37 }
  0xe8   : > { %1923 = vmatprep.mubr.bf16.mxu0 %v7372_v26  ;;  %v734_v26 = vsub.s32 2, %v7634_v37 }
  0xef   : > { %1924 = vmatmul.mubr.bf16.gmra.mrb[52].mxu0 %v7379_v27  ;;  %v7641_v27 = vld [vmem:[%s8594_s15] sm:$0x1f] }
  0xf0   : > { %1931 = vmatprep.mubr.bf16.mxu0 %v7382_v28  ;;  %v730_v28 = vsub.s32 1, %v7634_v37 }
  0xf2   : > { %v7658_v38 = vrot.slane %v7641_v27, %v730_v28 }
  0xf7   : > { %1932 = vmatmul.mubr.bf16.gmra.mrb[56].mxu0 %v7389_v29  ;;  %v738_v29 = vsub.s32 3, %v7634_v37 }
  0xf8   : > { %1939 = vmatprep.mubr.bf16.mxu0 %v7392_v30  ;;  %v7648_v30 = vrot.slane %v7641_v27, %v726_v25 }
  0xf9   : > { %v7661_v39 = vrot.slane %v7641_v27, %v738_v29 }
  0xff   : > { %1940 = vmatmul.mubr.bf16.gmra.mrb[60].mxu0 %v7399_v31  ;;  %v7653_v31 = vrot.slane %v7641_v27, %v734_v26 }
 0x15a   : > { %v1546_v40 = vpop.f32.mrb[0].mxu0  ;;  %v1772_v41 = vpop.f32.mrb[0].mxu1 }
 0x15b   : > { %v6411_v42 = vadd.f32 %v1546_v40, %v7648_v30  ;;  %v6443_v43 = vadd.f32 %v1772_v41, %v7653_v31  ;;  %v1548_v44 = vpop.f32.mrb[1].mxu0  ;;  %v1774_v45 = vpop.f32.mrb[1].mxu1 }
 0x15c   : > { %v6412_v46 = vadd.f32 %v1548_v44, %v7658_v38  ;;  %v6444_v47 = vadd.f32 %v1774_v45, %v7661_v39  ;;  %v1550_v49 = vpop.f32.mrb[2].mxu0  ;;  %v1776_v50 = vpop.f32.mrb[2].mxu1 }
 0x15d   : > { %v6413_v51 = vadd.f32 %v1550_v49, %v7648_v30  ;;  %v6445_v52 = vadd.f32 %v1776_v50, %v7653_v31  ;;  %v1552_v53 = vpop.f32.mrb[3].mxu0  ;;  %v1778_v54 = vpop.f32.mrb[3].mxu1  ;;  %v2045_v57 = vmax.f32 %v6411_v42, 0.0  ;;  %v2047_v58 = vmax.f32 %v6443_v43, 0.0 }
 0x15e   : > { %v6414_v55 = vadd.f32 %v1552_v53, %v7658_v38  ;;  %v6446_v56 = vadd.f32 %v1778_v54, %v7661_v39  ;;  %v2046_v61 = vmax.f32 %v6412_v46, 0.0  ;;  %v2048_v62 = vmax.f32 %v6444_v47, 0.0 }
 0x15f   : > { %v2050_v59 = vmax.f32 %v6413_v51, 0.0  ;;  %v2052_v60 = vmax.f32 %v6445_v52, 0.0  ;;  %v6783_v51 = vld [vmem:[%s8583_s4 + $0x118] sm:$0xff]  }
 0x160   : > { %v2051_v63 = vmax.f32 %v6414_v55, 0.0  ;;  %v2053_v0 = vmax.f32 %v6446_v56, 0.0 }
 0x161   : > { %v2125_v1 = vpack.c.bf16 %v2050_v59, %v2045_v57  ;;  %v2127_v48 = vpack.c.bf16 %v2052_v60, %v2047_v58 }
 0x162   : > { %v2126_v2 = vpack.c.bf16 %v2051_v63, %v2046_v61  ;;  %v2128_v3 = vpack.c.bf16 %v2053_v0, %v2048_v62  ;;  %v1556_v4 = vpop.f32.mrb[4].mxu0  ;;  %v1782_v5 = vpop.f32.mrb[4].mxu1 }
 0x163   : > { %v6415_v6 = vadd.f32 %v1556_v4, %v7648_v30  ;;  %v6447_v7 = vadd.f32 %v1782_v5, %v7653_v31  ;;  %v1558_v8 = vpop.f32.mrb[5].mxu0  ;;  %v1784_v9 = vpop.f32.mrb[5].mxu1 }
 0x164   : > { %v6416_v11 = vadd.f32 %v1558_v8, %v7658_v38  ;;  %v6448_v12 = vadd.f32 %v1784_v9, %v7661_v39  ;;  %v1560_v13 = vpop.f32.mrb[6].mxu0  ;;  %v1786_v14 = vpop.f32.mrb[6].mxu1  ;;  %2517 = vmatprep.mubr.bf16.mxu1 %v2126_v2  ;;  %2614 = vmatprep.mubr.bf16.mxu0 %v2128_v3 }
 0x165   : > { %v6417_v15 = vadd.f32 %v1560_v13, %v7648_v30  ;;  %v6449_v16 = vadd.f32 %v1786_v14, %v7653_v31  ;;  %v1562_v17 = vpop.f32.mrb[7].mxu0  ;;  %v1788_v18 = vpop.f32.mrb[7].mxu1  ;;  %2518 = vmatmul.mubr.bf16.vlgmr.msra.gmra.mrb[48].mxu1 %v2125_v1  ;;  %2615 = vmatmul.mubr.bf16.vlgmr.msra.gmra.mrb[64].mxu0 %v2127_v48  ;;  %v2055_v21 = vmax.f32 %v6415_v6, 0.0  ;;  %v2057_v22 = vmax.f32 %v6447_v7, 0.0 }
 0x166   : > { %v6418_v19 = vadd.f32 %v1562_v17, %v7658_v38  ;;  %v6450_v20 = vadd.f32 %v1788_v18, %v7661_v39  ;;  %6182 = vmatpush3.bf16.msra.mxu1 %v6780_v24  ;;  %v2056_v23 = vmax.f32 %v6416_v11, 0.0  ;;  %v2058_v36 = vmax.f32 %v6448_v12, 0.0 }
 0x167   : > { %v2060_v33 = vmax.f32 %v6417_v15, 0.0  ;;  %v2062_v34 = vmax.f32 %v6449_v16, 0.0  ;;  %6183 = vmatprep.subr.bf16.mxu1 %v6781_v10 }
 0x168   : > { %v2061_v29 = vmax.f32 %v6418_v19, 0.0  ;;  %v2063_v40 = vmax.f32 %v6450_v20, 0.0 }
 0x169   : > { %v2130_v41 = vpack.c.bf16 %v2060_v33, %v2055_v21  ;;  %v2132_v42 = vpack.c.bf16 %v2062_v34, %v2057_v22 }
 0x16a   : > { %v2131_v43 = vpack.c.bf16 %v2061_v29, %v2056_v23  ;;  %v2133_v44 = vpack.c.bf16 %v2063_v40, %v2058_v36  ;;  %v1566_v45 = vpop.f32.mrb[8].mxu0  ;;  %v1792_v46 = vpop.f32.mrb[8].mxu1  ;;  %6184 = vmatpush3.bf16.msra.mxu1 %v6781_v10 }
 0x16b   : > { %v6419_v24 = vadd.f32 %v1566_v45, %v7648_v30  ;;  %v6451_v47 = vadd.f32 %v1792_v46, %v7653_v31  ;;  %v1568_v49 = vpop.f32.mrb[9].mxu0  ;;  %v1794_v50 = vpop.f32.mrb[9].mxu1  ;;  %6185 = vmatprep.subr.bf16.mxu1 %v6782_v35 }
 0x16c   : > { %v6420_v52 = vadd.f32 %v1568_v49, %v7658_v38  ;;  %v6452_v53 = vadd.f32 %v1794_v50, %v7661_v39  ;;  %v1570_v54 = vpop.f32.mrb[10].mxu0  ;;  %v1796_v55 = vpop.f32.mrb[10].mxu1  ;;  %2525 = vmatprep.mubr.bf16.mxu1 %v2131_v43  ;;  %2622 = vmatprep.mubr.bf16.mxu0 %v2133_v44 }
 0x16d   : > { %v6421_v56 = vadd.f32 %v1570_v54, %v7648_v30  ;;  %v6453_v57 = vadd.f32 %v1796_v55, %v7653_v31  ;;  %v1572_v58 = vpop.f32.mrb[11].mxu0  ;;  %v1798_v59 = vpop.f32.mrb[11].mxu1  ;;  %2526 = vmatmul.mubr.bf16.gmra.mrb[52].mxu1 %v2130_v41  ;;  %2623 = vmatmul.mubr.bf16.gmra.mrb[68].mxu0 %v2132_v42  ;;  %v2065_v62 = vmax.f32 %v6419_v24, 0.0  ;;  %v2067_v63 = vmax.f32 %v6451_v47, 0.0 }
 0x16e   : > { %v6422_v60 = vadd.f32 %v1572_v58, %v7658_v38  ;;  %v6454_v61 = vadd.f32 %v1798_v59, %v7661_v39  ;;  %6186 = vmatpush3.bf16.msra.mxu1 %v6782_v35  ;;  %v2066_v48 = vmax.f32 %v6420_v52, 0.0  ;;  %v2068_v2 = vmax.f32 %v6452_v53, 0.0 }
 0x16f   : > { %v2070_v0 = vmax.f32 %v6421_v56, 0.0  ;;  %v2072_v1 = vmax.f32 %v6453_v57, 0.0  ;;  %6187 = vmatprep.subr.bf16.mxu1 %v6783_v51 }
 0x170   : > { %v2071_v3 = vmax.f32 %v6422_v60, 0.0  ;;  %v2073_v4 = vmax.f32 %v6454_v61, 0.0 }
 0x171   : > { %v2135_v5 = vpack.c.bf16 %v2070_v0, %v2065_v62  ;;  %v2137_v6 = vpack.c.bf16 %v2072_v1, %v2067_v63 }
 0x172   : > { %v2136_v7 = vpack.c.bf16 %v2071_v3, %v2066_v48  ;;  %v2138_v8 = vpack.c.bf16 %v2073_v4, %v2068_v2  ;;  %v1576_v9 = vpop.f32.mrb[12].mxu0  ;;  %v1802_v10 = vpop.f32.mrb[12].mxu1  ;;  %6188 = vmatpush3.bf16.msra.mxu1 %v6783_v51 }
 0x173   : > { %v6423_v11 = vadd.f32 %v1576_v9, %v7648_v30  ;;  %v6455_v12 = vadd.f32 %v1802_v10, %v7653_v31  ;;  %v1578_v13 = vpop.f32.mrb[13].mxu0  ;;  %v1804_v14 = vpop.f32.mrb[13].mxu1 }
 0x174   : > { %v6424_v15 = vadd.f32 %v1578_v13, %v7658_v38  ;;  %v6456_v16 = vadd.f32 %v1804_v14, %v7661_v39  ;;  %v1580_v17 = vpop.f32.mrb[14].mxu0  ;;  %v1806_v18 = vpop.f32.mrb[14].mxu1  ;;  %2533 = vmatprep.mubr.bf16.mxu1 %v2136_v7  ;;  %2630 = vmatprep.mubr.bf16.mxu0 %v2138_v8 }
 0x175   : > { %v6425_v19 = vadd.f32 %v1580_v17, %v7648_v30  ;;  %v6457_v20 = vadd.f32 %v1806_v18, %v7653_v31  ;;  %v1582_v21 = vpop.f32.mrb[15].mxu0  ;;  %v1808_v22 = vpop.f32.mrb[15].mxu1  ;;  %2534 = vmatmul.mubr.bf16.gmra.mrb[56].mxu1 %v2135_v5  ;;  %2631 = vmatmul.mubr.bf16.gmra.mrb[72].mxu0 %v2137_v6  ;;  %v2075_v35 = vmax.f32 %v6423_v11, 0.0  ;;  %v2077_v23 = vmax.f32 %v6455_v12, 0.0 }
 0x176   : > { %v6426_v33 = vadd.f32 %v1582_v21, %v7658_v38  ;;  %v6458_v34 = vadd.f32 %v1808_v22, %v7661_v39  ;;  %v2076_v40 = vmax.f32 %v6424_v15, 0.0  ;;  %v2078_v41 = vmax.f32 %v6456_v16, 0.0 }
 0x177   : > { %v2080_v36 = vmax.f32 %v6425_v19, 0.0  ;;  %v2082_v29 = vmax.f32 %v6457_v20, 0.0 }
 0x178   : > { %v2081_v42 = vmax.f32 %v6426_v33, 0.0  ;;  %v2083_v43 = vmax.f32 %v6458_v34, 0.0 }
 0x179   : > { %v2140_v44 = vpack.c.bf16 %v2080_v36, %v2075_v35  ;;  %v2142_v45 = vpack.c.bf16 %v2082_v29, %v2077_v23 }
 0x17a   : > { %v2141_v46 = vpack.c.bf16 %v2081_v42, %v2076_v40  ;;  %v2143_v24 = vpack.c.bf16 %v2083_v43, %v2078_v41  ;;  %v1586_v47 = vpop.f32.mrb[16].mxu0  ;;  %v1812_v49 = vpop.f32.mrb[16].mxu1 }
 0x17b   : > { %v6427_v50 = vadd.f32 %v1586_v47, %v7648_v30  ;;  %v6459_v51 = vadd.f32 %v1812_v49, %v7653_v31  ;;  %v1588_v52 = vpop.f32.mrb[17].mxu0  ;;  %v1814_v53 = vpop.f32.mrb[17].mxu1 }
 0x17c   : > { %v6428_v54 = vadd.f32 %v1588_v52, %v7658_v38  ;;  %v6460_v55 = vadd.f32 %v1814_v53, %v7661_v39  ;;  %v1590_v56 = vpop.f32.mrb[18].mxu0  ;;  %v1816_v57 = vpop.f32.mrb[18].mxu1  ;;  %2541 = vmatprep.mubr.bf16.mxu1 %v2141_v46  ;;  %2638 = vmatprep.mubr.bf16.mxu0 %v2143_v24 }
 0x17d   : > { %v6429_v58 = vadd.f32 %v1590_v56, %v7648_v30  ;;  %v6461_v59 = vadd.f32 %v1816_v57, %v7653_v31  ;;  %v1592_v60 = vpop.f32.mrb[19].mxu0  ;;  %v1818_v61 = vpop.f32.mrb[19].mxu1  ;;  %2542 = vmatmul.mubr.bf16.gmra.mrb[60].mxu1 %v2140_v44  ;;  %2639 = vmatmul.mubr.bf16.gmra.mrb[76].mxu0 %v2142_v45  ;;  %v2085_v0 = vmax.f32 %v6427_v50, 0.0  ;;  %v2087_v1 = vmax.f32 %v6459_v51, 0.0 }
 0x17e   : > { %v6430_v62 = vadd.f32 %v1592_v60, %v7658_v38  ;;  %v6462_v63 = vadd.f32 %v1818_v61, %v7661_v39  ;;  %v2086_v3 = vmax.f32 %v6428_v54, 0.0  ;;  %v2088_v4 = vmax.f32 %v6460_v55, 0.0 }
 0x17f   : > { %v2090_v48 = vmax.f32 %v6429_v58, 0.0  ;;  %v2092_v2 = vmax.f32 %v6461_v59, 0.0 }
 0x180   : > { %v2091_v5 = vmax.f32 %v6430_v62, 0.0  ;;  %v2093_v6 = vmax.f32 %v6462_v63, 0.0 }
 0x181   : > { %v2145_v7 = vpack.c.bf16 %v2090_v48, %v2085_v0  ;;  %v2147_v8 = vpack.c.bf16 %v2092_v2, %v2087_v1 }
 0x182   : > { %v2146_v9 = vpack.c.bf16 %v2091_v5, %v2086_v3  ;;  %v2148_v10 = vpack.c.bf16 %v2093_v6, %v2088_v4  ;;  %v1596_v11 = vpop.f32.mrb[20].mxu0  ;;  %v1822_v12 = vpop.f32.mrb[20].mxu1 }
 0x183   : > { %v6431_v13 = vadd.f32 %v1596_v11, %v7648_v30  ;;  %v6463_v14 = vadd.f32 %v1822_v12, %v7653_v31  ;;  %v1598_v15 = vpop.f32.mrb[21].mxu0  ;;  %v1824_v16 = vpop.f32.mrb[21].mxu1 }
 0x184   : > { %v6432_v17 = vadd.f32 %v1598_v15, %v7658_v38  ;;  %v6464_v18 = vadd.f32 %v1824_v16, %v7661_v39  ;;  %v1600_v19 = vpop.f32.mrb[22].mxu0  ;;  %v1826_v20 = vpop.f32.mrb[22].mxu1  ;;  %2549 = vmatprep.mubr.bf16.mxu1 %v2146_v9  ;;  %2646 = vmatprep.mubr.bf16.mxu0 %v2148_v10 }
 0x185   : > { %v6433_v21 = vadd.f32 %v1600_v19, %v7648_v30  ;;  %v6465_v22 = vadd.f32 %v1826_v20, %v7653_v31  ;;  %v1602_v33 = vpop.f32.mrb[23].mxu0  ;;  %v1828_v34 = vpop.f32.mrb[23].mxu1  ;;  %2550 = vmatmul.mubr.bf16.gmra.mrb[64].mxu1 %v2145_v7  ;;  %2647 = vmatmul.mubr.bf16.gmra.mrb[80].mxu0 %v2147_v8  ;;  %v2095_v36 = vmax.f32 %v6431_v13, 0.0  ;;  %v2097_v29 = vmax.f32 %v6463_v14, 0.0 }
 0x186   : > { %v6434_v35 = vadd.f32 %v1602_v33, %v7658_v38  ;;  %v6466_v23 = vadd.f32 %v1828_v34, %v7661_v39  ;;  %v2096_v42 = vmax.f32 %v6432_v17, 0.0  ;;  %v2098_v43 = vmax.f32 %v6464_v18, 0.0 }
 0x187   : > { %v2100_v40 = vmax.f32 %v6433_v21, 0.0  ;;  %v2102_v41 = vmax.f32 %v6465_v22, 0.0 }
 0x188   : > { %v2101_v44 = vmax.f32 %v6434_v35, 0.0  ;;  %v2103_v45 = vmax.f32 %v6466_v23, 0.0 }
 0x189   : > { %v2150_v46 = vpack.c.bf16 %v2100_v40, %v2095_v36  ;;  %v2152_v24 = vpack.c.bf16 %v2102_v41, %v2097_v29  ;;  %v742_v40 = vsub.s32 4, %v7634_v37 }
 0x18a   : > { %v2151_v47 = vpack.c.bf16 %v2101_v44, %v2096_v42  ;;  %v2153_v49 = vpack.c.bf16 %v2103_v45, %v2098_v43  ;;  %v1606_v50 = vpop.f32.mrb[24].mxu0  ;;  %v1832_v51 = vpop.f32.mrb[24].mxu1 }
 0x18b   : > { %v6435_v52 = vadd.f32 %v1606_v50, %v7648_v30  ;;  %v6467_v53 = vadd.f32 %v1832_v51, %v7653_v31  ;;  %v1608_v54 = vpop.f32.mrb[25].mxu0  ;;  %v1834_v55 = vpop.f32.mrb[25].mxu1 }
 0x18c   : > { %v6436_v56 = vadd.f32 %v1608_v54, %v7658_v38  ;;  %v6468_v57 = vadd.f32 %v1834_v55, %v7661_v39  ;;  %v1610_v58 = vpop.f32.mrb[26].mxu0  ;;  %v1836_v59 = vpop.f32.mrb[26].mxu1  ;;  %2557 = vmatprep.mubr.bf16.mxu1 %v2151_v47  ;;  %2654 = vmatprep.mubr.bf16.mxu0 %v2153_v49 }
 0x18d   : > { %v6437_v60 = vadd.f32 %v1610_v58, %v7648_v30  ;;  %v6469_v61 = vadd.f32 %v1836_v59, %v7653_v31  ;;  %v1612_v62 = vpop.f32.mrb[27].mxu0  ;;  %v1838_v63 = vpop.f32.mrb[27].mxu1  ;;  %2558 = vmatmul.mubr.bf16.gmra.mrb[68].mxu1 %v2150_v46  ;;  %2655 = vmatmul.mubr.bf16.gmra.mrb[84].mxu0 %v2152_v24  ;;  %v2105_v48 = vmax.f32 %v6435_v52, 0.0  ;;  %v2107_v2 = vmax.f32 %v6467_v53, 0.0 }
 0x18e   : > { %v6438_v0 = vadd.f32 %v1612_v62, %v7658_v38  ;;  %v6470_v1 = vadd.f32 %v1838_v63, %v7661_v39  ;;  %v2106_v5 = vmax.f32 %v6436_v56, 0.0  ;;  %v2108_v6 = vmax.f32 %v6468_v57, 0.0 }
 0x18f   : > { %v2110_v3 = vmax.f32 %v6437_v60, 0.0  ;;  %v2112_v4 = vmax.f32 %v6469_v61, 0.0 }
 0x190   : > { %v2111_v7 = vmax.f32 %v6438_v0, 0.0  ;;  %v2113_v8 = vmax.f32 %v6470_v1, 0.0 }
 0x191   : > { %v2155_v9 = vpack.c.bf16 %v2110_v3, %v2105_v48  ;;  %v2157_v10 = vpack.c.bf16 %v2112_v4, %v2107_v2 }
 0x192   : > { %v2156_v11 = vpack.c.bf16 %v2111_v7, %v2106_v5  ;;  %v2158_v12 = vpack.c.bf16 %v2113_v8, %v2108_v6  ;;  %v1616_v13 = vpop.f32.mrb[28].mxu0  ;;  %v1842_v14 = vpop.f32.mrb[28].mxu1 }
 0x193   : > { %v6439_v15 = vadd.f32 %v1616_v13, %v7648_v30  ;;  %v6471_v16 = vadd.f32 %v1842_v14, %v7653_v31  ;;  %v1618_v17 = vpop.f32.mrb[29].mxu0  ;;  %v1844_v18 = vpop.f32.mrb[29].mxu1 }
 0x194   : > { %v6440_v19 = vadd.f32 %v1618_v17, %v7658_v38  ;;  %v6472_v20 = vadd.f32 %v1844_v18, %v7661_v39  ;;  %v1620_v21 = vpop.f32.mrb[30].mxu0  ;;  %v1846_v22 = vpop.f32.mrb[30].mxu1  ;;  %2565 = vmatprep.mubr.bf16.mxu1 %v2156_v11  ;;  %2662 = vmatprep.mubr.bf16.mxu0 %v2158_v12 }
 0x195   : > { %v6441_v33 = vadd.f32 %v1620_v21, %v7648_v30  ;;  %v6473_v34 = vadd.f32 %v1846_v22, %v7653_v31  ;;  %v1622_v35 = vpop.f32.mrb[31].mxu0  ;;  %v1848_v23 = vpop.f32.mrb[31].mxu1  ;;  %2566 = vmatmul.mubr.bf16.gmra.mrb[72].mxu1 %v2155_v9  ;;  %2663 = vmatmul.mubr.bf16.gmra.mrb[88].mxu0 %v2157_v10  ;;  %v2115_v41 = vmax.f32 %v6439_v15, 0.0  ;;  %v2117_v42 = vmax.f32 %v6471_v16, 0.0 }
 0x196   : > { %v6442_v36 = vadd.f32 %v1622_v35, %v7658_v38  ;;  %v6474_v29 = vadd.f32 %v1848_v23, %v7661_v39  ;;  %v2116_v45 = vmax.f32 %v6440_v19, 0.0  ;;  %v2118_v46 = vmax.f32 %v6472_v20, 0.0 }
 0x197   : > { %v2120_v43 = vmax.f32 %v6441_v33, 0.0  ;;  %v2122_v44 = vmax.f32 %v6473_v34, 0.0  ;;  %v7738_v38 = vrot.slane %v7641_v27, %v742_v40 }
 0x198   : > { %v2121_v24 = vmax.f32 %v6442_v36, 0.0  ;;  %v2123_v30 = vmax.f32 %v6474_v29, 0.0 }
 0x199   : > { %v2160_v47 = vpack.c.bf16 %v2120_v43, %v2115_v41  ;;  %v2162_v31 = vpack.c.bf16 %v2122_v44, %v2117_v42 }
 0x19a   : > { %v2161_v49 = vpack.c.bf16 %v2121_v24, %v2116_v45  ;;  %v2163_v50 = vpack.c.bf16 %v2123_v30, %v2118_v46  ;;  %v5793_v51 = vpop.f32.mrb[32].mxu0  ;;  %v6167_v52 = vpop.f32.mrb[32].mxu1 }
 0x19b   : > { %v5794_v39 = vpop.f32.mrb[33].mxu0  ;;  %v1982_v53 = vpop.f32.mrb[33].mxu1 }
 0x19c   : > { %v5795_v54 = vadd.f32 %v5794_v39, %v5793_v51  ;;  %v5796_v55 = vpop.f32.mrb[34].mxu0  ;;  %2573 = vmatprep.mubr.bf16.mxu1 %v2161_v49  ;;  %2670 = vmatprep.mubr.bf16.mxu0 %v2163_v50  ;;  %v6168_v56 = vpop.f32.mrb[34].mxu1 }
 0x19d   : > { %v5797_v57 = vpop.f32.mrb[35].mxu0  ;;  %2574 = vmatmul.mubr.bf16.gmra.mrb[76].mxu1 %v2160_v47  ;;  %2671 = vmatmul.mubr.bf16.gmra.mrb[92].mxu0 %v2162_v31  ;;  %v1985_v58 = vpop.f32.mrb[35].mxu1 }
 0x19e   : > { %v5798_v59 = vadd.f32 %v5797_v57, %v5796_v55  ;;  %v1886_v60 = vadd.f32 %v5795_v54, %v7738_v38 }
 0x1a0   : > { %v1983_v61 = vadd.f32 %v1982_v53, %v1886_v60  ;;  %v1889_v62 = vadd.f32 %v5798_v59, %v7738_v38 }
 0x1a2   : > { %v1986_v63 = vadd.f32 %v1985_v58, %v1889_v62  ;;  %v5799_v27 = vpop.f32.mrb[36].mxu0  ;;  %v6171_v0 = vpop.f32.mrb[36].mxu1  ;;  %v2049_v2 = vmax.f32 %v1983_v61, 0.0 }
 0x1a3   : > { %v5800_v1 = vpop.f32.mrb[37].mxu0  ;;  %v1998_v48 = vpop.f32.mrb[37].mxu1 }
 0x1a4   : > { %v2054_v3 = vmax.f32 %v1986_v63, 0.0  ;;  %v5801_v4 = vadd.f32 %v5800_v1, %v5799_v27  ;;  %v5802_v5 = vpop.f32.mrb[38].mxu0  ;;  %v6172_v6 = vpop.f32.mrb[38].mxu1 }
 0x1a5   : > { %v5803_v7 = vpop.f32.mrb[39].mxu0  ;;  %v2001_v8 = vpop.f32.mrb[39].mxu1 }
 0x1a6   : > { %v2129_v9 = vpack.c.bf16 %v2054_v3, %v2049_v2  ;;  %v1894_v10 = vadd.f32 %v5801_v4, %v7738_v38  ;;  %v5804_v11 = vadd.f32 %v5803_v7, %v5802_v5 }
 0x1a8   : > { %v1991_v12 = vadd.f32 %v6167_v52, %v1894_v10  ;;  %v1897_v13 = vadd.f32 %v5804_v11, %v7738_v38  ;;  %6189 = vmatprep.mubr.msk.bf16.mxu1 %vm2460_vm2, %v2129_v9 }
 0x1aa   : > { %v1994_v14 = vadd.f32 %v6168_v56, %v1897_v13  ;;  %v5805_v15 = vpop.f32.mrb[40].mxu0  ;;  %v6175_v16 = vpop.f32.mrb[40].mxu1  ;;  %v2059_v19 = vmax.f32 %v1991_v12, 0.0 }
 0x1ab   : > { %v5806_v17 = vpop.f32.mrb[41].mxu0  ;;  %v2014_v18 = vpop.f32.mrb[41].mxu1 }
 0x1ac   : > { %v2064_v20 = vmax.f32 %v1994_v14, 0.0  ;;  %v5807_v21 = vadd.f32 %v5806_v17, %v5805_v15  ;;  %v5808_v22 = vpop.f32.mrb[42].mxu0  ;;  %v6176_v33 = vpop.f32.mrb[42].mxu1 }
 0x1ad   : > { %v5809_v34 = vpop.f32.mrb[43].mxu0  ;;  %v2017_v35 = vpop.f32.mrb[43].mxu1 }
 0x1ae   : > { %v2134_v23 = vpack.c.bf16 %v2064_v20, %v2059_v19  ;;  %v5810_v36 = vadd.f32 %v5809_v34, %v5808_v22  ;;  %v1902_v29 = vadd.f32 %v5807_v21, %v7738_v38 }
 0x1b0   : > { %v1999_v40 = vadd.f32 %v1998_v48, %v1902_v29  ;;  %6190 = vmatmul.mubr.msk.bf16.vlgmr.msra.gmra.mrb[80].mxu1 %vm2460_vm2, %v2134_v23  ;;  %v1905_v41 = vadd.f32 %v5810_v36, %v7738_v38 }
 0x1b2   : > { %v2002_v42 = vadd.f32 %v2001_v8, %v1905_v41  ;;  %v5811_v43 = vpop.f32.mrb[44].mxu0  ;;  %v7748_v44 = vpop.f32.mrb[44].mxu1  ;;  %v2069_v24 = vmax.f32 %v1999_v40, 0.0 }
 0x1b3   : > { %v5812_v45 = vpop.f32.mrb[45].mxu0  ;;  %v2030_v46 = vpop.f32.mrb[45].mxu1 }
 0x1b4   : > { %v2074_v30 = vmax.f32 %v2002_v42, 0.0  ;;  %v5813_v47 = vadd.f32 %v5812_v45, %v5811_v43  ;;  %v5814_v31 = vpop.f32.mrb[46].mxu0  ;;  %v7750_v49 = vpop.f32.mrb[46].mxu1 }
 0x1b5   : > { %v5815_v50 = vpop.f32.mrb[47].mxu0  ;;  %v2033_v51 = vpop.f32.mrb[47].mxu1 }
 0x1b6   : > { %v2139_v52 = vpack.c.bf16 %v2074_v30, %v2069_v24  ;;  %v1910_v39 = vadd.f32 %v5813_v47, %v7738_v38  ;;  %v5816_v53 = vadd.f32 %v5815_v50, %v5814_v31 }
 0x1b8   : > { %v2007_v54 = vadd.f32 %v6171_v0, %v1910_v39  ;;  %v1913_v55 = vadd.f32 %v5816_v53, %v7738_v38  ;;  %6193 = vmatprep.mubr.msk.bf16.mxu1 %vm2460_vm2, %v2139_v52 }
 0x1ba   : > { %v2010_v56 = vadd.f32 %v6172_v6, %v1913_v55  ;;  %v5817_v57 = vpop.f32.mrb[48].mxu0  ;;  %v2079_v59 = vmax.f32 %v2007_v54, 0.0 }
 0x1bb   : > { %v5818_v58 = vpop.f32.mrb[49].mxu0 }
 0x1bc   : > { %v2084_v60 = vmax.f32 %v2010_v56, 0.0  ;;  %v5819_v61 = vadd.f32 %v5818_v58, %v5817_v57  ;;  %v5820_v62 = vpop.f32.mrb[50].mxu0  ;;  %v6784_v56 = vld [vmem:[%s8584_s5] sm:$0xff]   ;;  %v6789_v58 = vld [vmem:[%s8584_s5 + $0x28] sm:$0xff]  }
 0x1bd   : > { %v5821_v63 = vpop.f32.mrb[51].mxu0  ;;  %6205 = vmatprep.subr.bf16.mxu0 %v6784_v56  ;;  %v6788_v57 = vld [vmem:[%s8584_s5 + $0x20] sm:$0xff]  }
 0x1be   : > { %v2144_v27 = vpack.c.bf16 %v2084_v60, %v2079_v59  ;;  %v5822_v1 = vadd.f32 %v5821_v63, %v5820_v62  ;;  %v1918_v48 = vadd.f32 %v5819_v61, %v7738_v38  ;;  %6206 = vmatpush3.bf16.msra.mxu0 %v6784_v56  ;;  %v6790_v59 = vld [vmem:[%s8584_s5 + $0x30] sm:$0xff]   ;;  %v6791_v60 = vld [vmem:[%s8584_s5 + $0x38] sm:$0xff]   ;;  %v6792_v62 = vld [vmem:[%s8585_s6] ss:$12 sps:$4 sm:$0xff]  }
 0x1bf   : > { %v6794_v61 = vld [vmem:[%s8585_s6 + $0x4] ss:$12 sps:$4 sm:$0xff]   ;;  %v6797_v63 = vld [vmem:[%s8585_s6 + $0x1c] ss:$12 sps:$4 sm:$0xff]  }
 0x1c0   : > { %v2015_v2 = vadd.f32 %v2014_v18, %v1918_v48  ;;  %6194 = vmatmul.mubr.msk.bf16.gmra.mrb[84].mxu1 %vm2460_vm2, %v2144_v27  ;;  %v1921_v0 = vadd.f32 %v5822_v1, %v7738_v38  ;;  %3322 = vmatprep.subr.bf16.mxu1 %v6794_v61  ;;  %v6795_v27 = vld [vmem:[%s8585_s6 + $0x18] ss:$12 sps:$4 sm:$0xff]   ;;  %v6800_v1 = vld [vmem:[%s8585_s6 + $0x34] ss:$12 sps:$4 sm:$0xff]   ;;  %v6798_v48 = vld [vmem:[%s8585_s6 + $0x30] ss:$12 sps:$4 sm:$0xff]  }
 0x1c1   : > { %3323 = vmatpush1.bf16.msra.mxu1 %v6792_v62  ;;  %v7899_v61 = vld [vmem:[%s7860_s19 + $0x20] ss:$8 sps:$4 sm:$0xff]  }
 0x1c2   : > { %v2018_v3 = vadd.f32 %v2017_v35, %v1921_v0  ;;  %v5823_v4 = vpop.f32.mrb[52].mxu0  ;;  %v2089_v6 = vmax.f32 %v2015_v2, 0.0  ;;  %3324 = vmatprep.subr.bf16.mxu1 %v6797_v63  ;;  %v6803_v2 = vld [vmem:[%s8585_s6 + $0x4c] ss:$12 sps:$4 sm:$0xff]   ;;  %v6801_v0 = vld [vmem:[%s8585_s6 + $0x48] ss:$12 sps:$4 sm:$0xff]  }
 0x1c3   : > { %v5824_v5 = vpop.f32.mrb[53].mxu0 }
 0x1c4   : > { %v2094_v7 = vmax.f32 %v2018_v3, 0.0  ;;  %v5825_v8 = vadd.f32 %v5824_v5, %v5823_v4  ;;  %v5826_v9 = vpop.f32.mrb[54].mxu0  ;;  %v6807_v3 = vld [vmem:[%s8585_s6 + $0x64] ss:$12 sps:$4 sm:$0xff]   ;;  %v6805_v4 = vld [vmem:[%s8585_s6 + $0x60] ss:$12 sps:$4 sm:$0xff]  }
 0x1c5   : > { %v5827_v10 = vpop.f32.mrb[55].mxu0  ;;  %3325 = vmatpush1.bf16.msra.mxu1 %v6795_v27  ;;  %v6811_v5 = vld [vmem:[%s8585_s6 + $0x7c] ss:$12 sps:$4 sm:$0xff]  }
 0x1c6   : > { %v2149_v11 = vpack.c.bf16 %v2094_v7, %v2089_v6  ;;  %v1926_v12 = vadd.f32 %v5825_v8, %v7738_v38  ;;  %v5828_v13 = vadd.f32 %v5827_v10, %v5826_v9  ;;  %3326 = vmatprep.subr.bf16.mxu1 %v6800_v1  ;;  %v6809_v6 = vld [vmem:[%s8585_s6 + $0x78] ss:$12 sps:$4 sm:$0xff]   ;;  %v6815_v7 = vld [vmem:[%s8585_s6 + $0x94] ss:$12 sps:$4 sm:$0xff]   ;;  %v6813_v8 = vld [vmem:[%s8585_s6 + $0x90] ss:$12 sps:$4 sm:$0xff]  }
 0x1c7   : > { %v6819_v9 = vld [vmem:[%s8585_s6 + $0xac] ss:$12 sps:$4 sm:$0xff]   ;;  %v6817_v10 = vld [vmem:[%s8585_s6 + $0xa8] ss:$12 sps:$4 sm:$0xff]  }
 0x1c8   : > { %v2023_v14 = vadd.f32 %v6175_v16, %v1926_v12  ;;  %v1929_v15 = vadd.f32 %v5828_v13, %v7738_v38  ;;  %6197 = vmatprep.mubr.msk.bf16.mxu1 %vm2460_vm2, %v2149_v11  ;;  %v6823_v11 = vld [vmem:[%s8585_s6 + $0xc4] ss:$12 sps:$4 sm:$0xff]   ;;  %v6821_v12 = vld [vmem:[%s8585_s6 + $0xc0] ss:$12 sps:$4 sm:$0xff]   ;;  %v3044_v13 = vld [vmem:[%s8585_s6 + $0xd8] sm:$0x77] }
 0x1c9   : > { %3327 = vmatpush1.bf16.msra.mxu1 %v6798_v48 }
 0x1ca   : > { %v2026_v17 = vadd.f32 %v6176_v33, %v1929_v15  ;;  %v5829_v18 = vpop.f32.mrb[56].mxu0  ;;  %v2099_v20 = vmax.f32 %v2023_v14, 0.0  ;;  %3328 = vmatprep.subr.bf16.mxu1 %v6803_v2  ;;  %v5654_v14 = vcombine.high %v3044_v13, %v3044_v13  ;;  %v5653_v15 = vcombine.low %v3044_v13, %v3044_v13  ;;  %v7914_v13 = vld [vmem:[%s7860_s19 + $0x30] ss:$8 sps:$4 sm:$0xff]  }
 0x1cb   : > { %v5830_v19 = vpop.f32.mrb[57].mxu0 }
 0x1cc   : > { %v2104_v21 = vmax.f32 %v2026_v17, 0.0  ;;  %v5831_v22 = vadd.f32 %v5830_v19, %v5829_v18  ;;  %v5832_v34 = vpop.f32.mrb[58].mxu0  ;;  %v3314_v17 = vsel %vm3312_vm3, %v5653_v15, 0  ;;  %v7863_v18 = vld [vmem:[%s7860_s19 + $0x4] ss:$8 sps:$4 sm:$0xff]  }
 0x1cd   : > { %v5833_v35 = vpop.f32.mrb[59].mxu0  ;;  %3329 = vmatpush1.bf16.msra.mxu1 %v6801_v0 }
 0x1ce   : > { %v2154_v23 = vpack.c.bf16 %v2104_v21, %v2099_v20  ;;  %v5834_v36 = vadd.f32 %v5833_v35, %v5832_v34  ;;  %v1934_v29 = vadd.f32 %v5831_v22, %v7738_v38  ;;  %3330 = vmatprep.subr.bf16.mxu1 %v6807_v3  ;;  %v7866_v21 = vld [vmem:[%s7860_s19] ss:$8 sps:$4 sm:$0xff]   ;;  %v7871_v22 = vld [vmem:[%s8594_s15 + $0x5] ss:$0 sm:$0xff] }
 0x1d0   : > { %v2031_v40 = vadd.f32 %v2030_v46, %v1934_v29  ;;  %6198 = vmatmul.mubr.msk.bf16.gmra.mrb[88].mxu1 %vm2460_vm2, %v2154_v23  ;;  %v1937_v16 = vadd.f32 %v5834_v36, %v7738_v38 }
 0x1d1   : > { %3331 = vmatpush1.bf16.msra.mxu1 %v6805_v4 }
 0x1d2   : > { %v2034_v41 = vadd.f32 %v2033_v51, %v1937_v16  ;;  %v5835_v42 = vpop.f32.mrb[60].mxu0  ;;  %v2109_v33 = vmax.f32 %v2031_v40, 0.0  ;;  %3332 = vmatprep.subr.bf16.mxu1 %v6811_v5 }
 0x1d3   : > { %v5836_v43 = vpop.f32.mrb[61].mxu0 }
 0x1d4   : > { %v2114_v45 = vmax.f32 %v2034_v41, 0.0  ;;  %v5837_v24 = vadd.f32 %v5836_v43, %v5835_v42  ;;  %v5838_v30 = vpop.f32.mrb[62].mxu0 }
 0x1d5   : > { %v5839_v47 = vpop.f32.mrb[63].mxu0  ;;  %3333 = vmatpush1.bf16.msra.mxu1 %v6809_v6 }
 0x1d6   : > { %v2159_v31 = vpack.c.bf16 %v2114_v45, %v2109_v33  ;;  %v1942_v50 = vadd.f32 %v5837_v24, %v7738_v38  ;;  %v5840_v52 = vadd.f32 %v5839_v47, %v5838_v30  ;;  %3334 = vmatprep.subr.bf16.mxu1 %v6815_v7  ;;  %v7881_v30 = vld [vmem:[%s7860_s19 + $0x14] ss:$8 sps:$4 sm:$0xff]   ;;  %v7884_v47 = vld [vmem:[%s7860_s19 + $0x10] ss:$8 sps:$4 sm:$0xff]  }
 0x1d8   : > { %v2039_v39 = vadd.f32 %v7748_v44, %v1942_v50  ;;  %v1945_v46 = vadd.f32 %v5840_v52, %v7738_v38  ;;  %6201 = vmatprep.mubr.msk.bf16.mxu1 %vm2460_vm2, %v2159_v31  ;;  %v6785_v44 = vld [vmem:[%s8584_s5 + $0x8] sm:$0xff]   ;;  %v6786_v38 = vld [vmem:[%s8584_s5 + $0x10] sm:$0xff]  }
 0x1d9   : > { %6207 = vmatprep.subr.bf16.mxu0 %v6785_v44  ;;  %3335 = vmatpush1.bf16.msra.mxu1 %v6813_v8 }
 0x1da   : > { %v2042_v53 = vadd.f32 %v7750_v49, %v1945_v46  ;;  %v2119_v51 = vmax.f32 %v2039_v39, 0.0  ;;  %6208 = vmatpush3.bf16.msra.mxu0 %v6785_v44  ;;  %v6787_v49 = vld [vmem:[%s8584_s5 + $0x18] sm:$0xff]   ;;  %3336 = vmatprep.subr.bf16.mxu1 %v6819_v9 }
 0x1db   : > { %6209 = vmatprep.subr.bf16.mxu0 %v6786_v38 }
 0x1dc   : > { %v2124_v54 = vmax.f32 %v2042_v53, 0.0 }
 0x1dd   : > { %3337 = vmatpush1.bf16.msra.mxu1 %v6817_v10 }
 0x1de   : > { %v2164_v55 = vpack.c.bf16 %v2124_v54, %v2119_v51  ;;  %6210 = vmatpush3.bf16.msra.mxu0 %v6786_v38  ;;  %3338 = vmatprep.subr.bf16.mxu1 %v6823_v11 }
 0x1df   : > { %6211 = vmatprep.subr.bf16.mxu0 %v6787_v49 }
 0x1e0   : > { %6202 = vmatmul.mubr.msk.bf16.gmra.mrb[92].mxu1 %vm2460_vm2, %v2164_v55 }
 0x1e1   : > { %3339 = vmatpush1.bf16.msra.mxu1 %v6821_v12  ;;  %5657 = vmatprep.mubr.msk.bf16.mxu1 %vm3287_vm4, %v7863_v18  ;;  %v7911_v12 = vld [vmem:[%s7860_s19 + $0x34] ss:$8 sps:$4 sm:$0xff]  }
 0x1e2   : > { %6212 = vmatpush3.bf16.msra.mxu0 %v6787_v49  ;;  %5656 = vmatprep.subr.msk.bf16.mxu1 %vm3312_vm3, %v5654_v14 }
 0x1e3   : > { %6213 = vmatprep.subr.bf16.mxu0 %v6788_v57 }
 0x1e5   : > { %3341 = vmatpush1.bf16.msra.mxu1 %v3314_v17 }
 0x1e6   : > { %6214 = vmatpush3.bf16.msra.mxu0 %v6788_v57 }
 0x1e7   : > { %6215 = vmatprep.subr.bf16.mxu0 %v6789_v58 }
 0x1e8   : > { %3355 = vmatmul.mubr.bf16.vlgmr.msra.gmra.mrb[96].mxu1 %v7866_v21 }
 0x1e9   : > { %5658 = vmatprep.mubr.msk.bf16.mxu1 %vm3287_vm4, %v7881_v30 }
 0x1ea   : > { %6216 = vmatpush3.bf16.msra.mxu0 %v6789_v58 }
 0x1eb   : > { %6217 = vmatprep.subr.bf16.mxu0 %v6790_v59 }
 0x1ee   : > { %6218 = vmatpush3.bf16.msra.mxu0 %v6790_v59 }
 0x1ef   : > { %6219 = vmatprep.subr.bf16.mxu0 %v6791_v60 }
 0x1f0   : > { %3365 = vmatmul.mubr.bf16.gmra.mrb[100].mxu1 %v7884_v47 }
 0x1f2   : > { %6220 = vmatpush3.bf16.msra.mxu0 %v6791_v60  ;;  %v7896_v60 = vld [vmem:[%s7860_s19 + $0x24] ss:$8 sps:$4 sm:$0xff]  }
 0x1f3   : > { %3435 = vmatprep.subr.bf16.mxu0 %v6981_v32  ;;  %5659 = vmatprep.mubr.msk.bf16.mxu1 %vm3287_vm4, %v7896_v60 }
 0x1f8   : > { %3375 = vmatmul.mubr.bf16.gmra.mrb[104].mxu1 %v7899_v61 }
 0x1f9   : > { %5660 = vmatprep.mubr.msk.bf16.mxu1 %vm3287_vm4, %v7911_v12 }
 0x200   : > { %3385 = vmatmul.mubr.bf16.gmra.mrb[108].mxu1 %v7914_v13 }
 0x238   : > { %v5868_v19 = vpop.f32.mrb[48].mxu1  ;;  %v5932_v20 = vpop.f32.mrb[64].mxu0 }
 0x239   : > { %v5869_v34 = vpop.f32.mrb[49].mxu1  ;;  %v5933_v35 = vpop.f32.mrb[65].mxu0 }
 0x23a   : > { %v5870_v23 = vadd.f32 %v5869_v34, %v5868_v19  ;;  %v5934_v36 = vadd.f32 %v5933_v35, %v5932_v20  ;;  %v5871_v29 = vpop.f32.mrb[50].mxu1  ;;  %v5935_v40 = vpop.f32.mrb[66].mxu0 }
 0x23b   : > { %v5872_v16 = vpop.f32.mrb[51].mxu1  ;;  %v5936_v41 = vpop.f32.mrb[67].mxu0 }
 0x23c   : > { %v2520_v42 = vadd.f32 %v5870_v23, %v7871_v22  ;;  %v5873_v43 = vadd.f32 %v5872_v16, %v5871_v29  ;;  %v5937_v33 = vadd.f32 %v5936_v41, %v5935_v40 }
 0x23e   : > { %v2523_v45 = vadd.f32 %v5873_v43, %v7871_v22  ;;  %v7878_v24 = vadd.f32 %v5934_v36, %v2520_v42 }
 0x240   : > { %v5874_v31 = vpop.f32.mrb[52].mxu1  ;;  %v5938_v50 = vpop.f32.mrb[68].mxu0  ;;  %v7886_v52 = vadd.f32 %v5937_v33, %v2523_v45  ;;  %v7926_v45 = vld [vmem:[%s7860_s19 + $0x44] ss:$8 sps:$4 sm:$0xff]  }
 0x241   : > { %v5875_v39 = vpop.f32.mrb[53].mxu1  ;;  %v5939_v46 = vpop.f32.mrb[69].mxu0  ;;  %5661 = vmatprep.mubr.msk.bf16.mxu1 %vm3287_vm4, %v7926_v45 }
 0x242   : > { %v5876_v53 = vadd.f32 %v5875_v39, %v5874_v31  ;;  %v5940_v51 = vadd.f32 %v5939_v46, %v5938_v50  ;;  %v5877_v54 = vpop.f32.mrb[54].mxu1  ;;  %v5941_v55 = vpop.f32.mrb[70].mxu0  ;;  %v7929_v31 = vld [vmem:[%s7860_s19 + $0x40] ss:$8 sps:$4 sm:$0xff]  }
 0x243   : > { %v5878_v56 = vpop.f32.mrb[55].mxu1  ;;  %v5942_v44 = vpop.f32.mrb[71].mxu0  ;;  %3395 = vmatmul.mubr.bf16.gmra.mrb[112].mxu1 %v7929_v31 }
 0x244   : > { %v2528_v38 = vadd.f32 %v5876_v53, %v7871_v22  ;;  %v5879_v49 = vadd.f32 %v5878_v56, %v5877_v54  ;;  %v5943_v57 = vadd.f32 %v5942_v44, %v5941_v55 }
 0x246   : > { %v2531_v58 = vadd.f32 %v5879_v49, %v7871_v22  ;;  %v7893_v59 = vadd.f32 %v5940_v51, %v2528_v38 }
 0x248   : > { %v5880_v62 = vpop.f32.mrb[56].mxu1  ;;  %v5944_v63 = vpop.f32.mrb[72].mxu0  ;;  %v7901_v27 = vadd.f32 %v5943_v57, %v2531_v58 }
 0x249   : > { %v5881_v1 = vpop.f32.mrb[57].mxu1  ;;  %v5945_v48 = vpop.f32.mrb[73].mxu0 }
 0x24a   : > { %v5882_v2 = vadd.f32 %v5881_v1, %v5880_v62  ;;  %v5946_v0 = vadd.f32 %v5945_v48, %v5944_v63  ;;  %v5883_v3 = vpop.f32.mrb[58].mxu1  ;;  %v5947_v4 = vpop.f32.mrb[74].mxu0  ;;  %v7941_v48 = vld [vmem:[%s7860_s19 + $0x54] ss:$8 sps:$4 sm:$0xff]  }
 0x24b   : > { %v5884_v5 = vpop.f32.mrb[59].mxu1  ;;  %v5948_v6 = vpop.f32.mrb[75].mxu0  ;;  %5662 = vmatprep.mubr.msk.bf16.mxu1 %vm3287_vm4, %v7941_v48 }
 0x24c   : > { %v2536_v7 = vadd.f32 %v5882_v2, %v7871_v22  ;;  %v5885_v8 = vadd.f32 %v5884_v5, %v5883_v3  ;;  %v5949_v9 = vadd.f32 %v5948_v6, %v5947_v4  ;;  %v7944_v2 = vld [vmem:[%s7860_s19 + $0x50] ss:$8 sps:$4 sm:$0xff]  }
 0x24d   : > { %3405 = vmatmul.mubr.bf16.gmra.mrb[116].mxu1 %v7944_v2 }
 0x24e   : > { %v2539_v10 = vadd.f32 %v5885_v8, %v7871_v22  ;;  %v7908_v11 = vadd.f32 %v5946_v0, %v2536_v7 }
 0x250   : > { %v5886_v14 = vpop.f32.mrb[60].mxu1  ;;  %v5950_v15 = vpop.f32.mrb[76].mxu0  ;;  %v7916_v17 = vadd.f32 %v5949_v9, %v2539_v10 }
 0x251   : > { %v5887_v19 = vpop.f32.mrb[61].mxu1  ;;  %v5951_v20 = vpop.f32.mrb[77].mxu0 }
 0x252   : > { %v5888_v34 = vadd.f32 %v5887_v19, %v5886_v14  ;;  %v5952_v35 = vadd.f32 %v5951_v20, %v5950_v15  ;;  %v5889_v23 = vpop.f32.mrb[62].mxu1  ;;  %v5953_v36 = vpop.f32.mrb[78].mxu0 }
 0x253   : > { %v5890_v29 = vpop.f32.mrb[63].mxu1  ;;  %v5954_v40 = vpop.f32.mrb[79].mxu0 }
 0x254   : > { %v2544_v16 = vadd.f32 %v5888_v34, %v7871_v22  ;;  %v5891_v41 = vadd.f32 %v5890_v29, %v5889_v23  ;;  %v5955_v42 = vadd.f32 %v5954_v40, %v5953_v36  ;;  %v7956_v36 = vld [vmem:[%s7860_s19 + $0x64] ss:$8 sps:$4 sm:$0xff]   ;;  %v7959_v29 = vld [vmem:[%s7860_s19 + $0x60] ss:$8 sps:$4 sm:$0xff]  }
 0x255   : > { %5663 = vmatprep.mubr.msk.bf16.mxu1 %vm3287_vm4, %v7956_v36 }
 0x256   : > { %v2547_v43 = vadd.f32 %v5891_v41, %v7871_v22  ;;  %v7923_v33 = vadd.f32 %v5952_v35, %v2544_v16  ;;  %3415 = vmatmul.mubr.bf16.gmra.mrb[120].mxu1 %v7959_v29 }
 0x258   : > { %v5892_v50 = vpop.f32.mrb[64].mxu1  ;;  %v5956_v39 = vpop.f32.mrb[80].mxu0  ;;  %v7931_v46 = vadd.f32 %v5955_v42, %v2547_v43 }
 0x259   : > { %v5893_v53 = vpop.f32.mrb[65].mxu1  ;;  %v5957_v51 = vpop.f32.mrb[81].mxu0 }
 0x25a   : > { %v5894_v54 = vadd.f32 %v5893_v53, %v5892_v50  ;;  %v5958_v55 = vadd.f32 %v5957_v51, %v5956_v39  ;;  %v5895_v56 = vpop.f32.mrb[66].mxu1  ;;  %v5959_v44 = vpop.f32.mrb[82].mxu0 }
 0x25b   : > { %v5896_v38 = vpop.f32.mrb[67].mxu1  ;;  %v5960_v49 = vpop.f32.mrb[83].mxu0 }
 0x25c   : > { %v2552_v57 = vadd.f32 %v5894_v54, %v7871_v22  ;;  %v5897_v58 = vadd.f32 %v5896_v38, %v5895_v56  ;;  %v5961_v62 = vadd.f32 %v5960_v49, %v5959_v44 }
 0x25e   : > { %v2555_v63 = vadd.f32 %v5897_v58, %v7871_v22  ;;  %v7938_v1 = vadd.f32 %v5958_v55, %v2552_v57  ;;  %v7971_v58 = vld [vmem:[%s7860_s19 + $0x74] ss:$8 sps:$4 sm:$0xff]  }
 0x25f   : > { %5664 = vmatprep.mubr.msk.bf16.mxu1 %vm3287_vm4, %v7971_v58 }
 0x260   : > { %v5898_v0 = vpop.f32.mrb[68].mxu1  ;;  %v5962_v3 = vpop.f32.mrb[84].mxu0  ;;  %v7946_v4 = vadd.f32 %v5961_v62, %v2555_v63  ;;  %v7974_v62 = vld [vmem:[%s7860_s19 + $0x70] ss:$8 sps:$4 sm:$0xff]  }
 0x261   : > { %v5899_v5 = vpop.f32.mrb[69].mxu1  ;;  %v5963_v6 = vpop.f32.mrb[85].mxu0  ;;  %3425 = vmatmul.mubr.bf16.gmra.mrb[124].mxu1 %v7974_v62 }
 0x262   : > { %v5900_v7 = vadd.f32 %v5899_v5, %v5898_v0  ;;  %v5964_v8 = vadd.f32 %v5963_v6, %v5962_v3  ;;  %v5901_v9 = vpop.f32.mrb[70].mxu1  ;;  %v5965_v10 = vpop.f32.mrb[86].mxu0 }
 0x263   : > { %v5902_v14 = vpop.f32.mrb[71].mxu1  ;;  %v5966_v15 = vpop.f32.mrb[87].mxu0 }
 0x264   : > { %v2560_v19 = vadd.f32 %v5900_v7, %v7871_v22  ;;  %v5903_v20 = vadd.f32 %v5902_v14, %v5901_v9  ;;  %v5967_v34 = vadd.f32 %v5966_v15, %v5965_v10 }
 0x266   : > { %v2563_v35 = vadd.f32 %v5903_v20, %v7871_v22  ;;  %v7953_v23 = vadd.f32 %v5964_v8, %v2560_v19 }
 0x268   : > { %v5904_v40 = vpop.f32.mrb[72].mxu1  ;;  %v5968_v16 = vpop.f32.mrb[88].mxu0  ;;  %v7961_v41 = vadd.f32 %v5967_v34, %v2563_v35 }
 0x269   : > { %v5905_v42 = vpop.f32.mrb[73].mxu1  ;;  %v5969_v43 = vpop.f32.mrb[89].mxu0 }
 0x26a   : > { %v5906_v50 = vadd.f32 %v5905_v42, %v5904_v40  ;;  %v5970_v39 = vadd.f32 %v5969_v43, %v5968_v16  ;;  %v5907_v53 = vpop.f32.mrb[74].mxu1  ;;  %v5971_v51 = vpop.f32.mrb[90].mxu0  ;;  %v6855_v42 = vld [vmem:[%s8586_s7 + $0x40] sm:$0xff]  }
 0x26b   : > { %v5908_v54 = vpop.f32.mrb[75].mxu1  ;;  %v5972_v55 = vpop.f32.mrb[91].mxu0  ;;  %v6856_v43 = vld [vmem:[%s8586_s7] sm:$0xff]   ;;  %6008 = vmatprep.subr.bf16.mxu1 %v6855_v42 }
 0x26c   : > { %v2568_v56 = vadd.f32 %v5906_v50, %v7871_v22  ;;  %v5909_v44 = vadd.f32 %v5908_v54, %v5907_v53  ;;  %v5973_v38 = vadd.f32 %v5972_v55, %v5971_v51  ;;  %6009 = vmatpush3.bf16.msra.mxu1 %v6856_v43 }
 0x26e   : > { %v2571_v49 = vadd.f32 %v5909_v44, %v7871_v22  ;;  %v7968_v57 = vadd.f32 %v5970_v39, %v2568_v56 }
 0x270   : > { %v5910_v63 = vpop.f32.mrb[76].mxu1  ;;  %v5974_v0 = vpop.f32.mrb[92].mxu0  ;;  %v7976_v3 = vadd.f32 %v5973_v38, %v2571_v49 }
 0x271   : > { %v5911_v5 = vpop.f32.mrb[77].mxu1  ;;  %v5975_v6 = vpop.f32.mrb[93].mxu0 }
 0x272   : > { %v5912_v7 = vadd.f32 %v5911_v5, %v5910_v63  ;;  %v5976_v8 = vadd.f32 %v5975_v6, %v5974_v0  ;;  %v5913_v9 = vpop.f32.mrb[78].mxu1  ;;  %v5977_v10 = vpop.f32.mrb[94].mxu0  ;;  %v6804_v6 = vld [vmem:[%s8585_s6 + $0x8] ss:$12 sps:$4 sm:$0xff]  }
 0x273   : > { %v5914_v14 = vpop.f32.mrb[79].mxu1  ;;  %v5978_v15 = vpop.f32.mrb[95].mxu0 }
 0x274   : > { %v2576_v19 = vadd.f32 %v5912_v7, %v7871_v22  ;;  %v5915_v20 = vadd.f32 %v5914_v14, %v5913_v9  ;;  %v5979_v34 = vadd.f32 %v5978_v15, %v5977_v10 }
 0x276   : > { %v2579_v35 = vadd.f32 %v5915_v20, %v7871_v22  ;;  %v7983_v40 = vadd.f32 %v5976_v8, %v2576_v19  ;;  %v6816_v19 = vld [vmem:[%s8585_s6 + $0x50] ss:$12 sps:$4 sm:$0xff]  }
 0x278   : > { %v7985_v16 = vadd.f32 %v5979_v34, %v2579_v35 }
 0x283   : > { %v6191_v50 = vpop.f32.mrb[80].mxu1 }
 0x284   : > { %v2722_v39 = vadd.f32 %v6191_v50, %v7893_v59  ;;  %v2713_v53 = vpop.f32.mrb[81].mxu1  ;;  %v6812_v59 = vld [vmem:[%s8585_s6 + $0x38] ss:$12 sps:$4 sm:$0xff]  }
 0x285   : > { %v2714_v22 = vadd.f32 %v2713_v53, %v7878_v24  ;;  %v6192_v51 = vpop.f32.mrb[82].mxu1  ;;  %v6808_v24 = vld [vmem:[%s8585_s6 + $0x20] ss:$12 sps:$4 sm:$0xff]   ;;  %v6826_v50 = vld [vmem:[%s8585_s6 + $0x98] ss:$12 sps:$4 sm:$0xff]  }
 0x286   : > { %v2725_v54 = vadd.f32 %v6192_v51, %v7901_v27  ;;  %v2716_v55 = vpop.f32.mrb[83].mxu1  ;;  %v2778_v44 = vmax.f32 %v2722_v39, 0.0 }
 0x287   : > { %v2717_v56 = vadd.f32 %v2716_v55, %v7886_v52  ;;  %v2776_v49 = vmax.f32 %v2714_v22, 0.0 }
 0x288   : > { %v2779_v38 = vmax.f32 %v2725_v54, 0.0 }
 0x289   : > { %v2777_v63 = vmax.f32 %v2717_v56, 0.0 }
 0x28a   : > { %v2793_v0 = vpack.c.bf16 %v2779_v38, %v2778_v44  ;;  %v6831_v44 = vld [vmem:[%s8585_s6 + $0xb0] ss:$12 sps:$4 sm:$0xff]  }
 0x28b   : > { %v2792_v5 = vpack.c.bf16 %v2777_v63, %v2776_v49 }
 0x28d   : > { %6221 = vmatprep.mubr.bf16.mxu0 %v2792_v5 }
 0x28e   : > { %6222 = vmatmul.mubr.bf16.vlgmr.msra.gmra.mrb[96].mxu0 %v2793_v0 }
 0x28f   : > { %3436 = vmatpush1.bf16.msra.mxu0 %v6804_v6 }
 0x290   : > { %3437 = vmatprep.subr.bf16.mxu0 %v6981_v32 }
 0x293   : > { %v6195_v52 = vpop.f32.mrb[84].mxu1  ;;  %3438 = vmatpush1.bf16.msra.mxu0 %v6808_v24 }
 0x294   : > { %v2738_v27 = vadd.f32 %v6195_v52, %v7923_v33  ;;  %v2729_v7 = vpop.f32.mrb[85].mxu1  ;;  %3439 = vmatprep.subr.bf16.mxu0 %v6981_v32 }
 0x295   : > { %v2730_v8 = vadd.f32 %v2729_v7, %v7908_v11  ;;  %v6196_v9 = vpop.f32.mrb[86].mxu1  ;;  %v6820_v11 = vld [vmem:[%s8585_s6 + $0x68] ss:$12 sps:$4 sm:$0xff]  }
 0x296   : > { %v2741_v10 = vadd.f32 %v6196_v9, %v7931_v46  ;;  %v2732_v14 = vpop.f32.mrb[87].mxu1  ;;  %v2782_v20 = vmax.f32 %v2738_v27, 0.0 }
 0x297   : > { %v2733_v15 = vadd.f32 %v2732_v14, %v7916_v17  ;;  %3440 = vmatpush1.bf16.msra.mxu0 %v6812_v59  ;;  %v2780_v33 = vmax.f32 %v2730_v8, 0.0  ;;  %v6824_v17 = vld [vmem:[%s8585_s6 + $0x80] ss:$12 sps:$4 sm:$0xff]  }
 0x298   : > { %v2783_v34 = vmax.f32 %v2741_v10, 0.0  ;;  %3441 = vmatprep.subr.bf16.mxu0 %v6981_v32 }
 0x299   : > { %v2781_v35 = vmax.f32 %v2733_v15, 0.0 }
 0x29a   : > { %v2795_v42 = vpack.c.bf16 %v2783_v34, %v2782_v20 }
 0x29b   : > { %v2794_v43 = vpack.c.bf16 %v2781_v35, %v2780_v33  ;;  %3442 = vmatpush1.bf16.msra.mxu0 %v6816_v19 }
 0x29c   : > { %3443 = vmatprep.subr.bf16.mxu0 %v6981_v32 }
 0x29d   : > { %6225 = vmatprep.mubr.bf16.mxu0 %v2794_v43 }
 0x29e   : > { %6226 = vmatmul.mubr.bf16.gmra.mrb[100].mxu0 %v2795_v42 }
 0x29f   : > { %3444 = vmatpush1.bf16.msra.mxu0 %v6820_v11  ;;  %v6870_v11 = vld [vmem:[%s8586_s7 + $0x78] sm:$0xff]  }
 0x2a0   : > { %3445 = vmatprep.subr.bf16.mxu0 %v6981_v32 }
 0x2a3   : > { %v6199_v46 = vpop.f32.mrb[88].mxu1  ;;  %3446 = vmatpush1.bf16.msra.mxu0 %v6824_v17 }
 0x2a4   : > { %v2754_v39 = vadd.f32 %v6199_v46, %v7953_v23  ;;  %v2745_v53 = vpop.f32.mrb[89].mxu1  ;;  %3447 = vmatprep.subr.bf16.mxu0 %v6981_v32  ;;  %v6871_v46 = vld [vmem:[%s8586_s7 + $0x38] sm:$0xff]  }
 0x2a5   : > { %v2746_v22 = vadd.f32 %v2745_v53, %v7938_v1  ;;  %v6200_v51 = vpop.f32.mrb[90].mxu1  ;;  %v6832_v1 = vld [vmem:[%s8585_s6 + $0xc8] ss:$12 sps:$4 sm:$0xff]  }
 0x2a6   : > { %v2757_v54 = vadd.f32 %v6200_v51, %v7961_v41  ;;  %v2748_v55 = vpop.f32.mrb[91].mxu1  ;;  %v2786_v38 = vmax.f32 %v2754_v39, 0.0 }
 0x2a7   : > { %v2749_v56 = vadd.f32 %v2748_v55, %v7946_v4  ;;  %3448 = vmatpush1.bf16.msra.mxu0 %v6826_v50  ;;  %v2784_v23 = vmax.f32 %v2746_v22, 0.0  ;;  %v6836_v4 = vld [vmem:[%s8585_s6 + $0xe0] ss:$0 sps:$4 sm:$0x77]  }
 0x2a8   : > { %v2787_v49 = vmax.f32 %v2757_v54, 0.0  ;;  %3449 = vmatprep.subr.bf16.mxu0 %v6981_v32  ;;  %v3320_v41 = vsel %vm3312_vm3, %v6836_v4, 0 }
 0x2a9   : > { %v2785_v63 = vmax.f32 %v2749_v56, 0.0 }
 0x2aa   : > { %v2797_v0 = vpack.c.bf16 %v2787_v49, %v2786_v38 }
 0x2ab   : > { %v2796_v5 = vpack.c.bf16 %v2785_v63, %v2784_v23  ;;  %3450 = vmatpush1.bf16.msra.mxu0 %v6831_v44 }
 0x2ac   : > { %3451 = vmatprep.subr.bf16.mxu0 %v6981_v32 }
 0x2ad   : > { %6229 = vmatprep.mubr.bf16.mxu0 %v2796_v5 }
 0x2ae   : > { %6230 = vmatmul.mubr.bf16.gmra.mrb[104].mxu0 %v2797_v0 }
 0x2af   : > { %3452 = vmatpush1.bf16.msra.mxu0 %v6832_v1 }
 0x2b0   : > { %3453 = vmatprep.subr.bf16.mxu0 %v6981_v32 }
 0x2b3   : > { %v6203_v6 = vpop.f32.mrb[92].mxu1  ;;  %3454 = vmatpush1.bf16.msra.mxu0 %v3320_v41 }
 0x2b4   : > { %v2770_v24 = vadd.f32 %v6203_v6, %v7983_v40  ;;  %v2761_v52 = vpop.f32.mrb[93].mxu1 }
 0x2b5   : > { %v2762_v59 = vadd.f32 %v2761_v52, %v7968_v57  ;;  %v6204_v27 = vpop.f32.mrb[94].mxu1 }
 0x2b6   : > { %v2773_v7 = vadd.f32 %v6204_v27, %v7985_v16  ;;  %v2764_v8 = vpop.f32.mrb[95].mxu1  ;;  %v2790_v10 = vmax.f32 %v2770_v24, 0.0 }
 0x2b7   : > { %v2765_v9 = vadd.f32 %v2764_v8, %v7976_v3  ;;  %v2788_v15 = vmax.f32 %v2762_v59, 0.0 }
 0x2b8   : > { %v2791_v14 = vmax.f32 %v2773_v7, 0.0 }
 0x2b9   : > { %v2789_v19 = vmax.f32 %v2765_v9, 0.0 }
 0x2ba   : > { %v2799_v32 = vpack.c.bf16 %v2791_v14, %v2790_v10 }
 0x2bb   : > { %v2798_v20 = vpack.c.bf16 %v2789_v19, %v2788_v15  ;;  %v6872_v19 = vld [vmem:[%s8586_s7 + $0x88] sm:$0xff]  }
 0x2bd   : > { %6233 = vmatprep.mubr.bf16.mxu0 %v2798_v20 }
 0x2be   : > { %6234 = vmatmul.mubr.bf16.gmra.mrb[108].mxu0 %v2799_v32 }
 0x2bf   : > { %5665 = vmatprep.mubr.msk.bf16.mxu0 %vm3287_vm4, %v7863_v18  ;;  %v6857_v18 = vld [vmem:[%s8586_s7 + $0x48] sm:$0xff]  }
 0x2c0   : > { %6010 = vmatprep.subr.bf16.mxu1 %v6857_v18 }
 0x2c6   : > { %3468 = vmatmul.mubr.bf16.vlgmr.msra.gmra.mrb[112].mxu0 %v7866_v21  ;;  %v6858_v21 = vld [vmem:[%s8586_s7 + $0x8] sm:$0xff]  }
 0x2c7   : > { %5666 = vmatprep.mubr.msk.bf16.mxu0 %vm3287_vm4, %v7881_v30  ;;  %v6859_v30 = vld [vmem:[%s8586_s7 + $0x50] sm:$0xff]   ;;  %6011 = vmatpush3.bf16.msra.mxu1 %v6858_v21 }
 0x2c8   : > { %6012 = vmatprep.subr.bf16.mxu1 %v6859_v30 }
 0x2ce   : > { %3476 = vmatmul.mubr.bf16.gmra.mrb[116].mxu0 %v7884_v47  ;;  %v6860_v47 = vld [vmem:[%s8586_s7 + $0x10] sm:$0xff]  }
 0x2cf   : > { %5667 = vmatprep.mubr.msk.bf16.mxu0 %vm3287_vm4, %v7896_v60  ;;  %6013 = vmatpush3.bf16.msra.mxu1 %v6860_v47  ;;  %v6861_v60 = vld [vmem:[%s8586_s7 + $0x58] sm:$0xff]  }
 0x2d0   : > { %6014 = vmatprep.subr.bf16.mxu1 %v6861_v60 }
 0x2d6   : > { %3484 = vmatmul.mubr.bf16.gmra.mrb[120].mxu0 %v7899_v61  ;;  %v6862_v61 = vld [vmem:[%s8586_s7 + $0x18] sm:$0xff]  }
 0x2d7   : > { %5668 = vmatprep.mubr.msk.bf16.mxu0 %vm3287_vm4, %v7911_v12  ;;  %v6863_v12 = vld [vmem:[%s8586_s7 + $0x60] sm:$0xff]   ;;  %6015 = vmatpush3.bf16.msra.mxu1 %v6862_v61 }
 0x2d8   : > { %6016 = vmatprep.subr.bf16.mxu1 %v6863_v12 }
 0x2de   : > { %3492 = vmatmul.mubr.bf16.gmra.mrb[124].mxu0 %v7914_v13  ;;  %v6864_v13 = vld [vmem:[%s8586_s7 + $0x20] sm:$0xff]  }
 0x2df   : > { %5669 = vmatprep.mubr.msk.bf16.mxu0 %vm3287_vm4, %v7926_v45  ;;  %6017 = vmatpush3.bf16.msra.mxu1 %v6864_v13  ;;  %v6865_v45 = vld [vmem:[%s8586_s7 + $0x80] sm:$0xff]  }
 0x2e0   : > { %6237 = vmatprep.subr.bf16.mxu0 %v6865_v45 }
 0x2e1   : > { %6238 = vmatpush3.bf16.msra.mxu0 %v6865_v45 }
 0x2e2   : > { %6239 = vmatprep.subr.bf16.mxu0 %v6872_v19 }
 0x2e5   : > { %6240 = vmatpush3.bf16.msra.mxu0 %v6872_v19 }
 0x2e6   : > { %3500 = vmatmul.mubr.bf16.gmra.mrb[128].mxu0 %v7929_v31  ;;  %v6866_v31 = vld [vmem:[%s8586_s7 + $0x68] sm:$0xff]  }
 0x2e7   : > { %5670 = vmatprep.mubr.msk.bf16.mxu0 %vm3287_vm4, %v7941_v48  ;;  %v6867_v48 = vld [vmem:[%s8586_s7 + $0x28] sm:$0xff]   ;;  %6018 = vmatprep.subr.bf16.mxu1 %v6866_v31 }
 0x2e8   : > { %6019 = vmatpush3.bf16.msra.mxu1 %v6867_v48 }
 0x2ee   : > { %3508 = vmatmul.mubr.bf16.gmra.mrb[132].mxu0 %v7944_v2  ;;  %v8109_v2 = vld [vmem:[%s8594_s15 + $0x7] sm:$0x7] }
 0x2ef   : > { %5671 = vmatprep.mubr.msk.bf16.mxu0 %vm3287_vm4, %v7956_v36  ;;  %v8114_v36 = vrot.slane %v8109_v2, %v726_v25  ;;  %v8122_v57 = vrot.slane %v8109_v2, %v730_v28 }
 0x2f6   : > { %3516 = vmatmul.mubr.bf16.gmra.mrb[136].mxu0 %v7959_v29  ;;  %v6868_v29 = vld [vmem:[%s8586_s7 + $0x70] sm:$0xff]  }
 0x2f7   : > { %5672 = vmatprep.mubr.msk.bf16.mxu0 %vm3287_vm4, %v7971_v58  ;;  %v6869_v58 = vld [vmem:[%s8586_s7 + $0x30] sm:$0xff]   ;;  %6020 = vmatprep.subr.bf16.mxu1 %v6868_v29 }
 0x2f8   : > { %6021 = vmatpush3.bf16.msra.mxu1 %v6869_v58 }
 0x2f9   : > { %6022 = vmatprep.subr.bf16.mxu1 %v6870_v11 }
 0x2fc   : > { %6023 = vmatpush3.bf16.msra.mxu1 %v6871_v46 }
 0x2fe   : > { %3524 = vmatmul.mubr.bf16.gmra.mrb[140].mxu0 %v7974_v62  ;;  %v3356_v62 = vpop.f32.mrb[96].mxu1 }
 0x2ff   : > { %v3357_v25 = vadd.f32 %v3356_v62, %v8114_v36  ;;  %v3358_v3 = vpop.f32.mrb[97].mxu1 }
 0x300   : > { %v3359_v40 = vadd.f32 %v3358_v3, %v8122_v57  ;;  %v3360_v16 = vpop.f32.mrb[98].mxu1 }
 0x301   : > { %v3532_v34 = vmax.f32 %v3357_v25, 0.0  ;;  %v3361_v33 = vadd.f32 %v3360_v16, %v8114_v36  ;;  %v3362_v35 = vpop.f32.mrb[99].mxu1 }
 0x302   : > { %v3533_v28 = vmax.f32 %v3359_v40, 0.0  ;;  %v3363_v42 = vadd.f32 %v3362_v35, %v8122_v57  ;;  %v3366_v53 = vpop.f32.mrb[100].mxu1 }
 0x303   : > { %v3535_v43 = vmax.f32 %v3361_v33, 0.0  ;;  %v3368_v22 = vpop.f32.mrb[101].mxu1  ;;  %v3367_v55 = vadd.f32 %v3366_v53, %v8114_v36 }
 0x304   : > { %v3536_v17 = vmax.f32 %v3363_v42, 0.0  ;;  %v3370_v51 = vpop.f32.mrb[102].mxu1  ;;  %v3369_v56 = vadd.f32 %v3368_v22, %v8122_v57 }
 0x305   : > { %v3580_v50 = vpack.c.bf16 %v3535_v43, %v3532_v34  ;;  %v3372_v54 = vpop.f32.mrb[103].mxu1  ;;  %v3371_v44 = vadd.f32 %v3370_v51, %v8114_v36  ;;  %v3538_v49 = vmax.f32 %v3367_v55, 0.0 }
 0x306   : > { %v3581_v39 = vpack.c.bf16 %v3536_v17, %v3533_v28  ;;  %v3373_v38 = vadd.f32 %v3372_v54, %v8122_v57  ;;  %v3539_v23 = vmax.f32 %v3369_v56, 0.0  ;;  %v3376_v4 = vpop.f32.mrb[104].mxu1 }
 0x307   : > { %v3541_v63 = vmax.f32 %v3371_v44, 0.0  ;;  %v3378_v41 = vpop.f32.mrb[105].mxu1  ;;  %v3377_v24 = vadd.f32 %v3376_v4, %v8114_v36 }
 0x308   : > { %3812 = vmatprep.mubr.bf16.mxu1 %v3581_v39  ;;  %v3542_v0 = vmax.f32 %v3373_v38, 0.0  ;;  %v3380_v6 = vpop.f32.mrb[106].mxu1  ;;  %v3379_v52 = vadd.f32 %v3378_v41, %v8122_v57 }
 0x309   : > { %3813 = vmatmul.mubr.bf16.vlgmr.msra.gmra.mrb[128].mxu1 %v3580_v50  ;;  %v3583_v5 = vpack.c.bf16 %v3541_v63, %v3538_v49  ;;  %v3381_v59 = vadd.f32 %v3380_v6, %v8114_v36  ;;  %v3382_v27 = vpop.f32.mrb[107].mxu1  ;;  %v3544_v8 = vmax.f32 %v3377_v24, 0.0 }
 0x30a   : > { %v3584_v1 = vpack.c.bf16 %v3542_v0, %v3539_v23  ;;  %v3383_v7 = vadd.f32 %v3382_v27, %v8122_v57  ;;  %v3545_v9 = vmax.f32 %v3379_v52, 0.0  ;;  %v3386_v20 = vpop.f32.mrb[108].mxu1 }
 0x30b   : > { %v3547_v10 = vmax.f32 %v3381_v59, 0.0  ;;  %v3388_v18 = vpop.f32.mrb[109].mxu1  ;;  %v3387_v30 = vadd.f32 %v3386_v20, %v8114_v36 }
 0x30c   : > { %3820 = vmatprep.mubr.bf16.mxu1 %v3584_v1  ;;  %v3548_v14 = vmax.f32 %v3383_v7, 0.0  ;;  %v3390_v21 = vpop.f32.mrb[110].mxu1  ;;  %v3389_v47 = vadd.f32 %v3388_v18, %v8122_v57 }
 0x30d   : > { %v3586_v15 = vpack.c.bf16 %v3547_v10, %v3544_v8  ;;  %v3391_v60 = vadd.f32 %v3390_v21, %v8114_v36  ;;  %v3392_v61 = vpop.f32.mrb[111].mxu1  ;;  %v3550_v13 = vmax.f32 %v3387_v30, 0.0 }
 0x30e   : > { %v3587_v32 = vpack.c.bf16 %v3548_v14, %v3545_v9  ;;  %v3393_v12 = vadd.f32 %v3392_v61, %v8122_v57  ;;  %v3551_v45 = vmax.f32 %v3389_v47, 0.0 }
 0x30f   : > { %v3553_v31 = vmax.f32 %v3391_v60, 0.0 }
 0x310   : > { %v3554_v48 = vmax.f32 %v3393_v12, 0.0 }
 0x311   : > { %3821 = vmatmul.mubr.bf16.gmra.mrb[132].mxu1 %v3583_v5  ;;  %v3589_v29 = vpack.c.bf16 %v3553_v31, %v3550_v13 }
 0x312   : > { %3828 = vmatprep.mubr.bf16.mxu1 %v3587_v32  ;;  %v3590_v58 = vpack.c.bf16 %v3554_v48, %v3551_v45  ;;  %v5601_v48 = vld [vmem:[%s8594_s15 + $0x6] ss:$0 sm:$0xff] }
 0x316   : > { %v3396_v62 = vpop.f32.mrb[112].mxu1 }
 0x317   : > { %v3398_v25 = vpop.f32.mrb[113].mxu1  ;;  %v3397_v40 = vadd.f32 %v3396_v62, %v8114_v36 }
 0x318   : > { %v3400_v3 = vpop.f32.mrb[114].mxu1  ;;  %v3399_v16 = vadd.f32 %v3398_v25, %v8122_v57 }
 0x319   : > { %3829 = vmatmul.mubr.bf16.gmra.mrb[136].mxu1 %v3586_v15  ;;  %v3401_v34 = vadd.f32 %v3400_v3, %v8114_v36  ;;  %v3402_v33 = vpop.f32.mrb[115].mxu1  ;;  %v3556_v28 = vmax.f32 %v3397_v40, 0.0 }
 0x31a   : > { %3836 = vmatprep.mubr.bf16.mxu1 %v3590_v58  ;;  %v3403_v35 = vadd.f32 %v3402_v33, %v8122_v57  ;;  %v3557_v42 = vmax.f32 %v3399_v16, 0.0 }
 0x31b   : > { %v3559_v43 = vmax.f32 %v3401_v34, 0.0 }
 0x31c   : > { %v3560_v11 = vmax.f32 %v3403_v35, 0.0 }
 0x31d   : > { %v3592_v17 = vpack.c.bf16 %v3559_v43, %v3556_v28 }
 0x31e   : > { %v3593_v46 = vpack.c.bf16 %v3560_v11, %v3557_v42 }
 0x320   : > { %v3406_v50 = vpop.f32.mrb[116].mxu1 }
 0x321   : > { %3837 = vmatmul.mubr.bf16.gmra.mrb[140].mxu1 %v3589_v29  ;;  %v3408_v39 = vpop.f32.mrb[117].mxu1  ;;  %v3407_v22 = vadd.f32 %v3406_v50, %v8114_v36 }
 0x322   : > { %v3410_v53 = vpop.f32.mrb[118].mxu1  ;;  %3844 = vmatprep.mubr.bf16.mxu1 %v3593_v46  ;;  %v3409_v51 = vadd.f32 %v3408_v39, %v8122_v57 }
 0x323   : > { %v3411_v54 = vadd.f32 %v3410_v53, %v8114_v36  ;;  %v3412_v55 = vpop.f32.mrb[119].mxu1  ;;  %v3562_v44 = vmax.f32 %v3407_v22, 0.0 }
 0x324   : > { %v3413_v56 = vadd.f32 %v3412_v55, %v8122_v57  ;;  %v3563_v38 = vmax.f32 %v3409_v51, 0.0 }
 0x325   : > { %v3565_v49 = vmax.f32 %v3411_v54, 0.0 }
 0x326   : > { %v3566_v23 = vmax.f32 %v3413_v56, 0.0 }
 0x327   : > { %v3595_v63 = vpack.c.bf16 %v3565_v49, %v3562_v44  ;;  %v6873_v44 = vld [vmem:[%s8587_s8] sm:$0xff]  }
 0x328   : > { %v3596_v0 = vpack.c.bf16 %v3566_v23, %v3563_v38  ;;  %6257 = vmatprep.subr.bf16.mxu0 %v6873_v44 }
 0x329   : > { %3845 = vmatmul.mubr.bf16.gmra.mrb[144].mxu1 %v3592_v17  ;;  %v3416_v5 = vpop.f32.mrb[120].mxu1 }
 0x32a   : > { %v3418_v1 = vpop.f32.mrb[121].mxu1  ;;  %3852 = vmatprep.mubr.bf16.mxu1 %v3596_v0  ;;  %v3417_v41 = vadd.f32 %v3416_v5, %v8114_v36 }
 0x32b   : > { %v3420_v4 = vpop.f32.mrb[122].mxu1  ;;  %v3419_v6 = vadd.f32 %v3418_v1, %v8122_v57 }
 0x32c   : > { %v3421_v24 = vadd.f32 %v3420_v4, %v8114_v36  ;;  %v3422_v52 = vpop.f32.mrb[123].mxu1  ;;  %v3568_v27 = vmax.f32 %v3417_v41, 0.0 }
 0x32d   : > { %v3423_v59 = vadd.f32 %v3422_v52, %v8122_v57  ;;  %v3569_v7 = vmax.f32 %v3419_v6, 0.0 }
 0x32e   : > { %v3571_v8 = vmax.f32 %v3421_v24, 0.0 }
 0x32f   : > { %v3572_v9 = vmax.f32 %v3423_v59, 0.0 }
 0x330   : > { %v3598_v10 = vpack.c.bf16 %v3571_v8, %v3568_v27 }
 0x331   : > { %3853 = vmatmul.mubr.bf16.gmra.mrb[148].mxu1 %v3595_v63  ;;  %v3599_v14 = vpack.c.bf16 %v3572_v9, %v3569_v7 }
 0x333   : > { %3860 = vmatprep.mubr.bf16.mxu1 %v3599_v14 }
 0x334   : > { %v3426_v15 = vpop.f32.mrb[124].mxu1 }
 0x335   : > { %v3428_v19 = vpop.f32.mrb[125].mxu1  ;;  %v3427_v20 = vadd.f32 %v3426_v15, %v8114_v36 }
 0x336   : > { %v3430_v32 = vpop.f32.mrb[126].mxu1  ;;  %v3429_v18 = vadd.f32 %v3428_v19, %v8122_v57 }
 0x337   : > { %v3431_v21 = vadd.f32 %v3430_v32, %v8114_v36  ;;  %v3432_v30 = vpop.f32.mrb[127].mxu1  ;;  %v3574_v60 = vmax.f32 %v3427_v20, 0.0 }
 0x338   : > { %v3433_v47 = vadd.f32 %v3432_v30, %v8122_v57  ;;  %v3575_v61 = vmax.f32 %v3429_v18, 0.0 }
 0x339   : > { %3861 = vmatmul.mubr.bf16.gmra.mrb[152].mxu1 %v3598_v10  ;;  %v3577_v12 = vmax.f32 %v3431_v21, 0.0 }
 0x33a   : > { %v3578_v13 = vmax.f32 %v3433_v47, 0.0  ;;  %v8189_v47 = vrot.slane %v8109_v2, %v734_v26 }
 0x33b   : > { %v3601_v45 = vpack.c.bf16 %v3577_v12, %v3574_v60 }
 0x33c   : > { %v3602_v31 = vpack.c.bf16 %v3578_v13, %v3575_v61 }
 0x33e   : > { %3868 = vmatprep.mubr.bf16.mxu1 %v3602_v31 }
 0x341   : > { %3869 = vmatmul.mubr.bf16.gmra.mrb[156].mxu1 %v3601_v45 }
 0x361   : > { %v6223_v29 = vpop.f32.mrb[96].mxu0 }
 0x362   : > { %v2914_v58 = vadd.f32 %v6223_v29, %v5601_v48  ;;  %v2905_v62 = vpop.f32.mrb[97].mxu0 }
 0x363   : > { %v2906_v36 = vadd.f32 %v5601_v48, %v2905_v62  ;;  %v6224_v25 = vpop.f32.mrb[98].mxu0 }
 0x364   : > { %v2917_v3 = vadd.f32 %v6224_v25, %v5601_v48  ;;  %v2908_v40 = vpop.f32.mrb[99].mxu0  ;;  %v2970_v16 = vmax.f32 %v2914_v58, 0.0 }
 0x365   : > { %v2909_v57 = vadd.f32 %v5601_v48, %v2908_v40  ;;  %v2968_v33 = vmax.f32 %v2906_v36, 0.0 }
 0x366   : > { %v2971_v34 = vmax.f32 %v2917_v3, 0.0 }
 0x367   : > { %v2969_v35 = vmax.f32 %v2909_v57, 0.0 }
 0x368   : > { %v8171_v28 = vpack.c.bf16 %v2971_v34, %v2970_v16 }
 0x369   : > { %v8173_v42 = vpack.c.bf16 %v2969_v35, %v2968_v33 }
 0x371   : > { %v6227_v43 = vpop.f32.mrb[100].mxu0 }
 0x372   : > { %v2930_v11 = vadd.f32 %v6227_v43, %v5601_v48  ;;  %v2921_v17 = vpop.f32.mrb[101].mxu0  ;;  %v6874_v43 = vld [vmem:[%s8587_s8 + $0x8] sm:$0xff]  }
 0x373   : > { %v2922_v46 = vadd.f32 %v5601_v48, %v2921_v17  ;;  %v6228_v50 = vpop.f32.mrb[102].mxu0 }
 0x374   : > { %v2933_v39 = vadd.f32 %v6228_v50, %v5601_v48  ;;  %v2924_v53 = vpop.f32.mrb[103].mxu0  ;;  %v2974_v51 = vmax.f32 %v2930_v11, 0.0 }
 0x375   : > { %v2925_v22 = vadd.f32 %v5601_v48, %v2924_v53  ;;  %v2972_v55 = vmax.f32 %v2922_v46, 0.0 }
 0x376   : > { %v2975_v54 = vmax.f32 %v2933_v39, 0.0 }
 0x377   : > { %v2973_v56 = vmax.f32 %v2925_v22, 0.0 }
 0x378   : > { %v8178_v38 = vpack.c.bf16 %v2975_v54, %v2974_v51 }
 0x379   : > { %v8180_v49 = vpack.c.bf16 %v2973_v56, %v2972_v55 }
 0x381   : > { %v6231_v23 = vpop.f32.mrb[104].mxu0 }
 0x382   : > { %v2946_v63 = vadd.f32 %v6231_v23, %v5601_v48  ;;  %v2937_v0 = vpop.f32.mrb[105].mxu0 }
 0x383   : > { %v2938_v5 = vadd.f32 %v5601_v48, %v2937_v0  ;;  %v6232_v1 = vpop.f32.mrb[106].mxu0 }
 0x384   : > { %v2949_v4 = vadd.f32 %v6232_v1, %v5601_v48  ;;  %v2940_v41 = vpop.f32.mrb[107].mxu0  ;;  %v2978_v24 = vmax.f32 %v2946_v63, 0.0 }
 0x385   : > { %v2941_v6 = vadd.f32 %v5601_v48, %v2940_v41  ;;  %v2976_v59 = vmax.f32 %v2938_v5, 0.0 }
 0x386   : > { %v2979_v52 = vmax.f32 %v2949_v4, 0.0 }
 0x387   : > { %v2977_v27 = vmax.f32 %v2941_v6, 0.0 }
 0x388   : > { %v8182_v7 = vpack.c.bf16 %v2979_v52, %v2978_v24 }
 0x389   : > { %v8184_v8 = vpack.c.bf16 %v2977_v27, %v2976_v59 }
 0x391   : > { %v6235_v9 = vpop.f32.mrb[108].mxu0 }
 0x392   : > { %v2962_v10 = vadd.f32 %v6235_v9, %v5601_v48  ;;  %v2953_v14 = vpop.f32.mrb[109].mxu0 }
 0x393   : > { %v2954_v15 = vadd.f32 %v5601_v48, %v2953_v14  ;;  %v6236_v19 = vpop.f32.mrb[110].mxu0 }
 0x394   : > { %v2965_v32 = vadd.f32 %v6236_v19, %v5601_v48  ;;  %v2956_v20 = vpop.f32.mrb[111].mxu0  ;;  %v2982_v21 = vmax.f32 %v2962_v10, 0.0 }
 0x395   : > { %v2957_v18 = vadd.f32 %v5601_v48, %v2956_v20  ;;  %v2980_v60 = vmax.f32 %v2954_v15, 0.0 }
 0x396   : > { %v2983_v30 = vmax.f32 %v2965_v32, 0.0 }
 0x397   : > { %v2981_v61 = vmax.f32 %v2957_v18, 0.0 }
 0x398   : > { %v8191_v12 = vpack.c.bf16 %v2983_v30, %v2982_v21 }
 0x399   : > { %v8193_v13 = vpack.c.bf16 %v2981_v61, %v2980_v60  ;;  %v3469_v45 = vpop.f32.mrb[112].mxu0 }
 0x39a   : > { %v3470_v31 = vadd.f32 %v3469_v45, %v8189_v47  ;;  %v3471_v29 = vpop.f32.mrb[113].mxu0 }
 0x39b   : > { %v3472_v58 = vpop.f32.mrb[114].mxu0 }
 0x39c   : > { %v3473_v48 = vadd.f32 %v3472_v58, %v8189_v47  ;;  %v3474_v62 = vpop.f32.mrb[115].mxu0  ;;  %v3534_v36 = vmax.f32 %v3470_v31, 0.0 }
 0x39e   : > { %v3537_v25 = vmax.f32 %v3473_v48, 0.0 }
 0x3a0   : > { %v3582_v37 = vpack.c.bf16 %v3537_v25, %v3534_v36 }
 0x3a1   : > { %v3477_v26 = vpop.f32.mrb[116].mxu0 }
 0x3a2   : > { %v3478_v2 = vadd.f32 %v3477_v26, %v8189_v47  ;;  %v3479_v3 = vpop.f32.mrb[117].mxu0  ;;  %6241 = vmatprep.mubr.msk.bf16.mxu0 %vm3755_vm5, %v3582_v37 }
 0x3a3   : > { %v3480_v40 = vpop.f32.mrb[118].mxu0 }
 0x3a4   : > { %v3481_v57 = vadd.f32 %v3480_v40, %v8189_v47  ;;  %v3482_v16 = vpop.f32.mrb[119].mxu0  ;;  %v3540_v34 = vmax.f32 %v3478_v2, 0.0 }
 0x3a6   : > { %v3543_v33 = vmax.f32 %v3481_v57, 0.0 }
 0x3a8   : > { %v3585_v35 = vpack.c.bf16 %v3543_v33, %v3540_v34 }
 0x3a9   : > { %v3485_v11 = vpop.f32.mrb[120].mxu0 }
 0x3aa   : > { %v3486_v17 = vadd.f32 %v3485_v11, %v8189_v47  ;;  %v3487_v46 = vpop.f32.mrb[121].mxu0  ;;  %6242 = vmatmul.mubr.msk.bf16.vlgmr.msra.gmra.mrb[144].mxu0 %vm3755_vm5, %v3585_v35 }
 0x3ab   : > { %v3488_v50 = vpop.f32.mrb[122].mxu0  ;;  %6258 = vmatpush3.bf16.msra.mxu0 %v6873_v44 }
 0x3ac   : > { %v3489_v39 = vadd.f32 %v3488_v50, %v8189_v47  ;;  %v3490_v53 = vpop.f32.mrb[123].mxu0  ;;  %6259 = vmatprep.subr.bf16.mxu0 %v6874_v43  ;;  %v3546_v22 = vmax.f32 %v3486_v17, 0.0 }
 0x3ae   : > { %v3549_v51 = vmax.f32 %v3489_v39, 0.0 }
 0x3af   : > { %6260 = vmatpush3.bf16.msra.mxu0 %v6874_v43 }
 0x3b0   : > { %v3588_v54 = vpack.c.bf16 %v3549_v51, %v3546_v22 }
 0x3b1   : > { %v3493_v55 = vpop.f32.mrb[124].mxu0 }
 0x3b2   : > { %v3494_v56 = vadd.f32 %v3493_v55, %v8189_v47  ;;  %v3495_v23 = vpop.f32.mrb[125].mxu0  ;;  %6245 = vmatprep.mubr.msk.bf16.mxu0 %vm3755_vm5, %v3588_v54 }
 0x3b3   : > { %v3496_v63 = vpop.f32.mrb[126].mxu0 }
 0x3b4   : > { %v3497_v0 = vadd.f32 %v3496_v63, %v8189_v47  ;;  %v3498_v5 = vpop.f32.mrb[127].mxu0  ;;  %v3552_v1 = vmax.f32 %v3494_v56, 0.0 }
 0x3b6   : > { %v3555_v44 = vmax.f32 %v3497_v0, 0.0 }
 0x3b8   : > { %v3591_v4 = vpack.c.bf16 %v3555_v44, %v3552_v1  ;;  %v6875_v1 = vld [vmem:[%s8587_s8 + $0x10] sm:$0xff]  }
 0x3b9   : > { %v3501_v41 = vpop.f32.mrb[128].mxu0  ;;  %6261 = vmatprep.subr.bf16.mxu0 %v6875_v1 }
 0x3ba   : > { %v3502_v6 = vadd.f32 %v3501_v41, %v8189_v47  ;;  %v3503_v24 = vpop.f32.mrb[129].mxu0  ;;  %6246 = vmatmul.mubr.msk.bf16.gmra.mrb[148].mxu0 %vm3755_vm5, %v3591_v4  ;;  %v6876_v4 = vld [vmem:[%s8587_s8 + $0x18] sm:$0xff]  }
 0x3bb   : > { %v3504_v52 = vpop.f32.mrb[130].mxu0  ;;  %6262 = vmatpush3.bf16.msra.mxu0 %v6875_v1 }
 0x3bc   : > { %v3505_v59 = vadd.f32 %v3504_v52, %v8189_v47  ;;  %v3506_v27 = vpop.f32.mrb[131].mxu0  ;;  %v3558_v9 = vmax.f32 %v3502_v6, 0.0  ;;  %6263 = vmatprep.subr.bf16.mxu0 %v6876_v4 }
 0x3be   : > { %v3561_v10 = vmax.f32 %v3505_v59, 0.0 }
 0x3bf   : > { %6264 = vmatpush3.bf16.msra.mxu0 %v6876_v4 }
 0x3c0   : > { %v3594_v14 = vpack.c.bf16 %v3561_v10, %v3558_v9 }
 0x3c1   : > { %v3509_v15 = vpop.f32.mrb[132].mxu0 }
 0x3c2   : > { %v3510_v19 = vadd.f32 %v3509_v15, %v8189_v47  ;;  %v3511_v32 = vpop.f32.mrb[133].mxu0  ;;  %6249 = vmatprep.mubr.msk.bf16.mxu0 %vm3755_vm5, %v3594_v14 }
 0x3c3   : > { %v3512_v20 = vpop.f32.mrb[134].mxu0 }
 0x3c4   : > { %v3513_v18 = vadd.f32 %v3512_v20, %v8189_v47  ;;  %v3514_v21 = vpop.f32.mrb[135].mxu0  ;;  %v3564_v30 = vmax.f32 %v3510_v19, 0.0 }
 0x3c6   : > { %v3567_v60 = vmax.f32 %v3513_v18, 0.0 }
 0x3c8   : > { %v3597_v61 = vpack.c.bf16 %v3567_v60, %v3564_v30 }
 0x3c9   : > { %v3517_v45 = vpop.f32.mrb[136].mxu0 }
 0x3ca   : > { %v3518_v31 = vadd.f32 %v3517_v45, %v8189_v47  ;;  %v3519_v29 = vpop.f32.mrb[137].mxu0  ;;  %6250 = vmatmul.mubr.msk.bf16.gmra.mrb[152].mxu0 %vm3755_vm5, %v3597_v61 }
 0x3cb   : > { %v3520_v58 = vpop.f32.mrb[138].mxu0 }
 0x3cc   : > { %v3521_v48 = vadd.f32 %v3520_v58, %v8189_v47  ;;  %v3522_v62 = vpop.f32.mrb[139].mxu0  ;;  %v3570_v36 = vmax.f32 %v3518_v31, 0.0 }
 0x3ce   : > { %v3573_v25 = vmax.f32 %v3521_v48, 0.0 }
 0x3d0   : > { %v3600_v37 = vpack.c.bf16 %v3573_v25, %v3570_v36 }
 0x3d1   : > { %v3525_v26 = vpop.f32.mrb[140].mxu0 }
 0x3d2   : > { %v3526_v2 = vadd.f32 %v3525_v26, %v8189_v47  ;;  %v3527_v3 = vpop.f32.mrb[141].mxu0  ;;  %6253 = vmatprep.mubr.msk.bf16.mxu0 %vm3755_vm5, %v3600_v37 }
 0x3d3   : > { %v3528_v40 = vpop.f32.mrb[142].mxu0 }
 0x3d4   : > { %v3529_v57 = vadd.f32 %v3528_v40, %v8189_v47  ;;  %v3530_v16 = vpop.f32.mrb[143].mxu0  ;;  %v3576_v34 = vmax.f32 %v3526_v2, 0.0  ;;  %v6877_v40 = vld [vmem:[%s8589_s10] sm:$0xff]  }
 0x3d5   : > { %6281 = vmatprep.subr.bf16.mxu1 %v6877_v40  ;;  %v8259_v16 = vld [vmem:[%s8594_s15 + $0xa] ss:$0 sm:$0xff] }
 0x3d6   : > { %v3579_v33 = vmax.f32 %v3529_v57, 0.0  ;;  %v6878_v57 = vld [vmem:[%s8589_s10 + $0x8] sm:$0xff]   ;;  %6282 = vmatpush3.bf16.msra.mxu1 %v6877_v40 }
 0x3d7   : > { %6283 = vmatprep.subr.bf16.mxu1 %v6878_v57 }
 0x3d8   : > { %v3603_v35 = vpack.c.bf16 %v3579_v33, %v3576_v34 }
 0x3da   : > { %6254 = vmatmul.mubr.msk.bf16.gmra.mrb[156].mxu0 %vm3755_vm5, %v3603_v35  ;;  %6284 = vmatpush3.bf16.msra.mxu1 %v6878_v57 }
 0x3dc   : > { %v6024_v43 = vpop.f32.mrb[128].mxu1 }
 0x3dd   : > { %v6025_v11 = vpop.f32.mrb[129].mxu1 }
 0x3de   : > { %v6026_v17 = vadd.f32 %v6025_v11, %v6024_v43  ;;  %v6027_v46 = vpop.f32.mrb[130].mxu1 }
 0x3df   : > { %v6028_v50 = vpop.f32.mrb[131].mxu1 }
 0x3e0   : > { %v8222_v39 = vadd.f32 %v6028_v50, %v6027_v46  ;;  %v3815_v35 = vadd.f32 %v6026_v17, %v8259_v16 }
 0x3e4   : > { %v6030_v53 = vpop.f32.mrb[132].mxu1 }
 0x3e5   : > { %v6031_v22 = vpop.f32.mrb[133].mxu1 }
 0x3e6   : > { %v6032_v51 = vadd.f32 %v6031_v22, %v6030_v53  ;;  %v6033_v54 = vpop.f32.mrb[134].mxu1  ;;  %v3818_v22 = vadd.f32 %v8222_v39, %v8259_v16 }
 0x3e7   : > { %v6034_v55 = vpop.f32.mrb[135].mxu1 }
 0x3e8   : > { %v6035_v56 = vadd.f32 %v6034_v55, %v6033_v54  ;;  %v3823_v34 = vadd.f32 %v6032_v51, %v8259_v16 }
 0x3ea   : > { %v3826_v46 = vadd.f32 %v6035_v56, %v8259_v16 }
 0x3ec   : > { %v6036_v47 = vpop.f32.mrb[136].mxu1 }
 0x3ed   : > { %v6037_v23 = vpop.f32.mrb[137].mxu1 }
 0x3ee   : > { %v8224_v63 = vadd.f32 %v6037_v23, %v6036_v47  ;;  %v6039_v0 = vpop.f32.mrb[138].mxu1 }
 0x3ef   : > { %v6040_v5 = vpop.f32.mrb[139].mxu1 }
 0x3f0   : > { %v8229_v44 = vadd.f32 %v6040_v5, %v6039_v0 }
 0x3f4   : > { %v6042_v41 = vpop.f32.mrb[140].mxu1 }
 0x3f5   : > { %v6043_v6 = vpop.f32.mrb[141].mxu1 }
 0x3f6   : > { %v6044_v24 = vadd.f32 %v6043_v6, %v6042_v41  ;;  %v6045_v52 = vpop.f32.mrb[142].mxu1  ;;  %v3831_v41 = vadd.f32 %v8224_v63, %v8259_v16 }
 0x3f7   : > { %v6046_v59 = vpop.f32.mrb[143].mxu1 }
 0x3f8   : > { %v6047_v27 = vadd.f32 %v6046_v59, %v6045_v52  ;;  %v3839_v17 = vadd.f32 %v6044_v24, %v8259_v16 }
 0x3fa   : > { %v3842_v52 = vadd.f32 %v6047_v27, %v8259_v16 }
 0x3fc   : > { %v6048_v9 = vpop.f32.mrb[144].mxu1 }
 0x3fd   : > { %v6049_v10 = vpop.f32.mrb[145].mxu1 }
 0x3fe   : > { %v8234_v14 = vadd.f32 %v6049_v10, %v6048_v9  ;;  %v6051_v15 = vpop.f32.mrb[146].mxu1  ;;  %v3834_v10 = vadd.f32 %v8229_v44, %v8259_v16 }
 0x3ff   : > { %v6052_v19 = vpop.f32.mrb[147].mxu1 }
 0x400   : > { %v8236_v32 = vadd.f32 %v6052_v19, %v6051_v15  ;;  %v3847_v44 = vadd.f32 %v8234_v14, %v8259_v16 }
 0x404   : > { %v6054_v20 = vpop.f32.mrb[148].mxu1 }
 0x405   : > { %v6055_v18 = vpop.f32.mrb[149].mxu1 }
 0x406   : > { %v8238_v21 = vadd.f32 %v6055_v18, %v6054_v20  ;;  %v6057_v30 = vpop.f32.mrb[150].mxu1 }
 0x407   : > { %v6058_v60 = vpop.f32.mrb[151].mxu1 }
 0x408   : > { %v8240_v61 = vadd.f32 %v6058_v60, %v6057_v30  ;;  %v3855_v63 = vadd.f32 %v8238_v21, %v8259_v16 }
 0x40c   : > { %v6060_v45 = vpop.f32.mrb[152].mxu1 }
 0x40d   : > { %v6061_v31 = vpop.f32.mrb[153].mxu1 }
 0x40e   : > { %v8242_v29 = vadd.f32 %v6061_v31, %v6060_v45  ;;  %v6063_v58 = vpop.f32.mrb[154].mxu1 }
 0x40f   : > { %v6064_v48 = vpop.f32.mrb[155].mxu1 }
 0x410   : > { %v8244_v62 = vadd.f32 %v6064_v48, %v6063_v58 }
 0x414   : > { %v6066_v36 = vpop.f32.mrb[156].mxu1 }
 0x415   : > { %v6067_v25 = vpop.f32.mrb[157].mxu1 }
 0x416   : > { %v8246_v37 = vadd.f32 %v6067_v25, %v6066_v36  ;;  %v6069_v26 = vpop.f32.mrb[158].mxu1  ;;  %v3858_v36 = vadd.f32 %v8240_v61, %v8259_v16 }
 0x417   : > { %v6070_v2 = vpop.f32.mrb[159].mxu1 }
 0x418   : > { %v8248_v3 = vadd.f32 %v6070_v2, %v6069_v26  ;;  %v3850_v2 = vadd.f32 %v8236_v32, %v8259_v16  ;;  %v3871_v14 = vadd.f32 %v8246_v37, %v8259_v16  ;;  %v3863_v32 = vadd.f32 %v8242_v29, %v8259_v16 }
 0x47d   : > { %v6243_v33 = vpop.f32.mrb[144].mxu0 }
 0x47e   : > { %v3920_v43 = vadd.f32 %v6243_v33, %v3823_v34  ;;  %v3911_v11 = vpop.f32.mrb[145].mxu0 }
 0x47f   : > { %v3912_v50 = vadd.f32 %v3911_v11, %v3815_v35  ;;  %v6244_v53 = vpop.f32.mrb[146].mxu0 }
 0x480   : > { %v3923_v54 = vadd.f32 %v6244_v53, %v3826_v46  ;;  %v3914_v55 = vpop.f32.mrb[147].mxu0  ;;  %v3976_v23 = vmax.f32 %v3920_v43, 0.0 }
 0x481   : > { %v3915_v47 = vadd.f32 %v3914_v55, %v3818_v22  ;;  %v3974_v5 = vmax.f32 %v3912_v50, 0.0  ;;  %v3874_v22 = vadd.f32 %v8248_v3, %v8259_v16  ;;  %v6879_v3 = vld [vmem:[%s8589_s10 + $0x10] sm:$0xff]  }
 0x482   : > { %v3977_v0 = vmax.f32 %v3923_v54, 0.0  ;;  %6285 = vmatprep.subr.bf16.mxu1 %v6879_v3 }
 0x483   : > { %v3975_v1 = vmax.f32 %v3915_v47, 0.0  ;;  %v3866_v47 = vadd.f32 %v8244_v62, %v8259_v16  ;;  %6286 = vmatpush3.bf16.msra.mxu1 %v6879_v3  ;;  %v6880_v62 = vld [vmem:[%s8589_s10 + $0x18] sm:$0xff]   ;;  %v6881_v16 = vld [vmem:[%s8588_s9] sm:$0xff]  }
 0x484   : > { %v3991_v51 = vpack.c.bf16 %v3977_v0, %v3976_v23  ;;  %6287 = vmatprep.subr.bf16.mxu1 %v6880_v62 }
 0x485   : > { %v3990_v4 = vpack.c.bf16 %v3975_v1, %v3974_v5 }
 0x487   : > { %6265 = vmatprep.mubr.msk.bf16.mxu0 %vm2460_vm2, %v3990_v4  ;;  %6288 = vmatpush3.bf16.msra.mxu1 %v6880_v62  ;;  %v4512_v62 = vld [vmem:[%s8590_s11] sm:$0xf] }
 0x488   : > { %6266 = vmatmul.mubr.msk.bf16.vlgmr.msra.gmra.mrb[160].mxu0 %vm2460_vm2, %v3991_v51  ;;  %6305 = vmatprep.subr.bf16.mxu1 %v6881_v16 }
 0x48d   : > { %v6247_v56 = vpop.f32.mrb[148].mxu0 }
 0x48e   : > { %v3936_v39 = vadd.f32 %v6247_v56, %v3839_v17  ;;  %v3927_v6 = vpop.f32.mrb[149].mxu0  ;;  %v6897_v56 = vld [vmem:[%s8591_s12] sm:$0xff]  }
 0x48f   : > { %v3928_v59 = vadd.f32 %v3927_v6, %v3831_v41  ;;  %v6248_v9 = vpop.f32.mrb[150].mxu0  ;;  %v6898_v41 = vld [vmem:[%s8591_s12 + $0x8] sm:$0xff]   ;;  %6355 = vmatprep.subr.bf16.mxu0 %v6897_v56  ;;  %v6899_v6 = vld [vmem:[%s8591_s12 + $0x10] sm:$0xff]  }
 0x490   : > { %v3939_v15 = vadd.f32 %v6248_v9, %v3842_v52  ;;  %v3930_v19 = vpop.f32.mrb[151].mxu0  ;;  %v3980_v18 = vmax.f32 %v3936_v39, 0.0  ;;  %v8320_v39 = vld [vmem:[%s8594_s15 + $0xb] ss:$0 sm:$0xff]  ;;  %6356 = vmatpush3.bf16.msra.mxu0 %v6897_v56 }
 0x491   : > { %v3931_v20 = vadd.f32 %v3930_v19, %v3834_v10  ;;  %v3978_v60 = vmax.f32 %v3928_v59, 0.0  ;;  %6357 = vmatprep.subr.bf16.mxu0 %v6898_v41 }
 0x492   : > { %v3981_v30 = vmax.f32 %v3939_v15, 0.0 }
 0x493   : > { %v3979_v24 = vmax.f32 %v3931_v20, 0.0 }
 0x494   : > { %v3993_v45 = vpack.c.bf16 %v3981_v30, %v3980_v18  ;;  %6358 = vmatpush3.bf16.msra.mxu0 %v6898_v41  ;;  %v6900_v18 = vld [vmem:[%s8591_s12 + $0x18] sm:$0xff]  }
 0x495   : > { %v3992_v31 = vpack.c.bf16 %v3979_v24, %v3978_v60  ;;  %6359 = vmatprep.subr.bf16.mxu0 %v6899_v6 }
 0x497   : > { %6269 = vmatprep.mubr.msk.bf16.mxu0 %vm2460_vm2, %v3992_v31 }
 0x498   : > { %6270 = vmatmul.mubr.msk.bf16.gmra.mrb[164].mxu0 %vm2460_vm2, %v3993_v45 }
 0x499   : > { %6360 = vmatpush3.bf16.msra.mxu0 %v6899_v6 }
 0x49a   : > { %6361 = vmatprep.subr.bf16.mxu0 %v6900_v18 }
 0x49d   : > { %v6251_v27 = vpop.f32.mrb[152].mxu0  ;;  %6362 = vmatpush3.bf16.msra.mxu0 %v6900_v18 }
 0x49e   : > { %v3952_v58 = vadd.f32 %v6251_v27, %v3855_v63  ;;  %v3943_v48 = vpop.f32.mrb[153].mxu0  ;;  %v6901_v27 = vld [vmem:[%s8591_s12 + $0x20] sm:$0xff]  }
 0x49f   : > { %v3944_v25 = vadd.f32 %v3943_v48, %v3847_v44  ;;  %v6252_v26 = vpop.f32.mrb[154].mxu0  ;;  %6363 = vmatprep.subr.bf16.mxu0 %v6901_v27  ;;  %v6902_v48 = vld [vmem:[%s8591_s12 + $0x28] sm:$0xff]  }
 0x4a0   : > { %v3955_v40 = vadd.f32 %v6252_v26, %v3858_v36  ;;  %v3946_v57 = vpop.f32.mrb[155].mxu0  ;;  %v3984_v33 = vmax.f32 %v3952_v58, 0.0  ;;  %v6882_v58 = vld [vmem:[%s8588_s9 + $0x8] sm:$0xff]   ;;  %v6883_v36 = vld [vmem:[%s8588_s9 + $0x10] sm:$0xff]  }
 0x4a1   : > { %v3947_v34 = vadd.f32 %v3946_v57, %v3850_v2  ;;  %v3982_v21 = vmax.f32 %v3944_v25, 0.0  ;;  %6364 = vmatpush3.bf16.msra.mxu0 %v6901_v27  ;;  %v6905_v27 = vld [vmem:[%s8592_s13] sm:$0xff]  }
 0x4a2   : > { %v3985_v35 = vmax.f32 %v3955_v40, 0.0  ;;  %6365 = vmatprep.subr.bf16.mxu0 %v6902_v48  ;;  %v6884_v40 = vld [vmem:[%s8588_s9 + $0x18] sm:$0xff]  }
 0x4a3   : > { %v3983_v43 = vmax.f32 %v3947_v34, 0.0 }
 0x4a4   : > { %v3995_v11 = vpack.c.bf16 %v3985_v35, %v3984_v33 }
 0x4a5   : > { %v3994_v46 = vpack.c.bf16 %v3983_v43, %v3982_v21  ;;  %6366 = vmatpush3.bf16.msra.mxu0 %v6902_v48 }
 0x4a7   : > { %6273 = vmatprep.mubr.msk.bf16.mxu0 %vm2460_vm2, %v3994_v46  ;;  %v6885_v46 = vld [vmem:[%s8588_s9 + $0x20] sm:$0xff]  }
 0x4a8   : > { %6274 = vmatmul.mubr.msk.bf16.gmra.mrb[168].mxu0 %vm2460_vm2, %v3995_v11 }
 0x4ad   : > { %v6255_v61 = vpop.f32.mrb[156].mxu0 }
 0x4ae   : > { %v3968_v50 = vadd.f32 %v6255_v61, %v3871_v14  ;;  %v3959_v53 = vpop.f32.mrb[157].mxu0 }
 0x4af   : > { %v3960_v54 = vadd.f32 %v3959_v53, %v3863_v32  ;;  %v6256_v55 = vpop.f32.mrb[158].mxu0  ;;  %v6886_v53 = vld [vmem:[%s8588_s9 + $0x28] sm:$0xff]  }
 0x4b0   : > { %v3971_v23 = vadd.f32 %v6256_v55, %v3874_v22  ;;  %v3962_v0 = vpop.f32.mrb[159].mxu0  ;;  %v3988_v1 = vmax.f32 %v3968_v50, 0.0  ;;  %v6887_v22 = vld [vmem:[%s8588_s9 + $0x30] sm:$0xff]  }
 0x4b1   : > { %v3963_v5 = vadd.f32 %v3962_v0, %v3866_v47  ;;  %v3986_v51 = vmax.f32 %v3960_v54, 0.0 }
 0x4b2   : > { %v3989_v37 = vmax.f32 %v3971_v23, 0.0  ;;  %v6888_v23 = vld [vmem:[%s8588_s9 + $0x38] sm:$0xff]  }
 0x4b3   : > { %v3987_v4 = vmax.f32 %v3963_v5, 0.0 }
 0x4b4   : > { %v3997_v17 = vpack.c.bf16 %v3989_v37, %v3988_v1 }
 0x4b5   : > { %v3996_v29 = vpack.c.bf16 %v3987_v4, %v3986_v51 }
 0x4b7   : > { %6277 = vmatprep.mubr.msk.bf16.mxu0 %vm2460_vm2, %v3996_v29 }
 0x4b8   : > { %6278 = vmatmul.mubr.msk.bf16.gmra.mrb[172].mxu0 %vm2460_vm2, %v3997_v17 }
 0x55b   : > { %v6267_v52 = vpop.f32.mrb[160].mxu0 }
 0x55c   : > { %v4104_v59 = vadd.f32 %v6267_v52, %v8320_v39  ;;  %v4095_v9 = vpop.f32.mrb[161].mxu0 }
 0x55d   : > { %v4096_v10 = vadd.f32 %v8320_v39, %v4095_v9  ;;  %v6268_v15 = vpop.f32.mrb[162].mxu0 }
 0x55e   : > { %v4107_v19 = vadd.f32 %v6268_v15, %v8320_v39  ;;  %v4098_v20 = vpop.f32.mrb[163].mxu0  ;;  %v4160_v60 = vmax.f32 %v4104_v59, 0.0 }
 0x55f   : > { %v4099_v30 = vadd.f32 %v8320_v39, %v4098_v20  ;;  %v4158_v45 = vmax.f32 %v4096_v10, 0.0 }
 0x560   : > { %v4161_v24 = vmax.f32 %v4107_v19, 0.0 }
 0x561   : > { %v4159_v31 = vmax.f32 %v4099_v30, 0.0 }
 0x562   : > { %v4175_v63 = vpack.c.bf16 %v4161_v24, %v4160_v60 }
 0x563   : > { %v4174_v44 = vpack.c.bf16 %v4159_v31, %v4158_v45  ;;  %v4580_v31 = vsel %vm4578_vm6, %v4512_v62, 0 }
 0x565   : > { %6289 = vmatprep.mubr.msk.bf16.mxu1 %vm2460_vm2, %v4174_v44  ;;  %v8420_v44 = vld [vmem:[%s8594_s15 + $0xc] ss:$0 sm:$0xff] }
 0x566   : > { %6290 = vmatmul.mubr.msk.bf16.vlgmr.msra.gmra.mrb[160].mxu1 %vm2460_vm2, %v4175_v63  ;;  %v6904_v63 = vld [vmem:[%s8591_s12 + $0x38] sm:$0xff]  }
 0x567   : > { %6306 = vmatpush3.bf16.msra.mxu1 %v6881_v16 }
 0x568   : > { %6307 = vmatprep.subr.bf16.mxu1 %v6882_v58 }
 0x56b   : > { %v6271_v25 = vpop.f32.mrb[164].mxu0  ;;  %6308 = vmatpush3.bf16.msra.mxu1 %v6882_v58 }
 0x56c   : > { %v4120_v26 = vadd.f32 %v6271_v25, %v8320_v39  ;;  %v4111_v2 = vpop.f32.mrb[165].mxu0  ;;  %6309 = vmatprep.subr.bf16.mxu1 %v6883_v36 }
 0x56d   : > { %v4112_v57 = vadd.f32 %v8320_v39, %v4111_v2  ;;  %v6272_v34 = vpop.f32.mrb[166].mxu0 }
 0x56e   : > { %v4123_v33 = vadd.f32 %v6272_v34, %v8320_v39  ;;  %v4114_v35 = vpop.f32.mrb[167].mxu0  ;;  %v4164_v43 = vmax.f32 %v4120_v26, 0.0 }
 0x56f   : > { %v4115_v21 = vadd.f32 %v8320_v39, %v4114_v35  ;;  %6310 = vmatpush3.bf16.msra.mxu1 %v6883_v36  ;;  %v4162_v14 = vmax.f32 %v4112_v57, 0.0 }
 0x570   : > { %v4165_v11 = vmax.f32 %v4123_v33, 0.0  ;;  %6311 = vmatprep.subr.bf16.mxu1 %v6884_v40 }
 0x571   : > { %v4163_v61 = vmax.f32 %v4115_v21, 0.0 }
 0x572   : > { %v4177_v32 = vpack.c.bf16 %v4165_v11, %v4164_v43 }
 0x573   : > { %v4176_v50 = vpack.c.bf16 %v4163_v61, %v4162_v14  ;;  %6312 = vmatpush3.bf16.msra.mxu1 %v6884_v40 }
 0x574   : > { %6313 = vmatprep.subr.bf16.mxu1 %v6885_v46 }
 0x575   : > { %6293 = vmatprep.mubr.msk.bf16.mxu1 %vm2460_vm2, %v4176_v50 }
 0x576   : > { %6294 = vmatmul.mubr.msk.bf16.gmra.mrb[164].mxu1 %vm2460_vm2, %v4177_v32  ;;  %v6906_v32 = vld [vmem:[%s8592_s13 + $0x8] sm:$0xff]  }
 0x577   : > { %6314 = vmatpush3.bf16.msra.mxu1 %v6885_v46 }
 0x578   : > { %6315 = vmatprep.subr.bf16.mxu1 %v6886_v53 }
 0x57b   : > { %v6275_v54 = vpop.f32.mrb[168].mxu0  ;;  %6316 = vmatpush3.bf16.msra.mxu1 %v6886_v53 }
 0x57c   : > { %v4136_v55 = vadd.f32 %v6275_v54, %v8320_v39  ;;  %v4127_v47 = vpop.f32.mrb[169].mxu0  ;;  %6317 = vmatprep.subr.bf16.mxu1 %v6887_v22 }
 0x57d   : > { %v4128_v0 = vadd.f32 %v8320_v39, %v4127_v47  ;;  %v6276_v5 = vpop.f32.mrb[170].mxu0 }
 0x57e   : > { %v4139_v1 = vadd.f32 %v6276_v5, %v8320_v39  ;;  %v4130_v37 = vpop.f32.mrb[171].mxu0  ;;  %v4168_v4 = vmax.f32 %v4136_v55, 0.0 }
 0x57f   : > { %v4131_v51 = vadd.f32 %v8320_v39, %v4130_v37  ;;  %6318 = vmatpush3.bf16.msra.mxu1 %v6887_v22  ;;  %v4166_v29 = vmax.f32 %v4128_v0, 0.0  ;;  %v6907_v0 = vld [vmem:[%s8592_s13 + $0x10] sm:$0xff]  }
 0x580   : > { %v4169_v17 = vmax.f32 %v4139_v1, 0.0  ;;  %6319 = vmatprep.subr.bf16.mxu1 %v6888_v23 }
 0x581   : > { %v4167_v3 = vmax.f32 %v4131_v51, 0.0 }
 0x582   : > { %v4179_v16 = vpack.c.bf16 %v4169_v17, %v4168_v4 }
 0x583   : > { %v4178_v56 = vpack.c.bf16 %v4167_v3, %v4166_v29  ;;  %6320 = vmatpush3.bf16.msra.mxu1 %v6888_v23 }
 0x584   : > { %6572 = vmatprep.subr.msk.bf16.mxu1 %vm4578_vm6, %v4512_v62 }
 0x585   : > { %6297 = vmatprep.mubr.msk.bf16.mxu1 %vm2460_vm2, %v4178_v56 }
 0x586   : > { %6298 = vmatmul.mubr.msk.bf16.gmra.mrb[168].mxu1 %vm2460_vm2, %v4179_v16 }
 0x58b   : > { %v6279_v41 = vpop.f32.mrb[172].mxu0 }
 0x58c   : > { %v4152_v6 = vadd.f32 %v6279_v41, %v8320_v39  ;;  %v4143_v52 = vpop.f32.mrb[173].mxu0 }
 0x58d   : > { %v4144_v59 = vadd.f32 %v8320_v39, %v4143_v52  ;;  %v6280_v9 = vpop.f32.mrb[174].mxu0 }
 0x58e   : > { %v4155_v10 = vadd.f32 %v6280_v9, %v8320_v39  ;;  %v4146_v15 = vpop.f32.mrb[175].mxu0  ;;  %v4172_v20 = vmax.f32 %v4152_v6, 0.0 }
 0x58f   : > { %v4147_v19 = vadd.f32 %v8320_v39, %v4146_v15  ;;  %v4170_v30 = vmax.f32 %v4144_v59, 0.0  ;;  %v6903_v39 = vld [vmem:[%s8591_s12 + $0x30] sm:$0xff]  }
 0x590   : > { %v4173_v18 = vmax.f32 %v4155_v10, 0.0  ;;  %6367 = vmatprep.subr.bf16.mxu0 %v6903_v39 }
 0x591   : > { %v4171_v60 = vmax.f32 %v4147_v19, 0.0  ;;  %6368 = vmatpush3.bf16.msra.mxu0 %v6903_v39 }
 0x592   : > { %v4181_v24 = vpack.c.bf16 %v4173_v18, %v4172_v20  ;;  %6369 = vmatprep.subr.bf16.mxu0 %v6904_v63 }
 0x593   : > { %v4180_v45 = vpack.c.bf16 %v4171_v60, %v4170_v30 }
 0x595   : > { %6301 = vmatprep.mubr.msk.bf16.mxu1 %vm2460_vm2, %v4180_v45  ;;  %6370 = vmatpush3.bf16.msra.mxu0 %v6904_v63 }
 0x596   : > { %6302 = vmatmul.mubr.msk.bf16.gmra.mrb[172].mxu1 %vm2460_vm2, %v4181_v24  ;;  %6387 = vmatprep.subr.bf16.mxu0 %v6905_v27 }
 0x597   : > { %6321 = vmatprep.mubr.bf16.mxu1 %v8173_v42  ;;  %v6889_v42 = vld [vmem:[%s8309_s20] sm:$0xff]  }
 0x59e   : > { %6322 = vmatmul.mubr.bf16.vlgmr.msra.gmra.mrb[160].mxu1 %v8171_v28  ;;  %v6890_v28 = vld [vmem:[%s8309_s20 + $0x8] sm:$0xff]  }
 0x59f   : > { %6325 = vmatprep.mubr.bf16.mxu1 %v8180_v49  ;;  %6338 = vmatpush3.bf16.msra.mxu1 %v4580_v31  ;;  %v6891_v49 = vld [vmem:[%s8309_s20 + $0x10] sm:$0xff]  }
 0x5a6   : > { %6326 = vmatmul.mubr.bf16.gmra.mrb[164].mxu1 %v8178_v38  ;;  %v6892_v38 = vld [vmem:[%s8309_s20 + $0x18] sm:$0xff]  }
 0x5a7   : > { %6329 = vmatprep.mubr.bf16.mxu1 %v8184_v8  ;;  %v6893_v8 = vld [vmem:[%s8309_s20 + $0x20] sm:$0xff]  }
 0x5ae   : > { %6330 = vmatmul.mubr.bf16.gmra.mrb[168].mxu1 %v8182_v7  ;;  %v6894_v7 = vld [vmem:[%s8309_s20 + $0x28] sm:$0xff]  }
 0x5af   : > { %6333 = vmatprep.mubr.bf16.mxu1 %v8193_v13  ;;  %v6895_v13 = vld [vmem:[%s8309_s20 + $0x30] sm:$0xff]  }
 0x5b6   : > { %6334 = vmatmul.mubr.bf16.gmra.mrb[172].mxu1 %v8191_v12  ;;  %v6896_v12 = vld [vmem:[%s8309_s20 + $0x38] sm:$0xff]  }
 0x5b7   : > { %6339 = vmatprep.mubr.msk.bf16.mxu1 %vm4553_vm7, %v6889_v42 }
 0x5be   : > { %6340 = vmatmul.mubr.msk.bf16.vlgmr.msra.gmra.mrb[160].mxu1 %vm4553_vm7, %v6890_v28 }
 0x5bf   : > { %6343 = vmatprep.mubr.msk.bf16.mxu1 %vm4553_vm7, %v6891_v49 }
 0x5c6   : > { %6344 = vmatmul.mubr.msk.bf16.gmra.mrb[164].mxu1 %vm4553_vm7, %v6892_v38 }
 0x5c7   : > { %6347 = vmatprep.mubr.msk.bf16.mxu1 %vm4553_vm7, %v6893_v8 }
 0x5ce   : > { %6348 = vmatmul.mubr.msk.bf16.gmra.mrb[168].mxu1 %vm4553_vm7, %v6894_v7 }
 0x5cf   : > { %6351 = vmatprep.mubr.msk.bf16.mxu1 %vm4553_vm7, %v6895_v13  ;;  %v6908_v13 = vld [vmem:[%s8592_s13 + $0x18] sm:$0xff]  }
 0x5d6   : > { %6352 = vmatmul.mubr.msk.bf16.gmra.mrb[172].mxu1 %vm4553_vm7, %v6896_v12  ;;  %v5750_v12 = vld [vmem:[%s8594_s15 + $0xd] ss:$0 sm:$0xff] }
 0x691   : > { %v6341_v58 = vpop.f32.mrb[160].mxu1 }
 0x692   : > { %v4704_v48 = vadd.f32 %v6341_v58, %v8420_v44  ;;  %v4616_v36 = vpop.f32.mrb[161].mxu1 }
 0x693   : > { %v4702_v25 = vadd.f32 %v8420_v44, %v4616_v36  ;;  %v6342_v26 = vpop.f32.mrb[162].mxu1 }
 0x694   : > { %v4705_v2 = vadd.f32 %v6342_v26, %v8420_v44  ;;  %v4619_v40 = vpop.f32.mrb[163].mxu1  ;;  %v4720_v34 = vmax.f32 %v4704_v48, 0.0 }
 0x695   : > { %v4703_v57 = vadd.f32 %v8420_v44, %v4619_v40  ;;  %v4718_v35 = vmax.f32 %v4702_v25, 0.0 }
 0x696   : > { %v4721_v33 = vmax.f32 %v4705_v2, 0.0 }
 0x697   : > { %v4719_v21 = vmax.f32 %v4703_v57, 0.0 }
 0x698   : > { %v4735_v43 = vpack.c.bf16 %v4721_v33, %v4720_v34 }
 0x699   : > { %v4734_v11 = vpack.c.bf16 %v4719_v21, %v4718_v35  ;;  %v6345_v46 = vpop.f32.mrb[164].mxu1 }
 0x69a   : > { %v4708_v14 = vadd.f32 %v6345_v46, %v8420_v44  ;;  %v4632_v61 = vpop.f32.mrb[165].mxu1 }
 0x69b   : > { %v4706_v50 = vadd.f32 %v8420_v44, %v4632_v61  ;;  %v6346_v53 = vpop.f32.mrb[166].mxu1  ;;  %6371 = vmatprep.mubr.bf16.mxu0 %v4734_v11 }
 0x69c   : > { %v4709_v22 = vadd.f32 %v6346_v53, %v8420_v44  ;;  %v4635_v54 = vpop.f32.mrb[167].mxu1  ;;  %6372 = vmatmul.mubr.bf16.vlgmr.msra.gmra.mrb[176].mxu0 %v4735_v43  ;;  %v4724_v47 = vmax.f32 %v4708_v14, 0.0 }
 0x69d   : > { %v4707_v55 = vadd.f32 %v8420_v44, %v4635_v54  ;;  %6388 = vmatpush3.bf16.msra.mxu0 %v6905_v27  ;;  %v4722_v5 = vmax.f32 %v4706_v50, 0.0 }
 0x69e   : > { %v4725_v23 = vmax.f32 %v4709_v22, 0.0  ;;  %6389 = vmatprep.subr.bf16.mxu0 %v6906_v32 }
 0x69f   : > { %v4723_v1 = vmax.f32 %v4707_v55, 0.0 }
 0x6a0   : > { %v4737_v37 = vpack.c.bf16 %v4725_v23, %v4724_v47 }
 0x6a1   : > { %v4736_v51 = vpack.c.bf16 %v4723_v1, %v4722_v5  ;;  %v6349_v4 = vpop.f32.mrb[168].mxu1  ;;  %6390 = vmatpush3.bf16.msra.mxu0 %v6906_v32 }
 0x6a2   : > { %v4712_v17 = vadd.f32 %v6349_v4, %v8420_v44  ;;  %v4648_v29 = vpop.f32.mrb[169].mxu1  ;;  %6391 = vmatprep.subr.bf16.mxu0 %v6907_v0 }
 0x6a3   : > { %v4710_v3 = vadd.f32 %v8420_v44, %v4648_v29  ;;  %v6350_v62 = vpop.f32.mrb[170].mxu1  ;;  %6375 = vmatprep.mubr.bf16.mxu0 %v4736_v51 }
 0x6a4   : > { %v4713_v16 = vadd.f32 %v6350_v62, %v8420_v44  ;;  %v4651_v56 = vpop.f32.mrb[171].mxu1  ;;  %6376 = vmatmul.mubr.bf16.gmra.mrb[180].mxu0 %v4737_v37  ;;  %v4728_v6 = vmax.f32 %v4712_v17, 0.0 }
 0x6a5   : > { %v4711_v41 = vadd.f32 %v8420_v44, %v4651_v56  ;;  %6392 = vmatpush3.bf16.msra.mxu0 %v6907_v0  ;;  %v4726_v59 = vmax.f32 %v4710_v3, 0.0 }
 0x6a6   : > { %v4729_v52 = vmax.f32 %v4713_v16, 0.0  ;;  %6393 = vmatprep.subr.bf16.mxu0 %v6908_v13 }
 0x6a7   : > { %v4727_v9 = vmax.f32 %v4711_v41, 0.0 }
 0x6a8   : > { %v4739_v10 = vpack.c.bf16 %v4729_v52, %v4728_v6 }
 0x6a9   : > { %v4738_v15 = vpack.c.bf16 %v4727_v9, %v4726_v59  ;;  %v6353_v19 = vpop.f32.mrb[172].mxu1  ;;  %6394 = vmatpush3.bf16.msra.mxu0 %v6908_v13  ;;  %v8468_v13 = vld [vmem:[%s8593_s14] ss:$0 sm:$0xff] }
 0x6aa   : > { %v4716_v20 = vadd.f32 %v6353_v19, %v8420_v44  ;;  %v4664_v18 = vpop.f32.mrb[173].mxu1 }
 0x6ab   : > { %v4714_v30 = vadd.f32 %v8420_v44, %v4664_v18  ;;  %v6354_v60 = vpop.f32.mrb[174].mxu1  ;;  %6379 = vmatprep.mubr.bf16.mxu0 %v4738_v15 }
 0x6ac   : > { %v4717_v24 = vadd.f32 %v6354_v60, %v8420_v44  ;;  %v4667_v45 = vpop.f32.mrb[175].mxu1  ;;  %6380 = vmatmul.mubr.bf16.gmra.mrb[184].mxu0 %v4739_v10  ;;  %v4732_v42 = vmax.f32 %v4716_v20, 0.0 }
 0x6ad   : > { %v4715_v31 = vadd.f32 %v8420_v44, %v4667_v45  ;;  %v4730_v49 = vmax.f32 %v4714_v30, 0.0 }
 0x6ae   : > { %v4733_v28 = vmax.f32 %v4717_v24, 0.0 }
 0x6af   : > { %v4731_v38 = vmax.f32 %v4715_v31, 0.0 }
 0x6b0   : > { %v4741_v8 = vpack.c.bf16 %v4733_v28, %v4732_v42  ;;  %v8461_v42 = vld [vmem:[%s8594_s15 + $0xe] ss:$0 sm:$0xff] }
 0x6b1   : > { %v4740_v7 = vpack.c.bf16 %v4731_v38, %v4730_v49 }
 0x6b3   : > { %6383 = vmatprep.mubr.bf16.mxu0 %v4740_v7 }
 0x6b4   : > { %6384 = vmatmul.mubr.bf16.gmra.mrb[188].mxu0 %v4741_v8 }
 0x76f   : > { %v6373_v39 = vpop.f32.mrb[176].mxu0 }
 0x770   : > { %v4856_v63 = vadd.f32 %v6373_v39, %v5750_v12  ;;  %v4847_v27 = vpop.f32.mrb[177].mxu0 }
 0x771   : > { %v4848_v44 = vadd.f32 %v5750_v12, %v4847_v27  ;;  %v6374_v58 = vpop.f32.mrb[178].mxu0 }
 0x772   : > { %v4859_v48 = vadd.f32 %v6374_v58, %v5750_v12  ;;  %v4850_v36 = vpop.f32.mrb[179].mxu0  ;;  %v4912_v26 = vmax.f32 %v4856_v63, 0.0 }
 0x773   : > { %v4851_v25 = vadd.f32 %v5750_v12, %v4850_v36  ;;  %v4910_v40 = vmax.f32 %v4848_v44, 0.0 }
 0x774   : > { %v4913_v2 = vmax.f32 %v4859_v48, 0.0 }
 0x775   : > { %v4911_v57 = vmax.f32 %v4851_v25, 0.0 }
 0x776   : > { %v4927_v34 = vpack.c.bf16 %v4913_v2, %v4912_v26 }
 0x777   : > { %v4926_v33 = vpack.c.bf16 %v4911_v57, %v4910_v40  ;;  %v6377_v35 = vpop.f32.mrb[180].mxu0 }
 0x778   : > { %v4872_v21 = vadd.f32 %v6377_v35, %v5750_v12  ;;  %v4863_v43 = vpop.f32.mrb[181].mxu0 }
 0x779   : > { %v4864_v11 = vadd.f32 %v5750_v12, %v4863_v43  ;;  %v6378_v46 = vpop.f32.mrb[182].mxu0  ;;  %6395 = vmatprep.mubr.msk.bf16.mxu0 %vm2460_vm2, %v4926_v33 }
 0x77a   : > { %v4875_v14 = vadd.f32 %v6378_v46, %v5750_v12  ;;  %v4866_v61 = vpop.f32.mrb[183].mxu0  ;;  %6396 = vmatmul.mubr.msk.bf16.vlgmr.msra.gmra.mrb[192].mxu0 %vm2460_vm2, %v4927_v34  ;;  %v4916_v50 = vmax.f32 %v4872_v21, 0.0 }
 0x77b   : > { %v4867_v32 = vadd.f32 %v5750_v12, %v4866_v61  ;;  %v4914_v22 = vmax.f32 %v4864_v11, 0.0 }
 0x77c   : > { %v4917_v53 = vmax.f32 %v4875_v14, 0.0 }
 0x77d   : > { %v4915_v54 = vmax.f32 %v4867_v32, 0.0 }
 0x77e   : > { %v4929_v55 = vpack.c.bf16 %v4917_v53, %v4916_v50 }
 0x77f   : > { %v4928_v47 = vpack.c.bf16 %v4915_v54, %v4914_v22  ;;  %v6381_v23 = vpop.f32.mrb[184].mxu0 }
 0x780   : > { %v4888_v0 = vadd.f32 %v6381_v23, %v5750_v12  ;;  %v4879_v5 = vpop.f32.mrb[185].mxu0 }
 0x781   : > { %v4880_v1 = vadd.f32 %v5750_v12, %v4879_v5  ;;  %v6382_v37 = vpop.f32.mrb[186].mxu0  ;;  %6399 = vmatprep.mubr.msk.bf16.mxu0 %vm2460_vm2, %v4928_v47 }
 0x782   : > { %v4891_v51 = vadd.f32 %v6382_v37, %v5750_v12  ;;  %v4882_v4 = vpop.f32.mrb[187].mxu0  ;;  %6400 = vmatmul.mubr.msk.bf16.gmra.mrb[196].mxu0 %vm2460_vm2, %v4929_v55  ;;  %v4920_v29 = vmax.f32 %v4888_v0, 0.0 }
 0x783   : > { %v4883_v17 = vadd.f32 %v5750_v12, %v4882_v4  ;;  %v4918_v62 = vmax.f32 %v4880_v1, 0.0 }
 0x784   : > { %v4921_v3 = vmax.f32 %v4891_v51, 0.0 }
 0x785   : > { %v4919_v16 = vmax.f32 %v4883_v17, 0.0 }
 0x786   : > { %v4931_v56 = vpack.c.bf16 %v4921_v3, %v4920_v29 }
 0x787   : > { %v4930_v41 = vpack.c.bf16 %v4919_v16, %v4918_v62  ;;  %v6385_v6 = vpop.f32.mrb[188].mxu0 }
 0x788   : > { %v4904_v52 = vadd.f32 %v6385_v6, %v5750_v12  ;;  %v4895_v59 = vpop.f32.mrb[189].mxu0 }
 0x789   : > { %v4896_v9 = vadd.f32 %v5750_v12, %v4895_v59  ;;  %v6386_v10 = vpop.f32.mrb[190].mxu0  ;;  %6403 = vmatprep.mubr.msk.bf16.mxu0 %vm2460_vm2, %v4930_v41 }
 0x78a   : > { %v4907_v15 = vadd.f32 %v6386_v10, %v5750_v12  ;;  %v4898_v19 = vpop.f32.mrb[191].mxu0  ;;  %6404 = vmatmul.mubr.msk.bf16.gmra.mrb[200].mxu0 %vm2460_vm2, %v4931_v56  ;;  %v4924_v18 = vmax.f32 %v4904_v52, 0.0 }
 0x78b   : > { %v4899_v20 = vadd.f32 %v5750_v12, %v4898_v19  ;;  %v4922_v60 = vmax.f32 %v4896_v9, 0.0 }
 0x78c   : > { %v4925_v30 = vmax.f32 %v4907_v15, 0.0 }
 0x78d   : > { %v4923_v24 = vmax.f32 %v4899_v20, 0.0 }
 0x78e   : > { %v4933_v45 = vpack.c.bf16 %v4925_v30, %v4924_v18 }
 0x78f   : > { %v4932_v31 = vpack.c.bf16 %v4923_v24, %v4922_v60 }
 0x791   : > { %6407 = vmatprep.mubr.msk.bf16.mxu0 %vm2460_vm2, %v4932_v31 }
 0x792   : > { %6408 = vmatmul.mubr.msk.bf16.gmra.mrb[204].mxu0 %vm2460_vm2, %v4933_v45 }
 0x84d   : > { %v6397_v28 = vpop.f32.mrb[192].mxu0 }
 0x84e   : > { %v5040_v49 = vadd.f32 %v6397_v28, %v8461_v42  ;;  %v5031_v38 = vpop.f32.mrb[193].mxu0 }
 0x84f   : > { %v5032_v8 = vadd.f32 %v8461_v42, %v5031_v38  ;;  %v6398_v7 = vpop.f32.mrb[194].mxu0 }
 0x850   : > { %v5096_v12 = vmax.f32 %v5040_v49, 0.0  ;;  %v5043_v39 = vadd.f32 %v6398_v7, %v8461_v42  ;;  %v5034_v63 = vpop.f32.mrb[195].mxu0 }
 0x851   : > { %v5094_v27 = vmax.f32 %v5032_v8, 0.0  ;;  %v5035_v44 = vadd.f32 %v8461_v42, %v5034_v63 }
 0x852   : > { %v5097_v58 = vmax.f32 %v5043_v39, 0.0  ;;  %v5119_v48 = vmul.f32 %v8468_v13, %v5096_v12 }
 0x853   : > { %v5095_v36 = vmax.f32 %v5035_v44, 0.0  ;;  %v5117_v25 = vmul.f32 %v8468_v13, %v5094_v27 }
 0x854   : > { %v5139_v26 = vsel %vm3755_vm5, %v5119_v48, 0.0  ;;  %v5120_v2 = vmul.f32 %v8468_v13, %v5097_v58 }
 0x855   : > { %5140 = vadd.xlane.f32.xlu1 %v5139_v26  ;;  %v6401_v40 = vpop.f32.mrb[196].mxu0  ;;  %v5133_v57 = vsel %vm3755_vm5, %v5117_v25, 0.0  ;;  %v5118_v34 = vmul.f32 %v8468_v13, %v5095_v36 }
 0x856   : > { %v5056_v33 = vadd.f32 %v6401_v40, %v8461_v42  ;;  %v5047_v35 = vpop.f32.mrb[197].mxu0  ;;  %5134 = vadd.xlane.f32.xlu0 %v5133_v57  ;;  %v5142_v61 = vsel %vm3755_vm5, %v5120_v2, 0.0  ;;  %v8519_v57 = vld [vmem:[%s8594_s15 + $0xf] ss:$0 sm:$0xff] }
 0x857   : > { %v5048_v21 = vadd.f32 %v8461_v42, %v5047_v35  ;;  %v6402_v43 = vpop.f32.mrb[198].mxu0  ;;  %v5136_v53 = vsel %vm3755_vm5, %v5118_v34, 0.0 }
 0x858   : > { %v5100_v11 = vmax.f32 %v5056_v33, 0.0  ;;  %v5059_v46 = vadd.f32 %v6402_v43, %v8461_v42  ;;  %v5050_v14 = vpop.f32.mrb[199].mxu0 }
 0x859   : > { %v5098_v32 = vmax.f32 %v5048_v21, 0.0  ;;  %v5051_v50 = vadd.f32 %v8461_v42, %v5050_v14  ;;  %5143 = vadd.xlane.f32.xlu1 %v5142_v61 }
 0x85a   : > { %v5101_v22 = vmax.f32 %v5059_v46, 0.0  ;;  %5137 = vadd.xlane.f32.xlu0 %v5136_v53  ;;  %v5123_v54 = vmul.f32 %v8468_v13, %v5100_v11 }
 0x85b   : > { %v5099_v55 = vmax.f32 %v5051_v50, 0.0  ;;  %v5121_v5 = vmul.f32 %v8468_v13, %v5098_v32 }
 0x85c   : > { %v5151_v47 = vsel %vm3755_vm5, %v5123_v54, 0.0  ;;  %v5124_v23 = vmul.f32 %v8468_v13, %v5101_v22 }
 0x85d   : > { %v6405_v0 = vpop.f32.mrb[200].mxu0  ;;  %v5122_v4 = vmul.f32 %v8468_v13, %v5099_v55  ;;  %v5145_v6 = vsel %vm3755_vm5, %v5121_v5, 0.0 }
 0x85e   : > { %v5072_v1 = vadd.f32 %v6405_v0, %v8461_v42  ;;  %v5063_v37 = vpop.f32.mrb[201].mxu0  ;;  %5152 = vadd.xlane.f32.xlu0 %v5151_v47  ;;  %v5154_v51 = vsel %vm3755_vm5, %v5124_v23, 0.0 }
 0x85f   : > { %v5064_v17 = vadd.f32 %v8461_v42, %v5063_v37  ;;  %5155 = vadd.xlane.f32.xlu1 %v5154_v51  ;;  %v6406_v29 = vpop.f32.mrb[202].mxu0  ;;  %v5148_v59 = vsel %vm3755_vm5, %v5122_v4, 0.0 }
 0x860   : > { %v5104_v3 = vmax.f32 %v5072_v1, 0.0  ;;  %v5075_v62 = vadd.f32 %v6406_v29, %v8461_v42  ;;  %v5066_v16 = vpop.f32.mrb[203].mxu0 }
 0x861   : > { %v5102_v56 = vmax.f32 %v5064_v17, 0.0  ;;  %v5067_v41 = vadd.f32 %v8461_v42, %v5066_v16 }
 0x862   : > { %v5105_v52 = vmax.f32 %v5075_v62, 0.0  ;;  %5146 = vadd.xlane.f32.xlu0 %v5145_v6  ;;  %v5127_v9 = vmul.f32 %v8468_v13, %v5104_v3 }
 0x863   : > { %v5103_v10 = vmax.f32 %v5067_v41, 0.0  ;;  %5149 = vadd.xlane.f32.xlu1 %v5148_v59  ;;  %v5125_v18 = vmul.f32 %v8468_v13, %v5102_v56 }
 0x864   : > { %v5163_v15 = vsel %vm3755_vm5, %v5127_v9, 0.0  ;;  %v5128_v19 = vmul.f32 %v8468_v13, %v5105_v52 }
 0x865   : > { %v6409_v20 = vpop.f32.mrb[204].mxu0  ;;  %v5126_v45 = vmul.f32 %v8468_v13, %v5103_v10  ;;  %v5157_v39 = vsel %vm3755_vm5, %v5125_v18, 0.0 }
 0x866   : > { %v5088_v30 = vadd.f32 %v6409_v20, %v8461_v42  ;;  %5164 = vadd.xlane.f32.xlu0 %v5163_v15  ;;  %v5079_v60 = vpop.f32.mrb[205].mxu0  ;;  %v5166_v24 = vsel %vm3755_vm5, %v5128_v19, 0.0 }
 0x867   : > { %v5080_v31 = vadd.f32 %v8461_v42, %v5079_v60  ;;  %5167 = vadd.xlane.f32.xlu1 %v5166_v24  ;;  %v6410_v28 = vpop.f32.mrb[206].mxu0  ;;  %v5160_v63 = vsel %vm3755_vm5, %v5126_v45, 0.0 }
 0x868   : > { %v5091_v49 = vadd.f32 %v6410_v28, %v8461_v42  ;;  %v5082_v38 = vpop.f32.mrb[207].mxu0  ;;  %v5108_v8 = vmax.f32 %v5088_v30, 0.0 }
 0x869   : > { %v5106_v7 = vmax.f32 %v5080_v31, 0.0  ;;  %v5083_v12 = vadd.f32 %v8461_v42, %v5082_v38 }
 0x86a   : > { %5158 = vadd.xlane.f32.xlu0 %v5157_v39  ;;  %v5109_v27 = vmax.f32 %v5091_v49, 0.0  ;;  %v5131_v25 = vmul.f32 %v8468_v13, %v5108_v8 }
 0x86b   : > { %v5107_v44 = vmax.f32 %v5083_v12, 0.0  ;;  %5161 = vadd.xlane.f32.xlu1 %v5160_v63  ;;  %v5129_v58 = vmul.f32 %v8468_v13, %v5106_v7 }
 0x86c   : > { %v5132_v42 = vmul.f32 %v8468_v13, %v5109_v27  ;;  %v5175_v2 = vsel %vm3755_vm5, %v5131_v25, 0.0 }
 0x86d   : > { %v5169_v48 = vsel %vm3755_vm5, %v5129_v58, 0.0  ;;  %v5130_v36 = vmul.f32 %v8468_v13, %v5107_v44 }
 0x86e   : > { %5170 = vadd.xlane.f32.xlu0 %v5169_v48  ;;  %v5178_v40 = vsel %vm3755_vm5, %v5132_v42, 0.0 }
 0x86f   : > { %v5172_v26 = vsel %vm3755_vm5, %v5130_v36, 0.0 }
 0x870   : > { %5173 = vadd.xlane.f32.xlu1 %v5172_v26 }
 0x872   : > { %5176 = vadd.xlane.f32.xlu0 %v5175_v2 }
 0x874   : > { %5179 = vadd.xlane.f32.xlu1 %v5178_v40 }
 0x8e2   : > { %v5141_v34 = vpop.xlane.xlu1 %5140 }
 0x8e3   : > { %v5190_v33 = vadd.f32 %v8519_v57, %v5141_v34  ;;  %v5135_v35 = vpop.xlane.xlu0 %5134 }
 0x8e4   : > { %v5188_v21 = vadd.f32 %v8519_v57, %v5135_v35 }
 0x8e5   : > { %v5206_v43 = vsub.f32 0.0, %v5190_v33 }
 0x8e6   : > { %v5204_v13 = vsub.f32 0.0, %v5188_v21  ;;  %v5144_v11 = vpop.xlane.xlu1 %5143 }
 0x8e7   : > { %v5224_v46 = vmul.f32 1.442695, %v5206_v43  ;;  %v5191_v14 = vadd.f32 %v8519_v57, %v5144_v11  ;;  %v5138_v61 = vpop.xlane.xlu0 %5137 }
 0x8e8   : > { %v5220_v32 = vmul.f32 1.442695, %v5204_v13  ;;  %v5189_v50 = vadd.f32 %v8519_v57, %v5138_v61 }
 0x8e9   : > { %6909 = vpow2.f32 %v5224_v46  ;;  %v5207_v53 = vsub.f32 0.0, %v5191_v14 }
 0x8ea   : > { %6911 = vpow2.f32 %v5220_v32  ;;  %v5205_v22 = vsub.f32 0.0, %v5189_v50 }
 0x8eb   : > { %v5226_v54 = vmul.f32 1.442695, %v5207_v53  ;;  %v5153_v55 = vpop.xlane.xlu0 %5152 }
 0x8ec   : > { %v5222_v47 = vmul.f32 1.442695, %v5205_v22  ;;  %v5194_v23 = vadd.f32 %v8519_v57, %v5153_v55  ;;  %v5156_v0 = vpop.xlane.xlu1 %5155 }
 0x8ed   : > { %6913 = vpow2.f32 %v5226_v54  ;;  %v5195_v5 = vadd.f32 %v8519_v57, %v5156_v0 }
 0x8ee   : > { %6915 = vpow2.f32 %v5222_v47  ;;  %v5210_v1 = vsub.f32 0.0, %v5194_v23 }
 0x8ef   : > { %v5211_v37 = vsub.f32 0.0, %v5195_v5  ;;  %v5147_v51 = vpop.xlane.xlu0 %5146 }
 0x8f0   : > { %v5232_v4 = vmul.f32 1.442695, %v5210_v1  ;;  %v5192_v17 = vadd.f32 %v8519_v57, %v5147_v51  ;;  %v5150_v29 = vpop.xlane.xlu1 %5149 }
 0x8f1   : > { %v5234_v3 = vmul.f32 1.442695, %v5211_v37  ;;  %v5193_v62 = vadd.f32 %v8519_v57, %v5150_v29 }
 0x8f2   : > { %6917 = vpow2.f32 %v5232_v4  ;;  %v5208_v16 = vsub.f32 0.0, %v5192_v17 }
 0x8f3   : > { %v6910_v56 = vpop.eup %6909  ;;  %6919 = vpow2.f32 %v5234_v3  ;;  %v5209_v41 = vsub.f32 0.0, %v5193_v62  ;;  %v5165_v6 = vpop.xlane.xlu0 %5164 }
 0x8f4   : > { %v6912_v52 = vpop.eup %6911  ;;  %v5254_v59 = vadd.f32 1.0, %v6910_v56  ;;  %v5228_v9 = vmul.f32 1.442695, %v5208_v16  ;;  %v5198_v10 = vadd.f32 %v8519_v57, %v5165_v6  ;;  %v5168_v15 = vpop.xlane.xlu1 %5167 }
 0x8f5   : > { %v5252_v19 = vadd.f32 1.0, %v6912_v52  ;;  %v5230_v20 = vmul.f32 1.442695, %v5209_v41  ;;  %v5199_v18 = vadd.f32 %v8519_v57, %v5168_v15 }
 0x8f6   : > { %6921 = vrcp.f32 %v5254_v59  ;;  %v5214_v30 = vsub.f32 0.0, %v5198_v10 }
 0x8f7   : > { %v6914_v60 = vpop.eup %6913  ;;  %6923 = vrcp.f32 %v5252_v19  ;;  %v5215_v24 = vsub.f32 0.0, %v5199_v18  ;;  %v5159_v45 = vpop.xlane.xlu0 %5158 }
 0x8f8   : > { %v6916_v31 = vpop.eup %6915  ;;  %v5255_v28 = vadd.f32 1.0, %v6914_v60  ;;  %6925 = vpow2.f32 %v5228_v9  ;;  %v5240_v49 = vmul.f32 1.442695, %v5214_v30  ;;  %v5196_v38 = vadd.f32 %v8519_v57, %v5159_v45  ;;  %v5162_v8 = vpop.xlane.xlu1 %5161 }
 0x8f9   : > { %v5253_v7 = vadd.f32 1.0, %v6916_v31  ;;  %6927 = vpow2.f32 %v5230_v20  ;;  %v5242_v12 = vmul.f32 1.442695, %v5215_v24  ;;  %v5197_v39 = vadd.f32 %v8519_v57, %v5162_v8 }
 0x8fa   : > { %6929 = vrcp.f32 %v5255_v28  ;;  %v5212_v63 = vsub.f32 0.0, %v5196_v38 }
 0x8fb   : > { %6931 = vrcp.f32 %v5253_v7  ;;  %v5213_v27 = vsub.f32 0.0, %v5197_v39  ;;  %v5171_v44 = vpop.xlane.xlu0 %5170 }
 0x8fc   : > { %v6918_v58 = vpop.eup %6917  ;;  %6933 = vpow2.f32 %v5240_v49  ;;  %v5236_v48 = vmul.f32 1.442695, %v5212_v63  ;;  %v5200_v36 = vadd.f32 %v8519_v57, %v5171_v44 }
 0x8fd   : > { %v6920_v25 = vpop.eup %6919  ;;  %v5258_v26 = vadd.f32 1.0, %v6918_v58  ;;  %6935 = vpow2.f32 %v5242_v12  ;;  %v5238_v42 = vmul.f32 1.442695, %v5213_v27  ;;  %v5174_v2 = vpop.xlane.xlu1 %5173 }
 0x8fe   : > { %v5259_v40 = vadd.f32 1.0, %v6920_v25  ;;  %6937 = vpow2.f32 %v5236_v48  ;;  %v5216_v34 = vsub.f32 0.0, %v5200_v36  ;;  %v5201_v33 = vadd.f32 %v8519_v57, %v5174_v2 }
 0x8ff   : > { %6939 = vrcp.f32 %v5258_v26  ;;  %v5177_v35 = vpop.xlane.xlu0 %5176 }
 0x900   : > { %v6922_v21 = vpop.eup %6921  ;;  %6941 = vrcp.f32 %v5259_v40  ;;  %v5244_v43 = vmul.f32 1.442695, %v5216_v34  ;;  %v5217_v13 = vsub.f32 0.0, %v5201_v33  ;;  %v5202_v11 = vadd.f32 %v8519_v57, %v5177_v35 }
 0x901   : > { %v6924_v46 = vpop.eup %6923  ;;  %5303 = vst.msk [vmem:[%s8539_s18 + $0x10] sm:$0xff] %vm5300_vm8, %v6922_v21  ;;  %6943 = vpow2.f32 %v5238_v42  ;;  %v5180_v14 = vpop.xlane.xlu1 %5179 }
 0x902   : > { %v6926_v61 = vpop.eup %6925  ;;  %5301 = vst.msk [vmem:[%s8539_s18] sm:$0xff] %vm5300_vm8, %v6924_v46  ;;  %6945 = vpow2.f32 %v5244_v43  ;;  %v5246_v32 = vmul.f32 1.442695, %v5217_v13  ;;  %v5218_v50 = vsub.f32 0.0, %v5202_v11  ;;  %v5203_v53 = vadd.f32 %v8519_v57, %v5180_v14 }
 0x903   : > { %v6928_v22 = vpop.eup %6927  ;;  %v5256_v54 = vadd.f32 1.0, %v6926_v61 }
 0x904   : > { %v6930_v55 = vpop.eup %6929  ;;  %v5257_v47 = vadd.f32 1.0, %v6928_v22  ;;  %6947 = vpow2.f32 %v5246_v32  ;;  %v5248_v23 = vmul.f32 1.442695, %v5218_v50  ;;  %v5219_v0 = vsub.f32 0.0, %v5203_v53 }
 0x905   : > { %v6932_v5 = vpop.eup %6931  ;;  %5304 = vst.msk [vmem:[%s8539_s18 + $0x18] sm:$0xff] %vm5300_vm8, %v6930_v55  ;;  %6949 = vrcp.f32 %v5256_v54 }
 0x906   : > { %v6934_v1 = vpop.eup %6933  ;;  %5302 = vst.msk [vmem:[%s8539_s18 + $0x8] sm:$0xff] %vm5300_vm8, %v6932_v5  ;;  %6951 = vrcp.f32 %v5257_v47  ;;  %v5250_v37 = vmul.f32 1.442695, %v5219_v0 }
 0x907   : > { %v6936_v51 = vpop.eup %6935  ;;  %v5262_v57 = vadd.f32 1.0, %v6934_v1  ;;  %6953 = vpow2.f32 %v5248_v23 }
 0x908   : > { %v6938_v4 = vpop.eup %6937  ;;  %v5263_v17 = vadd.f32 1.0, %v6936_v51  ;;  %6955 = vpow2.f32 %v5250_v37 }
 0x909   : > { %v6940_v29 = vpop.eup %6939  ;;  %6957 = vrcp.f32 %v5262_v57  ;;  %v5260_v3 = vadd.f32 1.0, %v6938_v4 }
 0x90a   : > { %v6942_v62 = vpop.eup %6941  ;;  %5307 = vst.msk [vmem:[%s8539_s18 + $0x30] sm:$0xff] %vm5300_vm8, %v6940_v29  ;;  %6959 = vrcp.f32 %v5263_v17 }
 0x90b   : > { %v6944_v16 = vpop.eup %6943  ;;  %5308 = vst.msk [vmem:[%s8539_s18 + $0x38] sm:$0xff] %vm5300_vm8, %v6942_v62  ;;  %6961 = vrcp.f32 %v5260_v3 }
 0x90c   : > { %v6946_v56 = vpop.eup %6945  ;;  %v5261_v41 = vadd.f32 1.0, %v6944_v16 }
 0x90d   : > { %v5264_v6 = vadd.f32 1.0, %v6946_v56 }
 0x90e   : > { %v6948_v52 = vpop.eup %6947  ;;  %6963 = vrcp.f32 %v5261_v41 }
 0x90f   : > { %v6950_v59 = vpop.eup %6949  ;;  %6965 = vrcp.f32 %v5264_v6  ;;  %v5265_v9 = vadd.f32 1.0, %v6948_v52 }
 0x910   : > { %v6952_v10 = vpop.eup %6951  ;;  %5305 = vst.msk [vmem:[%s8539_s18 + $0x20] sm:$0xff] %vm5300_vm8, %v6950_v59 }
 0x911   : > { %v6954_v15 = vpop.eup %6953  ;;  %5306 = vst.msk [vmem:[%s8539_s18 + $0x28] sm:$0xff] %vm5300_vm8, %v6952_v10  ;;  %6967 = vrcp.f32 %v5265_v9 }
 0x912   : > { %v6956_v19 = vpop.eup %6955  ;;  %v5266_v20 = vadd.f32 1.0, %v6954_v15 }
 0x913   : > { %v6958_v18 = vpop.eup %6957  ;;  %v5267_v30 = vadd.f32 1.0, %v6956_v19 }
 0x914   : > { %v6960_v60 = vpop.eup %6959  ;;  %5311 = vst.msk [vmem:[%s8539_s18 + $0x50] sm:$0xff] %vm5300_vm8, %v6958_v18  ;;  %6969 = vrcp.f32 %v5266_v20 }
 0x915   : > { %v6962_v24 = vpop.eup %6961  ;;  %5312 = vst.msk [vmem:[%s8539_s18 + $0x58] sm:$0xff] %vm5300_vm8, %v6960_v60  ;;  %6971 = vrcp.f32 %v5267_v30 }
 0x916   : > { %5309 = vst.msk [vmem:[%s8539_s18 + $0x40] sm:$0xff] %vm5300_vm8, %v6962_v24 }
 0x918   : > { %v6964_v45 = vpop.eup %6963 }
 0x919   : > { %v6966_v31 = vpop.eup %6965  ;;  %5310 = vst.msk [vmem:[%s8539_s18 + $0x48] sm:$0xff] %vm5300_vm8, %v6964_v45 }
 0x91a   : > { %5313 = vst.msk [vmem:[%s8539_s18 + $0x60] sm:$0xff] %vm5300_vm8, %v6966_v31 }
 0x91b   : > { %v6968_v28 = vpop.eup %6967 }
 0x91c   : > { %5314 = vst.msk [vmem:[%s8539_s18 + $0x68] sm:$0xff] %vm5300_vm8, %v6968_v28 }
 0x91e   : > { %v6970_v49 = vpop.eup %6969 }
 0x91f   : > { %v6972_v38 = vpop.eup %6971  ;;  %5315 = vst.msk [vmem:[%s8539_s18 + $0x70] sm:$0xff] %vm5300_vm8, %v6970_v49 }
 0x920   : > { %5316 = vst.msk [vmem:[%s8539_s18 + $0x78] sm:$0xff] %vm5300_vm8, %v6972_v38 }
 0x921 PF: > { %s26_s21 = sadd.s32 1, %s6979_s21  }
 0x922   : > { %p23_p4 = scmp.ge.s32.totalorder %s26_s21, 4  }
 0x924   :  { %25 = sbr.rel (!%p23_p4) target bundleno = 2 (0x2), region = 120 }

</bundles_post_ra>
